<compile_context>
chip_gen: v7x
topology: tpu7x:2x2x1
jax: 0.10.0
libtpu: 0.0.40
codegen_flags: <defaults>
</compile_context>

<pallas_src>
import functools

import jax
import jax.numpy as jnp
import numpy as np
from jax.experimental import pallas as pl
from jax.experimental.pallas import tpu as pltpu

DIM = 128          # self.dim
FEAT_CH = 6        # feat_channel
FEAT_PAD = 8       # feat_channel padded for clean MXU K / lane layout
N_SEG = 3          # segments per polygon
N_PTS = 20         # points per segment
ROWS = N_SEG * N_PTS  # 60 rows per polygon
ALIGN = 16         # polygon-block alignment (keeps bf16 reshapes (16,128)-tile aligned)


def _round_up(x, m):
    return ((x + m - 1) // m) * m


def _tree_max(a):
    """Max over the leading axis of (T, R, C) via a balanced tree (depth ceil(log2 T))."""
    vals = [a[t] for t in range(a.shape[0])]
    while len(vals) > 1:
        nxt = [jnp.maximum(vals[i], vals[i + 1]) for i in range(0, len(vals) - 1, 2)]
        if len(vals) % 2:
            nxt.append(vals[-1])
        vals = nxt
    return vals[0]


def _points_encoder_kernel(x_ref,
                           w1_ref, b1_ref, w2_ref,
                           w3a_ref, w3b_ref, c3_ref,
                           w4_ref, w5_ref, c5_ref,
                           w6_ref, b6_ref,
                           o_ref):
    """One grid step = P polygons.

    x_ref: (1, 60*P, 8) bf16, in-block row = t*(3P) + s*P + p
    o_ref: (P, DIM) f32
    """
    P = o_ref.shape[0]
    SP = N_SEG * P                      # 3P (segment, polygon) rows
    R = N_PTS * SP                      # 60P point rows

    x = x_ref[0]                        # (60P, 8) bf16, no in-kernel relayout

    def dot(a, w_ref):
        # bf16 MXU inputs, f32 accumulation.
        return jnp.dot(a, w_ref[...], preferred_element_type=jnp.float32)

    # ---- first_mlp: Linear(6->128) [BN folded] + ReLU + Linear(128->256) [b2 folded out] ----
    h = jnp.maximum(dot(x, w1_ref) + b1_ref[...], 0.0).astype(jnp.bfloat16)   # (60P, 128)
    h1 = dot(h, w2_ref).astype(jnp.bfloat16)                                  # (60P, 256)

    # ---- per-segment max over the 20 points (leading-dim tree reduce, bf16) ----
    pooled = _tree_max(h1.reshape(N_PTS, SP, 256))                            # (3P, 256)

    # ---- second_mlp: Linear(512->256) [BN folded, w3 split, b2/b3 -> c3] + ReLU ----
    t1 = dot(h1, w3a_ref)                                                     # (60P, 256) f32
    t2 = dot(pooled, w3b_ref) + c3_ref[...]                                   # (3P, 256)  f32
    h = jnp.maximum(t1.reshape(N_PTS, SP, 256) + t2[None], 0.0)
    h = h.astype(jnp.bfloat16).reshape(R, 256)                                # (60P, 256) bf16
    # Linear(256->128); b4 folded into c5 (exact across the segment max).
    h2 = dot(h, w4_ref).astype(jnp.bfloat16)                                  # (60P, 128)

    # ---- per-segment max over the 20 points ----
    res = _tree_max(h2.reshape(N_PTS, SP, DIM))                               # (3P, 128) bf16

    # ---- third_mlp: Linear(128->256) [BN + b4 folded into c5] + ReLU + Linear(256->128) ----
    h = jnp.maximum(dot(res, w5_ref) + c5_ref[...], 0.0).astype(jnp.bfloat16) # (3P, 256)
    h3 = dot(h, w6_ref)                                                       # (3P, 128) f32

    # ---- per-polygon max over the 3 segments; b6 added after the max (exact) ----
    out = _tree_max(h3.reshape(N_SEG, P, DIM)) + b6_ref[...]                  # (P, 128) f32
    o_ref[...] = out.astype(o_ref.dtype)


@functools.partial(jax.jit, static_argnames=("block_polys",))
def points_encoder_pallas(polygon_feature, params, block_polys=64):
    """polygon_feature: (bs, M, 3, 20, FEAT_CH) float32 -> (bs, M, DIM) float32."""
    bs, M = polygon_feature.shape[:2]
    n_poly = bs * M
    assert block_polys >= ALIGN and block_polys % ALIGN == 0, \
        "block_polys must be a multiple of 16"

    (w1, b1, w2, b2, w3, b3, w4, b4, w5, b5, w6, b6) = params

    # ---- choose the per-step polygon block P (all static at trace time) ----
    n_a = _round_up(n_poly, ALIGN)
    P = min(block_polys, n_a)
    if n_a > ALIGN and n_a <= P:
        # A single block would cover everything: split into >=2 grid steps so both
        # v7x TensorCores get work (harmless elsewhere).
        P = _round_up((n_a + 1) // 2, ALIGN)
    n_pad = _round_up(n_poly, P)
    n_blocks = n_pad // P

    # ---- point-major, block-major input layout: (n_blocks, 60*P, FEAT_PAD) bf16 ----
    # in-block row = t*(3P) + s*P + p  (t = point, s = segment, p = polygon in block)
    x = jnp.transpose(polygon_feature, (3, 2, 0, 1, 4)).reshape(ROWS, n_poly, FEAT_CH)
    x = jnp.pad(x, ((0, 0), (0, n_pad - n_poly), (0, FEAT_PAD - FEAT_CH)))
    x = x.reshape(ROWS, n_blocks, P, FEAT_PAD).transpose(1, 0, 2, 3)
    x = x.reshape(n_blocks, ROWS * P, FEAT_PAD).astype(jnp.bfloat16)

    # ---- weight preprocessing: pad K of w1, split w3, fold bias constants ----
    w1p = jnp.pad(w1, ((0, FEAT_PAD - FEAT_CH), (0, 0)))
    w3a, w3b = w3[:256], w3[256:]
    c3 = b2 @ (w3a + w3b) + b3          # (1,256) — added to the pooled branch only (exact)
    c5 = b4 @ w5 + b5                   # (1,256) — b4 folded through the segment max (exact)
    bf = lambda w: w.astype(jnp.bfloat16)
    weights = (bf(w1p), b1, bf(w2), bf(w3a), bf(w3b), c3,
               bf(w4), bf(w5), c5, bf(w6), b6)

    def rep(a):
        zeros = (0,) * a.ndim
        return pl.BlockSpec(a.shape, lambda i, zeros=zeros: zeros)

    # ~0.45 MiB VMEM per polygon per step (bf16 intermediates + double-buffered input and
    # weights); raise the small v5e scoped default but stay well under v7x's 64 MiB physical.
    vmem_limit_bytes = int(min(8 * 2**20 + P * 480 * 1024, 48 * 2**20))

    out = pl.pallas_call(
        _points_encoder_kernel,
        out_shape=jax.ShapeDtypeStruct((n_pad, DIM), jnp.float32),
        grid_spec=pltpu.PrefetchScalarGridSpec(
            num_scalar_prefetch=0,
            grid=(n_blocks,),
            in_specs=[pl.BlockSpec((1, ROWS * P, FEAT_PAD), lambda i: (i, 0, 0))]
                     + [rep(w) for w in weights],
            out_specs=pl.BlockSpec((P, DIM), lambda i: (i, 0)),
        ),
        compiler_params=pltpu.CompilerParams(
            dimension_semantics=("parallel",),
            vmem_limit_bytes=vmem_limit_bytes),
    )(x, *weights)

    return out[:n_poly].reshape(bs, M, DIM)


# ---------------------------------------------------------------------------
# Deterministic parameter construction (synthetic weights; eval-mode BN folded).
# ---------------------------------------------------------------------------
def _linear_params(key, fan_in, fan_out):
    kw, kb = jax.random.split(key)
    bound = 1.0 / np.sqrt(fan_in)
    w = jax.random.uniform(kw, (fan_in, fan_out), jnp.float32, -bound, bound)
    b = jax.random.uniform(kb, (1, fan_out), jnp.float32, -bound, bound)
    return w, b


def _bn_params(key, n):
    kg, kb, km, kv = jax.random.split(key, 4)
    gamma = 1.0 + 0.1 * jax.random.normal(kg, (n,), jnp.float32)
    beta = 0.1 * jax.random.normal(kb, (n,), jnp.float32)
    mean = 0.1 * jax.random.normal(km, (n,), jnp.float32)
    var = 1.0 + 0.1 * jnp.abs(jax.random.normal(kv, (n,), jnp.float32))
    return gamma, beta, mean, var


def _fold_bn(w, b, bn, eps=1e-5):
    """Fold eval-mode BatchNorm1d (after the linear) into the linear itself."""
    gamma, beta, mean, var = bn
    scale = gamma / jnp.sqrt(var + eps)
    w_f = w * scale[None, :]
    b_f = (b - mean[None, :]) * scale[None, :] + beta[None, :]
    return w_f, b_f


def make_params(key):
    keys = jax.random.split(key, 9)
    # first_mlp
    w1, b1 = _linear_params(keys[0], FEAT_CH, 128)
    bn1 = _bn_params(keys[1], 128)
    w2, b2 = _linear_params(keys[2], 128, 256)
    # second_mlp
    w3, b3 = _linear_params(keys[3], 512, 256)
    bn2 = _bn_params(keys[4], 256)
    w4, b4 = _linear_params(keys[5], 256, DIM)
    # third_mlp
    w5, b5 = _linear_params(keys[6], DIM, 256)
    bn3 = _bn_params(keys[7], 256)
    w6, b6 = _linear_params(keys[8], 256, DIM)

    w1f, b1f = _fold_bn(w1, b1, bn1)
    w3f, b3f = _fold_bn(w3, b3, bn2)
    w5f, b5f = _fold_bn(w5, b5, bn3)
    return (w1f, b1f, w2, b2, w3f, b3f, w4, b4, w5f, b5f, w6, b6)


# ---------------------------------------------------------------------------
# Pure-JAX reference (mirrors the PyTorch forward, eval-mode BN folded, f32).
# ---------------------------------------------------------------------------
def points_encoder_ref(polygon_feature, params):
    (w1, b1, w2, b2, w3, b3, w4, b4, w5, b5, w6, b6) = params
    bs, M = polygon_feature.shape[:2]
    x = polygon_feature.reshape(-1, FEAT_CH)
    h = jnp.maximum(x @ w1 + b1, 0.0)
    h1 = (h @ w2 + b2).reshape(bs, M, N_SEG, N_PTS, 256)
    pooled = jnp.max(h1, axis=-2, keepdims=True)
    feat = jnp.concatenate(
        [h1, jnp.broadcast_to(pooled, h1.shape)], axis=-1).reshape(-1, 512)
    h = jnp.maximum(feat @ w3 + b3, 0.0)
    h2 = (h @ w4 + b4).reshape(bs, M, N_SEG, N_PTS, DIM)
    res = jnp.max(h2, axis=-2).reshape(-1, DIM)
    h = jnp.maximum(res @ w5 + b5, 0.0)
    h3 = (h @ w6 + b6).reshape(bs, M, N_SEG, DIM)
    return jnp.max(h3, axis=-2)


if __name__ == "__main__":
    key = jax.random.PRNGKey(0)
    k_params, k_x1, k_x2, k_x3 = jax.random.split(key, 4)
    params = make_params(k_params)

    # Case 1: tiny (single block).  Case 2: exercises the 2-step split heuristic + tail pad.
    # Case 3: exercises the full block_polys=64 path with multi-step grid + tail pad.
    for (bs, M), kx in (((2, 4), k_x1), ((2, 20), k_x2), ((3, 30), k_x3)):
        polygon_feature = jax.random.normal(
            kx, (bs, M, N_SEG, N_PTS, FEAT_CH), jnp.float32)

        out = jax.block_until_ready(points_encoder_pallas(polygon_feature, params))
        ref = jax.block_until_ready(points_encoder_ref(polygon_feature, params))

        assert out.shape == (bs, M, DIM), out.shape
        assert bool(jnp.all(jnp.isfinite(out)))
        # bf16 MXU inputs / bf16 intermediates vs f32 reference -> relaxed tolerance.
        np.testing.assert_allclose(np.asarray(out), np.asarray(ref),
                                   rtol=2e-2, atol=2e-2)

    print("KERNEL_OK")
</pallas_src>

<mosaic_0001>
module attributes {stable_mosaic.version = 11 : i64} {
  func.func @_points_encoder_kernel(%arg0: i32, %arg1: memref<1x960x8xbf16, #tpu.memory_space<vmem>>, %arg2: memref<8x128xbf16, #tpu.memory_space<vmem>>, %arg3: memref<1x128xf32, #tpu.memory_space<vmem>>, %arg4: memref<128x256xbf16, #tpu.memory_space<vmem>>, %arg5: memref<256x256xbf16, #tpu.memory_space<vmem>>, %arg6: memref<256x256xbf16, #tpu.memory_space<vmem>>, %arg7: memref<1x256xf32, #tpu.memory_space<vmem>>, %arg8: memref<256x128xbf16, #tpu.memory_space<vmem>>, %arg9: memref<128x256xbf16, #tpu.memory_space<vmem>>, %arg10: memref<1x256xf32, #tpu.memory_space<vmem>>, %arg11: memref<256x128xbf16, #tpu.memory_space<vmem>>, %arg12: memref<1x128xf32, #tpu.memory_space<vmem>>, %arg13: memref<16x128xf32, #tpu.memory_space<vmem>>) attributes {dimension_semantics = [#tpu.dimension_semantics<parallel>], iteration_bounds = array<i64: 1>, scalar_prefetch = 0 : i64, scratch_operands = 0 : i64, tpu.core_type = #tpu.core_type<tc>, window_params = [{transform_indices = @transform_0, window_bounds = array<i64: 1, 960, 8>}, {pipeline_mode = #tpu.pipeline_mode<synchronous>, transform_indices = @transform_1, window_bounds = array<i64: 8, 128>}, {pipeline_mode = #tpu.pipeline_mode<synchronous>, transform_indices = @transform_2, window_bounds = array<i64: 1, 128>}, {pipeline_mode = #tpu.pipeline_mode<synchronous>, transform_indices = @transform_3, window_bounds = array<i64: 128, 256>}, {pipeline_mode = #tpu.pipeline_mode<synchronous>, transform_indices = @transform_4, window_bounds = array<i64: 256, 256>}, {pipeline_mode = #tpu.pipeline_mode<synchronous>, transform_indices = @transform_5, window_bounds = array<i64: 256, 256>}, {pipeline_mode = #tpu.pipeline_mode<synchronous>, transform_indices = @transform_6, window_bounds = array<i64: 1, 256>}, {pipeline_mode = #tpu.pipeline_mode<synchronous>, transform_indices = @transform_7, window_bounds = array<i64: 256, 128>}, {pipeline_mode = #tpu.pipeline_mode<synchronous>, transform_indices = @transform_8, window_bounds = array<i64: 128, 256>}, {pipeline_mode = #tpu.pipeline_mode<synchronous>, transform_indices = @transform_9, window_bounds = array<i64: 1, 256>}, {pipeline_mode = #tpu.pipeline_mode<synchronous>, transform_indices = @transform_10, window_bounds = array<i64: 256, 128>}, {pipeline_mode = #tpu.pipeline_mode<synchronous>, transform_indices = @transform_11, window_bounds = array<i64: 1, 128>}, {transform_indices = @transform_12, window_bounds = array<i64: 16, 128>}]} {
    %c0 = arith.constant 0 : index
    %c0_0 = arith.constant 0 : index
    %c0_1 = arith.constant 0 : index
    %0 = vector.load %arg1[%c0, %c0_0, %c0_1] : memref<1x960x8xbf16, #tpu.memory_space<vmem>>, vector<1x960x8xbf16>
    %1 = vector.shape_cast %0 : vector<1x960x8xbf16> to vector<960x8xbf16>
    %c0_2 = arith.constant 0 : index
    %c0_3 = arith.constant 0 : index
    %2 = vector.load %arg2[%c0_2, %c0_3] : memref<8x128xbf16, #tpu.memory_space<vmem>>, vector<8x128xbf16>
    %cst = arith.constant dense<0.000000e+00> : vector<960x128xf32>
    %3 = tpu.matmul %1, %2, %cst {dimension_numbers = #tpu.dot_dimension_numbers<[1], [0], [0], [1], [0, 0, 1, 1], [], []>} : vector<960x8xbf16>, vector<8x128xbf16>, vector<960x128xf32> -> vector<960x128xf32>
    %c0_4 = arith.constant 0 : index
    %c0_5 = arith.constant 0 : index
    %4 = vector.load %arg3[%c0_4, %c0_5] : memref<1x128xf32, #tpu.memory_space<vmem>>, vector<1x128xf32>
    %5 = vector.broadcast %4 : vector<1x128xf32> to vector<960x128xf32>
    %6 = arith.addf %3, %5 : vector<960x128xf32>
    %cst_6 = arith.constant 0.000000e+00 : f32
    %7 = vector.broadcast %cst_6 : f32 to vector<960x128xf32>
    %8 = arith.maximumf %6, %7 : vector<960x128xf32>
    %9 = arith.truncf %8 : vector<960x128xf32> to vector<960x128xbf16>
    %c0_7 = arith.constant 0 : index
    %c0_8 = arith.constant 0 : index
    %10 = vector.load %arg4[%c0_7, %c0_8] : memref<128x256xbf16, #tpu.memory_space<vmem>>, vector<128x256xbf16>
    %cst_9 = arith.constant dense<0.000000e+00> : vector<960x256xf32>
    %11 = tpu.matmul %9, %10, %cst_9 {dimension_numbers = #tpu.dot_dimension_numbers<[1], [0], [0], [1], [0, 0, 1, 1], [], []>} : vector<960x128xbf16>, vector<128x256xbf16>, vector<960x256xf32> -> vector<960x256xf32>
    %12 = arith.truncf %11 : vector<960x256xf32> to vector<960x256xbf16>
    %13 = vector.shape_cast %12 : vector<960x256xbf16> to vector<20x48x256xbf16>
    %14 = vector.extract_strided_slice %13 {offsets = [0, 0, 0], sizes = [1, 48, 256], strides = [1, 1, 1]} : vector<20x48x256xbf16> to vector<1x48x256xbf16>
    %15 = vector.shape_cast %14 : vector<1x48x256xbf16> to vector<48x256xbf16>
    %16 = vector.extract_strided_slice %13 {offsets = [1, 0, 0], sizes = [1, 48, 256], strides = [1, 1, 1]} : vector<20x48x256xbf16> to vector<1x48x256xbf16>
    %17 = vector.shape_cast %16 : vector<1x48x256xbf16> to vector<48x256xbf16>
    %18 = vector.extract_strided_slice %13 {offsets = [2, 0, 0], sizes = [1, 48, 256], strides = [1, 1, 1]} : vector<20x48x256xbf16> to vector<1x48x256xbf16>
    %19 = vector.shape_cast %18 : vector<1x48x256xbf16> to vector<48x256xbf16>
    %20 = vector.extract_strided_slice %13 {offsets = [3, 0, 0], sizes = [1, 48, 256], strides = [1, 1, 1]} : vector<20x48x256xbf16> to vector<1x48x256xbf16>
    %21 = vector.shape_cast %20 : vector<1x48x256xbf16> to vector<48x256xbf16>
    %22 = vector.extract_strided_slice %13 {offsets = [4, 0, 0], sizes = [1, 48, 256], strides = [1, 1, 1]} : vector<20x48x256xbf16> to vector<1x48x256xbf16>
    %23 = vector.shape_cast %22 : vector<1x48x256xbf16> to vector<48x256xbf16>
    %24 = vector.extract_strided_slice %13 {offsets = [5, 0, 0], sizes = [1, 48, 256], strides = [1, 1, 1]} : vector<20x48x256xbf16> to vector<1x48x256xbf16>
    %25 = vector.shape_cast %24 : vector<1x48x256xbf16> to vector<48x256xbf16>
    %26 = vector.extract_strided_slice %13 {offsets = [6, 0, 0], sizes = [1, 48, 256], strides = [1, 1, 1]} : vector<20x48x256xbf16> to vector<1x48x256xbf16>
    %27 = vector.shape_cast %26 : vector<1x48x256xbf16> to vector<48x256xbf16>
    %28 = vector.extract_strided_slice %13 {offsets = [7, 0, 0], sizes = [1, 48, 256], strides = [1, 1, 1]} : vector<20x48x256xbf16> to vector<1x48x256xbf16>
    %29 = vector.shape_cast %28 : vector<1x48x256xbf16> to vector<48x256xbf16>
    %30 = vector.extract_strided_slice %13 {offsets = [8, 0, 0], sizes = [1, 48, 256], strides = [1, 1, 1]} : vector<20x48x256xbf16> to vector<1x48x256xbf16>
    %31 = vector.shape_cast %30 : vector<1x48x256xbf16> to vector<48x256xbf16>
    %32 = vector.extract_strided_slice %13 {offsets = [9, 0, 0], sizes = [1, 48, 256], strides = [1, 1, 1]} : vector<20x48x256xbf16> to vector<1x48x256xbf16>
    %33 = vector.shape_cast %32 : vector<1x48x256xbf16> to vector<48x256xbf16>
    %34 = vector.extract_strided_slice %13 {offsets = [10, 0, 0], sizes = [1, 48, 256], strides = [1, 1, 1]} : vector<20x48x256xbf16> to vector<1x48x256xbf16>
    %35 = vector.shape_cast %34 : vector<1x48x256xbf16> to vector<48x256xbf16>
    %36 = vector.extract_strided_slice %13 {offsets = [11, 0, 0], sizes = [1, 48, 256], strides = [1, 1, 1]} : vector<20x48x256xbf16> to vector<1x48x256xbf16>
    %37 = vector.shape_cast %36 : vector<1x48x256xbf16> to vector<48x256xbf16>
    %38 = vector.extract_strided_slice %13 {offsets = [12, 0, 0], sizes = [1, 48, 256], strides = [1, 1, 1]} : vector<20x48x256xbf16> to vector<1x48x256xbf16>
    %39 = vector.shape_cast %38 : vector<1x48x256xbf16> to vector<48x256xbf16>
    %40 = vector.extract_strided_slice %13 {offsets = [13, 0, 0], sizes = [1, 48, 256], strides = [1, 1, 1]} : vector<20x48x256xbf16> to vector<1x48x256xbf16>
    %41 = vector.shape_cast %40 : vector<1x48x256xbf16> to vector<48x256xbf16>
    %42 = vector.extract_strided_slice %13 {offsets = [14, 0, 0], sizes = [1, 48, 256], strides = [1, 1, 1]} : vector<20x48x256xbf16> to vector<1x48x256xbf16>
    %43 = vector.shape_cast %42 : vector<1x48x256xbf16> to vector<48x256xbf16>
    %44 = vector.extract_strided_slice %13 {offsets = [15, 0, 0], sizes = [1, 48, 256], strides = [1, 1, 1]} : vector<20x48x256xbf16> to vector<1x48x256xbf16>
    %45 = vector.shape_cast %44 : vector<1x48x256xbf16> to vector<48x256xbf16>
    %46 = vector.extract_strided_slice %13 {offsets = [16, 0, 0], sizes = [1, 48, 256], strides = [1, 1, 1]} : vector<20x48x256xbf16> to vector<1x48x256xbf16>
    %47 = vector.shape_cast %46 : vector<1x48x256xbf16> to vector<48x256xbf16>
    %48 = vector.extract_strided_slice %13 {offsets = [17, 0, 0], sizes = [1, 48, 256], strides = [1, 1, 1]} : vector<20x48x256xbf16> to vector<1x48x256xbf16>
    %49 = vector.shape_cast %48 : vector<1x48x256xbf16> to vector<48x256xbf16>
    %50 = vector.extract_strided_slice %13 {offsets = [18, 0, 0], sizes = [1, 48, 256], strides = [1, 1, 1]} : vector<20x48x256xbf16> to vector<1x48x256xbf16>
    %51 = vector.shape_cast %50 : vector<1x48x256xbf16> to vector<48x256xbf16>
    %52 = vector.extract_strided_slice %13 {offsets = [19, 0, 0], sizes = [1, 48, 256], strides = [1, 1, 1]} : vector<20x48x256xbf16> to vector<1x48x256xbf16>
    %53 = vector.shape_cast %52 : vector<1x48x256xbf16> to vector<48x256xbf16>
    %54 = arith.maximumf %15, %17 : vector<48x256xbf16>
    %55 = arith.maximumf %19, %21 : vector<48x256xbf16>
    %56 = arith.maximumf %23, %25 : vector<48x256xbf16>
    %57 = arith.maximumf %27, %29 : vector<48x256xbf16>
    %58 = arith.maximumf %31, %33 : vector<48x256xbf16>
    %59 = arith.maximumf %35, %37 : vector<48x256xbf16>
    %60 = arith.maximumf %39, %41 : vector<48x256xbf16>
    %61 = arith.maximumf %43, %45 : vector<48x256xbf16>
    %62 = arith.maximumf %47, %49 : vector<48x256xbf16>
    %63 = arith.maximumf %51, %53 : vector<48x256xbf16>
    %64 = arith.maximumf %54, %55 : vector<48x256xbf16>
    %65 = arith.maximumf %56, %57 : vector<48x256xbf16>
    %66 = arith.maximumf %58, %59 : vector<48x256xbf16>
    %67 = arith.maximumf %60, %61 : vector<48x256xbf16>
    %68 = arith.maximumf %62, %63 : vector<48x256xbf16>
    %69 = arith.maximumf %64, %65 : vector<48x256xbf16>
    %70 = arith.maximumf %66, %67 : vector<48x256xbf16>
    %71 = arith.maximumf %69, %70 : vector<48x256xbf16>
    %72 = arith.maximumf %71, %68 : vector<48x256xbf16>
    %c0_10 = arith.constant 0 : index
    %c0_11 = arith.constant 0 : index
    %73 = vector.load %arg5[%c0_10, %c0_11] : memref<256x256xbf16, #tpu.memory_space<vmem>>, vector<256x256xbf16>
    %cst_12 = arith.constant dense<0.000000e+00> : vector<960x256xf32>
    %74 = tpu.matmul %12, %73, %cst_12 {dimension_numbers = #tpu.dot_dimension_numbers<[1], [0], [0], [1], [0, 0, 1, 1], [], []>} : vector<960x256xbf16>, vector<256x256xbf16>, vector<960x256xf32> -> vector<960x256xf32>
    %c0_13 = arith.constant 0 : index
    %c0_14 = arith.constant 0 : index
    %75 = vector.load %arg6[%c0_13, %c0_14] : memref<256x256xbf16, #tpu.memory_space<vmem>>, vector<256x256xbf16>
    %cst_15 = arith.constant dense<0.000000e+00> : vector<48x256xf32>
    %76 = tpu.matmul %72, %75, %cst_15 {dimension_numbers = #tpu.dot_dimension_numbers<[1], [0], [0], [1], [0, 0, 1, 1], [], []>} : vector<48x256xbf16>, vector<256x256xbf16>, vector<48x256xf32> -> vector<48x256xf32>
    %c0_16 = arith.constant 0 : index
    %c0_17 = arith.constant 0 : index
    %77 = vector.load %arg7[%c0_16, %c0_17] : memref<1x256xf32, #tpu.memory_space<vmem>>, vector<1x256xf32>
    %78 = vector.broadcast %77 : vector<1x256xf32> to vector<48x256xf32>
    %79 = arith.addf %76, %78 : vector<48x256xf32>
    %80 = vector.shape_cast %74 : vector<960x256xf32> to vector<20x48x256xf32>
    %81 = vector.shape_cast %79 : vector<48x256xf32> to vector<1x48x256xf32>
    %82 = vector.broadcast %81 : vector<1x48x256xf32> to vector<20x48x256xf32>
    %83 = arith.addf %80, %82 : vector<20x48x256xf32>
    %cst_18 = arith.constant 0.000000e+00 : f32
    %84 = vector.broadcast %cst_18 : f32 to vector<20x48x256xf32>
    %85 = arith.maximumf %83, %84 : vector<20x48x256xf32>
    %86 = arith.truncf %85 : vector<20x48x256xf32> to vector<20x48x256xbf16>
    %87 = vector.shape_cast %86 : vector<20x48x256xbf16> to vector<960x256xbf16>
    %c0_19 = arith.constant 0 : index
    %c0_20 = arith.constant 0 : index
    %88 = vector.load %arg8[%c0_19, %c0_20] : memref<256x128xbf16, #tpu.memory_space<vmem>>, vector<256x128xbf16>
    %cst_21 = arith.constant dense<0.000000e+00> : vector<960x128xf32>
    %89 = tpu.matmul %87, %88, %cst_21 {dimension_numbers = #tpu.dot_dimension_numbers<[1], [0], [0], [1], [0, 0, 1, 1], [], []>} : vector<960x256xbf16>, vector<256x128xbf16>, vector<960x128xf32> -> vector<960x128xf32>
    %90 = arith.truncf %89 : vector<960x128xf32> to vector<960x128xbf16>
    %91 = vector.shape_cast %90 : vector<960x128xbf16> to vector<20x48x128xbf16>
    %92 = vector.extract_strided_slice %91 {offsets = [0, 0, 0], sizes = [1, 48, 128], strides = [1, 1, 1]} : vector<20x48x128xbf16> to vector<1x48x128xbf16>
    %93 = vector.shape_cast %92 : vector<1x48x128xbf16> to vector<48x128xbf16>
    %94 = vector.extract_strided_slice %91 {offsets = [1, 0, 0], sizes = [1, 48, 128], strides = [1, 1, 1]} : vector<20x48x128xbf16> to vector<1x48x128xbf16>
    %95 = vector.shape_cast %94 : vector<1x48x128xbf16> to vector<48x128xbf16>
    %96 = vector.extract_strided_slice %91 {offsets = [2, 0, 0], sizes = [1, 48, 128], strides = [1, 1, 1]} : vector<20x48x128xbf16> to vector<1x48x128xbf16>
    %97 = vector.shape_cast %96 : vector<1x48x128xbf16> to vector<48x128xbf16>
    %98 = vector.extract_strided_slice %91 {offsets = [3, 0, 0], sizes = [1, 48, 128], strides = [1, 1, 1]} : vector<20x48x128xbf16> to vector<1x48x128xbf16>
    %99 = vector.shape_cast %98 : vector<1x48x128xbf16> to vector<48x128xbf16>
    %100 = vector.extract_strided_slice %91 {offsets = [4, 0, 0], sizes = [1, 48, 128], strides = [1, 1, 1]} : vector<20x48x128xbf16> to vector<1x48x128xbf16>
    %101 = vector.shape_cast %100 : vector<1x48x128xbf16> to vector<48x128xbf16>
    %102 = vector.extract_strided_slice %91 {offsets = [5, 0, 0], sizes = [1, 48, 128], strides = [1, 1, 1]} : vector<20x48x128xbf16> to vector<1x48x128xbf16>
    %103 = vector.shape_cast %102 : vector<1x48x128xbf16> to vector<48x128xbf16>
    %104 = vector.extract_strided_slice %91 {offsets = [6, 0, 0], sizes = [1, 48, 128], strides = [1, 1, 1]} : vector<20x48x128xbf16> to vector<1x48x128xbf16>
    %105 = vector.shape_cast %104 : vector<1x48x128xbf16> to vector<48x128xbf16>
    %106 = vector.extract_strided_slice %91 {offsets = [7, 0, 0], sizes = [1, 48, 128], strides = [1, 1, 1]} : vector<20x48x128xbf16> to vector<1x48x128xbf16>
    %107 = vector.shape_cast %106 : vector<1x48x128xbf16> to vector<48x128xbf16>
    %108 = vector.extract_strided_slice %91 {offsets = [8, 0, 0], sizes = [1, 48, 128], strides = [1, 1, 1]} : vector<20x48x128xbf16> to vector<1x48x128xbf16>
    %109 = vector.shape_cast %108 : vector<1x48x128xbf16> to vector<48x128xbf16>
    %110 = vector.extract_strided_slice %91 {offsets = [9, 0, 0], sizes = [1, 48, 128], strides = [1, 1, 1]} : vector<20x48x128xbf16> to vector<1x48x128xbf16>
    %111 = vector.shape_cast %110 : vector<1x48x128xbf16> to vector<48x128xbf16>
    %112 = vector.extract_strided_slice %91 {offsets = [10, 0, 0], sizes = [1, 48, 128], strides = [1, 1, 1]} : vector<20x48x128xbf16> to vector<1x48x128xbf16>
    %113 = vector.shape_cast %112 : vector<1x48x128xbf16> to vector<48x128xbf16>
    %114 = vector.extract_strided_slice %91 {offsets = [11, 0, 0], sizes = [1, 48, 128], strides = [1, 1, 1]} : vector<20x48x128xbf16> to vector<1x48x128xbf16>
    %115 = vector.shape_cast %114 : vector<1x48x128xbf16> to vector<48x128xbf16>
    %116 = vector.extract_strided_slice %91 {offsets = [12, 0, 0], sizes = [1, 48, 128], strides = [1, 1, 1]} : vector<20x48x128xbf16> to vector<1x48x128xbf16>
    %117 = vector.shape_cast %116 : vector<1x48x128xbf16> to vector<48x128xbf16>
    %118 = vector.extract_strided_slice %91 {offsets = [13, 0, 0], sizes = [1, 48, 128], strides = [1, 1, 1]} : vector<20x48x128xbf16> to vector<1x48x128xbf16>
    %119 = vector.shape_cast %118 : vector<1x48x128xbf16> to vector<48x128xbf16>
    %120 = vector.extract_strided_slice %91 {offsets = [14, 0, 0], sizes = [1, 48, 128], strides = [1, 1, 1]} : vector<20x48x128xbf16> to vector<1x48x128xbf16>
    %121 = vector.shape_cast %120 : vector<1x48x128xbf16> to vector<48x128xbf16>
    %122 = vector.extract_strided_slice %91 {offsets = [15, 0, 0], sizes = [1, 48, 128], strides = [1, 1, 1]} : vector<20x48x128xbf16> to vector<1x48x128xbf16>
    %123 = vector.shape_cast %122 : vector<1x48x128xbf16> to vector<48x128xbf16>
    %124 = vector.extract_strided_slice %91 {offsets = [16, 0, 0], sizes = [1, 48, 128], strides = [1, 1, 1]} : vector<20x48x128xbf16> to vector<1x48x128xbf16>
    %125 = vector.shape_cast %124 : vector<1x48x128xbf16> to vector<48x128xbf16>
    %126 = vector.extract_strided_slice %91 {offsets = [17, 0, 0], sizes = [1, 48, 128], strides = [1, 1, 1]} : vector<20x48x128xbf16> to vector<1x48x128xbf16>
    %127 = vector.shape_cast %126 : vector<1x48x128xbf16> to vector<48x128xbf16>
    %128 = vector.extract_strided_slice %91 {offsets = [18, 0, 0], sizes = [1, 48, 128], strides = [1, 1, 1]} : vector<20x48x128xbf16> to vector<1x48x128xbf16>
    %129 = vector.shape_cast %128 : vector<1x48x128xbf16> to vector<48x128xbf16>
    %130 = vector.extract_strided_slice %91 {offsets = [19, 0, 0], sizes = [1, 48, 128], strides = [1, 1, 1]} : vector<20x48x128xbf16> to vector<1x48x128xbf16>
    %131 = vector.shape_cast %130 : vector<1x48x128xbf16> to vector<48x128xbf16>
    %132 = arith.maximumf %93, %95 : vector<48x128xbf16>
    %133 = arith.maximumf %97, %99 : vector<48x128xbf16>
    %134 = arith.maximumf %101, %103 : vector<48x128xbf16>
    %135 = arith.maximumf %105, %107 : vector<48x128xbf16>
    %136 = arith.maximumf %109, %111 : vector<48x128xbf16>
    %137 = arith.maximumf %113, %115 : vector<48x128xbf16>
    %138 = arith.maximumf %117, %119 : vector<48x128xbf16>
    %139 = arith.maximumf %121, %123 : vector<48x128xbf16>
    %140 = arith.maximumf %125, %127 : vector<48x128xbf16>
    %141 = arith.maximumf %129, %131 : vector<48x128xbf16>
    %142 = arith.maximumf %132, %133 : vector<48x128xbf16>
    %143 = arith.maximumf %134, %135 : vector<48x128xbf16>
    %144 = arith.maximumf %136, %137 : vector<48x128xbf16>
    %145 = arith.maximumf %138, %139 : vector<48x128xbf16>
    %146 = arith.maximumf %140, %141 : vector<48x128xbf16>
    %147 = arith.maximumf %142, %143 : vector<48x128xbf16>
    %148 = arith.maximumf %144, %145 : vector<48x128xbf16>
    %149 = arith.maximumf %147, %148 : vector<48x128xbf16>
    %150 = arith.maximumf %149, %146 : vector<48x128xbf16>
    %c0_22 = arith.constant 0 : index
    %c0_23 = arith.constant 0 : index
    %151 = vector.load %arg9[%c0_22, %c0_23] : memref<128x256xbf16, #tpu.memory_space<vmem>>, vector<128x256xbf16>
    %cst_24 = arith.constant dense<0.000000e+00> : vector<48x256xf32>
    %152 = tpu.matmul %150, %151, %cst_24 {dimension_numbers = #tpu.dot_dimension_numbers<[1], [0], [0], [1], [0, 0, 1, 1], [], []>} : vector<48x128xbf16>, vector<128x256xbf16>, vector<48x256xf32> -> vector<48x256xf32>
    %c0_25 = arith.constant 0 : index
    %c0_26 = arith.constant 0 : index
    %153 = vector.load %arg10[%c0_25, %c0_26] : memref<1x256xf32, #tpu.memory_space<vmem>>, vector<1x256xf32>
    %154 = vector.broadcast %153 : vector<1x256xf32> to vector<48x256xf32>
    %155 = arith.addf %152, %154 : vector<48x256xf32>
    %cst_27 = arith.constant 0.000000e+00 : f32
    %156 = vector.broadcast %cst_27 : f32 to vector<48x256xf32>
    %157 = arith.maximumf %155, %156 : vector<48x256xf32>
    %158 = arith.truncf %157 : vector<48x256xf32> to vector<48x256xbf16>
    %c0_28 = arith.constant 0 : index
    %c0_29 = arith.constant 0 : index
    %159 = vector.load %arg11[%c0_28, %c0_29] : memref<256x128xbf16, #tpu.memory_space<vmem>>, vector<256x128xbf16>
    %cst_30 = arith.constant dense<0.000000e+00> : vector<48x128xf32>
    %160 = tpu.matmul %158, %159, %cst_30 {dimension_numbers = #tpu.dot_dimension_numbers<[1], [0], [0], [1], [0, 0, 1, 1], [], []>} : vector<48x256xbf16>, vector<256x128xbf16>, vector<48x128xf32> -> vector<48x128xf32>
    %161 = vector.shape_cast %160 : vector<48x128xf32> to vector<3x16x128xf32>
    %162 = vector.extract_strided_slice %161 {offsets = [0, 0, 0], sizes = [1, 16, 128], strides = [1, 1, 1]} : vector<3x16x128xf32> to vector<1x16x128xf32>
    %163 = vector.shape_cast %162 : vector<1x16x128xf32> to vector<16x128xf32>
    %164 = vector.extract_strided_slice %161 {offsets = [1, 0, 0], sizes = [1, 16, 128], strides = [1, 1, 1]} : vector<3x16x128xf32> to vector<1x16x128xf32>
    %165 = vector.shape_cast %164 : vector<1x16x128xf32> to vector<16x128xf32>
    %166 = vector.extract_strided_slice %161 {offsets = [2, 0, 0], sizes = [1, 16, 128], strides = [1, 1, 1]} : vector<3x16x128xf32> to vector<1x16x128xf32>
    %167 = vector.shape_cast %166 : vector<1x16x128xf32> to vector<16x128xf32>
    %168 = arith.maximumf %163, %165 : vector<16x128xf32>
    %169 = arith.maximumf %168, %167 : vector<16x128xf32>
    %c0_31 = arith.constant 0 : index
    %c0_32 = arith.constant 0 : index
    %170 = vector.load %arg12[%c0_31, %c0_32] : memref<1x128xf32, #tpu.memory_space<vmem>>, vector<1x128xf32>
    %171 = vector.broadcast %170 : vector<1x128xf32> to vector<16x128xf32>
    %172 = arith.addf %169, %171 : vector<16x128xf32>
    %c0_33 = arith.constant 0 : index
    %c0_34 = arith.constant 0 : index
    %173 = vector.load %arg13[%c0_33, %c0_34] : memref<16x128xf32, #tpu.memory_space<vmem>>, vector<16x128xf32>
    tpu.vector_store %arg13[%c0_33, %c0_34], %172 {strides = array<i32>} : memref<16x128xf32, #tpu.memory_space<vmem>>, vector<16x128xf32>,
    return
  }
  func.func @transform_0(%arg0: i32) -> (i32, i32, i32) {
    %c0_i32 = arith.constant 0 : i32
    %c0_i32_0 = arith.constant 0 : i32
    %c0_i32_1 = arith.constant 0 : i32
    return %arg0, %c0_i32, %c0_i32_0 : i32, i32, i32
  }
  func.func @transform_1(%arg0: i32) -> (i32, i32) {
    %c0_i32 = arith.constant 0 : i32
    %c0_i32_0 = arith.constant 0 : i32
    %c0_i32_1 = arith.constant 0 : i32
    return %c0_i32, %c0_i32_0 : i32, i32
  }
  func.func @transform_2(%arg0: i32) -> (i32, i32) {
    %c0_i32 = arith.constant 0 : i32
    %c0_i32_0 = arith.constant 0 : i32
    %c0_i32_1 = arith.constant 0 : i32
    return %c0_i32, %c0_i32_0 : i32, i32
  }
  func.func @transform_3(%arg0: i32) -> (i32, i32) {
    %c0_i32 = arith.constant 0 : i32
    %c0_i32_0 = arith.constant 0 : i32
    %c0_i32_1 = arith.constant 0 : i32
    return %c0_i32, %c0_i32_0 : i32, i32
  }
  func.func @transform_4(%arg0: i32) -> (i32, i32) {
    %c0_i32 = arith.constant 0 : i32
    %c0_i32_0 = arith.constant 0 : i32
    %c0_i32_1 = arith.constant 0 : i32
    return %c0_i32, %c0_i32_0 : i32, i32
  }
  func.func @transform_5(%arg0: i32) -> (i32, i32) {
    %c0_i32 = arith.constant 0 : i32
    %c0_i32_0 = arith.constant 0 : i32
    %c0_i32_1 = arith.constant 0 : i32
    return %c0_i32, %c0_i32_0 : i32, i32
  }
  func.func @transform_6(%arg0: i32) -> (i32, i32) {
    %c0_i32 = arith.constant 0 : i32
    %c0_i32_0 = arith.constant 0 : i32
    %c0_i32_1 = arith.constant 0 : i32
    return %c0_i32, %c0_i32_0 : i32, i32
  }
  func.func @transform_7(%arg0: i32) -> (i32, i32) {
    %c0_i32 = arith.constant 0 : i32
    %c0_i32_0 = arith.constant 0 : i32
    %c0_i32_1 = arith.constant 0 : i32
    return %c0_i32, %c0_i32_0 : i32, i32
  }
  func.func @transform_8(%arg0: i32) -> (i32, i32) {
    %c0_i32 = arith.constant 0 : i32
    %c0_i32_0 = arith.constant 0 : i32
    %c0_i32_1 = arith.constant 0 : i32
    return %c0_i32, %c0_i32_0 : i32, i32
  }
  func.func @transform_9(%arg0: i32) -> (i32, i32) {
    %c0_i32 = arith.constant 0 : i32
    %c0_i32_0 = arith.constant 0 : i32
    %c0_i32_1 = arith.constant 0 : i32
    return %c0_i32, %c0_i32_0 : i32, i32
  }
  func.func @transform_10(%arg0: i32) -> (i32, i32) {
    %c0_i32 = arith.constant 0 : i32
    %c0_i32_0 = arith.constant 0 : i32
    %c0_i32_1 = arith.constant 0 : i32
    return %c0_i32, %c0_i32_0 : i32, i32
  }
  func.func @transform_11(%arg0: i32) -> (i32, i32) {
    %c0_i32 = arith.constant 0 : i32
    %c0_i32_0 = arith.constant 0 : i32
    %c0_i32_1 = arith.constant 0 : i32
    return %c0_i32, %c0_i32_0 : i32, i32
  }
  func.func @transform_12(%arg0: i32) -> (i32, i32) {
    %c0_i32 = arith.constant 0 : i32
    %c0_i32_0 = arith.constant 0 : i32
    return %arg0, %c0_i32 : i32, i32
  }
}

</mosaic_0001>

<bundles_post_ra>
// kernel: points_encoder_pallas.1
= control target key start
LH: loop header
LB: loop body
LE: loop exit
PB: predicated region body
PF: predicated region fallthrough
CT: control target
= control target key end

     0   :  { %vm651_vm0 = vcmask 1043456   ;;  %vm470_vm1 = vcmask 64512   ;;  %v8815_v49 = vmov 0   ;;  %s8802_s1 = inlined_call_operand.vmem [shape: bf16[8,128], index: 1, kind: input, shape index: {}]   ;;  %s8803_s0 = inlined_call_operand.vmem [shape: bf16[1,960,8], index: 0, kind: input, shape index: {}]   ;;  %s8804_s3 = inlined_call_operand.vmem [shape: bf16[128,256], index: 3, kind: input, shape index: {}]   ;;  %s8805_s2 = inlined_call_operand.vmem [shape: f32[1,128], index: 2, kind: input, shape index: {}]   ;;  %s8806_s4 = inlined_call_operand.vmem [shape: bf16[256,256], index: 4, kind: input, shape index: {}]   ;;  %s8807_s5 = inlined_call_operand.vmem [shape: bf16[256,256], index: 5, kind: input, shape index: {}]   ;;  %s8808_s7 = inlined_call_operand.vmem [shape: bf16[256,128], index: 7, kind: input, shape index: {}]   ;;  %s8809_s6 = inlined_call_operand.vmem [shape: f32[1,256], index: 6, kind: input, shape index: {}]   ;;  %s8810_s8 = inlined_call_operand.vmem [shape: bf16[128,256], index: 8, kind: input, shape index: {}]   ;;  %s8811_s10 = inlined_call_operand.vmem [shape: bf16[256,128], index: 10, kind: input, shape index: {}]   ;;  %s8812_s9 = inlined_call_operand.vmem [shape: f32[1,256], index: 9, kind: input, shape index: {}]   ;;  %s8813_s11 = inlined_call_operand.vmem [shape: f32[1,128], index: 11, kind: input, shape index: {}]   ;;  %s8814_s12 = inlined_call_operand.vmem [shape: f32[16,128], index: 12, kind: output, shape index: {}]  }
   0x1   :  { %v162_v0 = vld [vmem:[%s8802_s1] sm:$0xf]  ;;  %v5640_v3 = vld [vmem:[%s8803_s0 + $0x8] sm:$0xff]   ;;  %v5641_v4 = vld [vmem:[%s8803_s0 + $0x10] sm:$0xff]   ;;  %1646 = vmatprep.mubr.bf16.mxu1 %v8815_v49 }
   0x2   :  { %5637 = vmatprep.subr.msk.bf16.mxu0 %vm651_vm0, %v162_v0  ;;  %v653_v1 = vsel %vm651_vm0, %v162_v0, 0  ;;  %v5639_v2 = vld [vmem:[%s8803_s0] sm:$0xff]   ;;  %v5642_v5 = vld [vmem:[%s8803_s0 + $0x18] sm:$0xff]   ;;  %v5644_v7 = vld [vmem:[%s8803_s0 + $0x28] sm:$0xff]  }
   0x3   :  { %5500 = vmatpush3.bf16.msra.mxu0 %v653_v1  ;;  %5501 = vmatprep.mubr.msk.bf16.mxu0 %vm470_vm1, %v5639_v2  ;;  %v5643_v6 = vld [vmem:[%s8803_s0 + $0x20] sm:$0xff]   ;;  %v5645_v8 = vld [vmem:[%s8803_s0 + $0x30] sm:$0xff]   ;;  %v5646_v9 = vld [vmem:[%s8803_s0 + $0x38] sm:$0xff]  }
   0x4   :  { %v5647_v10 = vld [vmem:[%s8803_s0 + $0x40] sm:$0xff]   ;;  %v5648_v11 = vld [vmem:[%s8803_s0 + $0x48] sm:$0xff]   ;;  %v5649_v12 = vld [vmem:[%s8803_s0 + $0x50] sm:$0xff]  }
   0x5   :  { %v5650_v13 = vld [vmem:[%s8803_s0 + $0x58] sm:$0xff]   ;;  %v5651_v14 = vld [vmem:[%s8803_s0 + $0x60] sm:$0xff]   ;;  %v5652_v15 = vld [vmem:[%s8803_s0 + $0x68] sm:$0xff]  }
   0x6   :  { %5502 = vmatmul.mubr.msk.bf16.vlgmr.msra.gmra.mrb[0].mxu0 %vm470_vm1, %v5640_v3  ;;  %v5653_v16 = vld [vmem:[%s8803_s0 + $0x70] sm:$0xff]   ;;  %v5654_v17 = vld [vmem:[%s8803_s0 + $0x78] sm:$0xff]   ;;  %v5655_v18 = vld [vmem:[%s8803_s0 + $0x80] sm:$0xff]  }
   0x7   :  { %5505 = vmatprep.mubr.msk.bf16.mxu0 %vm470_vm1, %v5641_v4  ;;  %v5656_v19 = vld [vmem:[%s8803_s0 + $0x88] sm:$0xff]   ;;  %v5657_v20 = vld [vmem:[%s8803_s0 + $0x90] sm:$0xff]   ;;  %v5658_v21 = vld [vmem:[%s8803_s0 + $0x98] sm:$0xff]  }
   0x8   :  { %v5659_v22 = vld [vmem:[%s8803_s0 + $0xa0] sm:$0xff]   ;;  %v5660_v23 = vld [vmem:[%s8803_s0 + $0xa8] sm:$0xff]   ;;  %v5661_v24 = vld [vmem:[%s8803_s0 + $0xb0] sm:$0xff]  }
   0x9   :  { %v5695_v25 = vld [vmem:[%s8804_s3 + $0x4] ss:$8 sps:$4 sm:$0xff]   ;;  %v5693_v26 = vld [vmem:[%s8804_s3] ss:$8 sps:$4 sm:$0xff]   ;;  %v5698_v27 = vld [vmem:[%s8804_s3 + $0x14] ss:$8 sps:$4 sm:$0xff]  }
   0xa   :  { %1444 = vmatprep.subr.bf16.mxu0 %v5695_v25  ;;  %5621 = vmatprep.subr.bf16.mxu1 %v5695_v25  ;;  %v5662_v28 = vld [vmem:[%s8803_s0 + $0xb8] sm:$0xff]   ;;  %v5663_v30 = vld [vmem:[%s8803_s0 + $0xc0] sm:$0xff]   ;;  %v5664_v35 = vld [vmem:[%s8803_s0 + $0xc8] sm:$0xff]  }
   0xb   :  { %1445 = vmatpush1.bf16.msra.mxu0 %v5693_v26  ;;  %v5696_v29 = vld [vmem:[%s8804_s3 + $0x10] ss:$8 sps:$4 sm:$0xff]   ;;  %5629 = vmatpush1.bf16.msra.mxu1 %v5693_v26  ;;  %v5703_v31 = vld [vmem:[%s8804_s3 + $0x24] ss:$8 sps:$4 sm:$0xff]   ;;  %v5701_v32 = vld [vmem:[%s8804_s3 + $0x20] ss:$8 sps:$4 sm:$0xff]  }
   0xc   :  { %1446 = vmatprep.subr.bf16.mxu0 %v5698_v27  ;;  %5622 = vmatprep.subr.bf16.mxu1 %v5698_v27  ;;  %v5706_v33 = vld [vmem:[%s8804_s3 + $0x34] ss:$8 sps:$4 sm:$0xff]   ;;  %v5704_v34 = vld [vmem:[%s8804_s3 + $0x30] ss:$8 sps:$4 sm:$0xff]   ;;  %v5711_v37 = vld [vmem:[%s8804_s3 + $0x44] ss:$8 sps:$4 sm:$0xff]  }
   0xd   :  { %v5665_v36 = vld [vmem:[%s8803_s0 + $0xd0] sm:$0xff]   ;;  %v5709_v38 = vld [vmem:[%s8804_s3 + $0x40] ss:$8 sps:$4 sm:$0xff]   ;;  %v5666_v41 = vld [vmem:[%s8803_s0 + $0xd8] sm:$0xff]  }
   0xe   :  { %5506 = vmatmul.mubr.msk.bf16.gmra.mrb[4].mxu0 %vm470_vm1, %v5642_v5  ;;  %v5714_v39 = vld [vmem:[%s8804_s3 + $0x54] ss:$8 sps:$4 sm:$0xff]   ;;  %v5712_v40 = vld [vmem:[%s8804_s3 + $0x50] ss:$8 sps:$4 sm:$0xff]   ;;  %v5667_v42 = vld [vmem:[%s8803_s0 + $0xe0] sm:$0xff]  }
   0xf   :  { %5509 = vmatprep.mubr.msk.bf16.mxu0 %vm470_vm1, %v5643_v6  ;;  %1447 = vmatpush1.bf16.msra.mxu0 %v5696_v29  ;;  %v5719_v43 = vld [vmem:[%s8804_s3 + $0x64] ss:$8 sps:$4 sm:$0xff]   ;;  %v5717_v44 = vld [vmem:[%s8804_s3 + $0x60] ss:$8 sps:$4 sm:$0xff]   ;;  %v5722_v45 = vld [vmem:[%s8804_s3 + $0x74] ss:$8 sps:$4 sm:$0xff]  }
  0x10   :  { %5630 = vmatpush1.bf16.msra.mxu1 %v5696_v29  ;;  %1448 = vmatprep.subr.bf16.mxu0 %v5703_v31  ;;  %v5720_v46 = vld [vmem:[%s8804_s3 + $0x70] ss:$8 sps:$4 sm:$0xff]   ;;  %v5668_v47 = vld [vmem:[%s8803_s0 + $0xe8] sm:$0xff]   ;;  %v5671_v51 = vld [vmem:[%s8803_s0 + $0x100] sm:$0xff]  }
  0x11   :  { %5623 = vmatprep.subr.bf16.mxu1 %v5703_v31  ;;  %v5669_v48 = vld [vmem:[%s8803_s0 + $0xf0] sm:$0xff]   ;;  %v5670_v50 = vld [vmem:[%s8803_s0 + $0xf8] sm:$0xff]   ;;  %v5672_v52 = vld [vmem:[%s8803_s0 + $0x108] sm:$0xff]  }
  0x12   :  { %v5673_v53 = vld [vmem:[%s8803_s0 + $0x110] sm:$0xff]   ;;  %v5674_v54 = vld [vmem:[%s8803_s0 + $0x118] sm:$0xff]   ;;  %v5675_v55 = vld [vmem:[%s8803_s0 + $0x120] sm:$0xff]  }
  0x13   :  { %1449 = vmatpush1.bf16.msra.mxu0 %v5701_v32  ;;  %v5676_v56 = vld [vmem:[%s8803_s0 + $0x128] sm:$0xff]   ;;  %v5677_v57 = vld [vmem:[%s8803_s0 + $0x130] sm:$0xff]   ;;  %v5678_v58 = vld [vmem:[%s8803_s0 + $0x138] sm:$0xff]  }
  0x14   :  { %5631 = vmatpush1.bf16.msra.mxu1 %v5701_v32  ;;  %1450 = vmatprep.subr.bf16.mxu0 %v5706_v33  ;;  %v5679_v59 = vld [vmem:[%s8803_s0 + $0x140] sm:$0xff]   ;;  %v5680_v60 = vld [vmem:[%s8803_s0 + $0x148] sm:$0xff]   ;;  %v5681_v61 = vld [vmem:[%s8803_s0 + $0x150] sm:$0xff]  }
  0x15   :  { %5624 = vmatprep.subr.bf16.mxu1 %v5706_v33  ;;  %v5682_v62 = vld [vmem:[%s8803_s0 + $0x158] sm:$0xff]   ;;  %v5683_v63 = vld [vmem:[%s8803_s0 + $0x160] sm:$0xff]   ;;  %v5684_v0 = vld [vmem:[%s8803_s0 + $0x168] sm:$0xff]  }
  0x16   :  { %5510 = vmatmul.mubr.msk.bf16.gmra.mrb[8].mxu0 %vm470_vm1, %v5644_v7  ;;  %v5685_v1 = vld [vmem:[%s8803_s0 + $0x170] sm:$0xff]   ;;  %v5686_v2 = vld [vmem:[%s8803_s0 + $0x178] sm:$0xff]   ;;  %v5687_v3 = vld [vmem:[%s8803_s0 + $0x180] sm:$0xff]  }
  0x17   :  { %5513 = vmatprep.mubr.msk.bf16.mxu0 %vm470_vm1, %v5645_v8  ;;  %1451 = vmatpush1.bf16.msra.mxu0 %v5704_v34  ;;  %v5688_v4 = vld [vmem:[%s8803_s0 + $0x188] sm:$0xff]   ;;  %v5689_v5 = vld [vmem:[%s8803_s0 + $0x190] sm:$0xff]   ;;  %v5690_v6 = vld [vmem:[%s8803_s0 + $0x198] sm:$0xff]  }
  0x18   :  { %5632 = vmatpush1.bf16.msra.mxu1 %v5704_v34  ;;  %1452 = vmatprep.subr.bf16.mxu0 %v5711_v37  ;;  %v5691_v7 = vld [vmem:[%s8803_s0 + $0x1a0] sm:$0xff]   ;;  %v5692_v8 = vld [vmem:[%s8803_s0 + $0x1a8] sm:$0xff]   ;;  %v5715_v33 = vld [vmem:[%s8803_s0 + $0x1d0] sm:$0xff]  }
  0x19   :  { %5625 = vmatprep.subr.bf16.mxu1 %v5711_v37 }
  0x1b   :  { %1453 = vmatpush1.bf16.msra.mxu0 %v5709_v38 }
  0x1c   :  { %5633 = vmatpush1.bf16.msra.mxu1 %v5709_v38  ;;  %1454 = vmatprep.subr.bf16.mxu0 %v5714_v39 }
  0x1d   :  { %5626 = vmatprep.subr.bf16.mxu1 %v5714_v39 }
  0x1e   :  { %5514 = vmatmul.mubr.msk.bf16.gmra.mrb[12].mxu0 %vm470_vm1, %v5646_v9  ;;  %v5699_v9 = vld [vmem:[%s8803_s0 + $0x1b0] sm:$0xff]  }
  0x1f   :  { %5517 = vmatprep.mubr.msk.bf16.mxu0 %vm470_vm1, %v5647_v10  ;;  %1455 = vmatpush1.bf16.msra.mxu0 %v5712_v40  ;;  %v6216_v10 = vld [vmem:[%s8805_s2] ss:$0 sm:$0xff] }
  0x20   :  { %5634 = vmatpush1.bf16.msra.mxu1 %v5712_v40  ;;  %1456 = vmatprep.subr.bf16.mxu0 %v5719_v43 }
  0x21   :  { %5627 = vmatprep.subr.bf16.mxu1 %v5719_v43 }
  0x23   :  { %1457 = vmatpush1.bf16.msra.mxu0 %v5717_v44 }
  0x24   :  { %5635 = vmatpush1.bf16.msra.mxu1 %v5717_v44  ;;  %1458 = vmatprep.subr.bf16.mxu0 %v5722_v45 }
  0x25   :  { %5628 = vmatprep.subr.bf16.mxu1 %v5722_v45 }
  0x26   :  { %5518 = vmatmul.mubr.msk.bf16.gmra.mrb[16].mxu0 %vm470_vm1, %v5648_v11 }
  0x27   :  { %5521 = vmatprep.mubr.msk.bf16.mxu0 %vm470_vm1, %v5649_v12  ;;  %1459 = vmatpush1.bf16.msra.mxu0 %v5720_v46 }
  0x28   :  { %5636 = vmatpush1.bf16.msra.mxu1 %v5720_v46  ;;  %v5716_v46 = vld [vmem:[%s8803_s0 + $0x1d8] sm:$0xff]  }
  0x2e   :  { %5522 = vmatmul.mubr.msk.bf16.gmra.mrb[20].mxu0 %vm470_vm1, %v5650_v13 }
  0x2f   :  { %5525 = vmatprep.mubr.msk.bf16.mxu0 %vm470_vm1, %v5651_v14  ;;  %v5700_v14 = vld [vmem:[%s8803_s0 + $0x1b8] sm:$0xff]  }
  0x36   :  { %5526 = vmatmul.mubr.msk.bf16.gmra.mrb[24].mxu0 %vm470_vm1, %v5652_v15 }
  0x37   :  { %5529 = vmatprep.mubr.msk.bf16.mxu0 %vm470_vm1, %v5653_v16 }
  0x3e   :  { %5530 = vmatmul.mubr.msk.bf16.gmra.mrb[28].mxu0 %vm470_vm1, %v5654_v17  ;;  %v5707_v17 = vld [vmem:[%s8803_s0 + $0x1c0] sm:$0xff]  }
  0x3f   :  { %5533 = vmatprep.mubr.msk.bf16.mxu0 %vm470_vm1, %v5655_v18 }
  0x46   :  { %5534 = vmatmul.mubr.msk.bf16.gmra.mrb[32].mxu0 %vm470_vm1, %v5656_v19 }
  0x47   :  { %5537 = vmatprep.mubr.msk.bf16.mxu0 %vm470_vm1, %v5657_v20 }
  0x4e   :  { %5538 = vmatmul.mubr.msk.bf16.gmra.mrb[36].mxu0 %vm470_vm1, %v5658_v21 }
  0x4f   :  { %5541 = vmatprep.mubr.msk.bf16.mxu0 %vm470_vm1, %v5659_v22 }
  0x56   :  { %5542 = vmatmul.mubr.msk.bf16.gmra.mrb[40].mxu0 %vm470_vm1, %v5660_v23 }
  0x57   :  { %5545 = vmatprep.mubr.msk.bf16.mxu0 %vm470_vm1, %v5661_v24 }
  0x5e   :  { %5546 = vmatmul.mubr.msk.bf16.gmra.mrb[44].mxu0 %vm470_vm1, %v5662_v28 }
  0x5f   :  { %5549 = vmatprep.mubr.msk.bf16.mxu0 %vm470_vm1, %v5663_v30  ;;  %v5708_v30 = vld [vmem:[%s8803_s0 + $0x1c8] sm:$0xff]  }
  0x66   :  { %5550 = vmatmul.mubr.msk.bf16.gmra.mrb[48].mxu0 %vm470_vm1, %v5664_v35 }
  0x67   :  { %5553 = vmatprep.mubr.msk.bf16.mxu0 %vm470_vm1, %v5665_v36 }
  0x6e   :  { %5554 = vmatmul.mubr.msk.bf16.gmra.mrb[52].mxu0 %vm470_vm1, %v5666_v41 }
  0x6f   :  { %5557 = vmatprep.mubr.msk.bf16.mxu0 %vm470_vm1, %v5667_v42 }
  0x76   :  { %5558 = vmatmul.mubr.msk.bf16.gmra.mrb[56].mxu0 %vm470_vm1, %v5668_v47 }
  0x77   :  { %5561 = vmatprep.mubr.msk.bf16.mxu0 %vm470_vm1, %v5669_v48 }
  0x7e   :  { %5562 = vmatmul.mubr.msk.bf16.gmra.mrb[60].mxu0 %vm470_vm1, %v5670_v50 }
  0x7f   :  { %5565 = vmatprep.mubr.msk.bf16.mxu0 %vm470_vm1, %v5671_v51 }
  0x86   :  { %5566 = vmatmul.mubr.msk.bf16.gmra.mrb[64].mxu0 %vm470_vm1, %v5672_v52 }
  0x87   :  { %5569 = vmatprep.mubr.msk.bf16.mxu0 %vm470_vm1, %v5673_v53 }
  0x8e   :  { %5570 = vmatmul.mubr.msk.bf16.gmra.mrb[68].mxu0 %vm470_vm1, %v5674_v54 }
  0x8f   :  { %5573 = vmatprep.mubr.msk.bf16.mxu0 %vm470_vm1, %v5675_v55 }
  0x96   :  { %5574 = vmatmul.mubr.msk.bf16.gmra.mrb[72].mxu0 %vm470_vm1, %v5676_v56 }
  0x97   :  { %5577 = vmatprep.mubr.msk.bf16.mxu0 %vm470_vm1, %v5677_v57 }
  0x9e   :  { %5578 = vmatmul.mubr.msk.bf16.gmra.mrb[76].mxu0 %vm470_vm1, %v5678_v58 }
  0x9f   :  { %5581 = vmatprep.mubr.msk.bf16.mxu0 %vm470_vm1, %v5679_v59 }
  0xa6   :  { %5582 = vmatmul.mubr.msk.bf16.gmra.mrb[80].mxu0 %vm470_vm1, %v5680_v60 }
  0xa7   :  { %5585 = vmatprep.mubr.msk.bf16.mxu0 %vm470_vm1, %v5681_v61 }
  0xae   :  { %5586 = vmatmul.mubr.msk.bf16.gmra.mrb[84].mxu0 %vm470_vm1, %v5682_v62 }
  0xaf   :  { %5589 = vmatprep.mubr.msk.bf16.mxu0 %vm470_vm1, %v5683_v63 }
  0xb6   :  { %5590 = vmatmul.mubr.msk.bf16.gmra.mrb[88].mxu0 %vm470_vm1, %v5684_v0 }
  0xb7   :  { %5593 = vmatprep.mubr.msk.bf16.mxu0 %vm470_vm1, %v5685_v1 }
  0xbe   :  { %5594 = vmatmul.mubr.msk.bf16.gmra.mrb[92].mxu0 %vm470_vm1, %v5686_v2 }
  0xbf   :  { %5597 = vmatprep.mubr.msk.bf16.mxu0 %vm470_vm1, %v5687_v3 }
  0xc6   :  { %5598 = vmatmul.mubr.msk.bf16.gmra.mrb[96].mxu0 %vm470_vm1, %v5688_v4 }
  0xc7   :  { %5601 = vmatprep.mubr.msk.bf16.mxu0 %vm470_vm1, %v5689_v5 }
  0xce   :  { %5602 = vmatmul.mubr.msk.bf16.gmra.mrb[100].mxu0 %vm470_vm1, %v5690_v6 }
  0xcf   :  { %5605 = vmatprep.mubr.msk.bf16.mxu0 %vm470_vm1, %v5691_v7 }
  0xd6   :  { %5606 = vmatmul.mubr.msk.bf16.gmra.mrb[104].mxu0 %vm470_vm1, %v5692_v8 }
  0xd7   :  { %5609 = vmatprep.mubr.msk.bf16.mxu0 %vm470_vm1, %v5699_v9 }
  0xd9   :  { %v5503_v11 = vpop.f32.mrb[0].mxu0 }
  0xda   :  { %v698_v12 = vadd.f32 %v5503_v11, %v6216_v10  ;;  %v689_v13 = vpop.f32.mrb[1].mxu0 }
  0xdb   :  { %v690_v15 = vadd.f32 %v6216_v10, %v689_v13  ;;  %v5504_v16 = vpop.f32.mrb[2].mxu0 }
  0xdc   :  { %v701_v18 = vadd.f32 %v5504_v16, %v6216_v10  ;;  %v692_v19 = vpop.f32.mrb[3].mxu0  ;;  %v1170_v21 = vmax.f32 %v698_v12, 0.0 }
  0xdd   :  { %v693_v20 = vadd.f32 %v6216_v10, %v692_v19  ;;  %v1168_v23 = vmax.f32 %v690_v15, 0.0 }
  0xde   :  { %v1171_v22 = vmax.f32 %v701_v18, 0.0  ;;  %5610 = vmatmul.mubr.msk.bf16.gmra.mrb[108].mxu0 %vm470_vm1, %v5700_v14 }
  0xdf   :  { %v1169_v24 = vmax.f32 %v693_v20, 0.0  ;;  %5613 = vmatprep.mubr.msk.bf16.mxu0 %vm470_vm1, %v5707_v17 }
  0xe0   :  { %v1289_v25 = vpack.c.bf16 %v1171_v22, %v1170_v21 }
  0xe1   :  { %v1288_v26 = vpack.c.bf16 %v1169_v24, %v1168_v23  ;;  %v5507_v27 = vpop.f32.mrb[4].mxu0 }
  0xe2   :  { %v714_v28 = vadd.f32 %v5507_v27, %v6216_v10  ;;  %v705_v29 = vpop.f32.mrb[5].mxu0 }
  0xe3   :  { %v706_v31 = vadd.f32 %v6216_v10, %v705_v29  ;;  %v5508_v32 = vpop.f32.mrb[6].mxu0 }
  0xe4   :  { %v717_v34 = vadd.f32 %v5508_v32, %v6216_v10  ;;  %v708_v35 = vpop.f32.mrb[7].mxu0  ;;  %v1174_v37 = vmax.f32 %v714_v28, 0.0 }
  0xe5   :  { %v709_v36 = vadd.f32 %v6216_v10, %v708_v35  ;;  %v1172_v39 = vmax.f32 %v706_v31, 0.0 }
  0xe6   :  { %v1175_v38 = vmax.f32 %v717_v34, 0.0  ;;  %5614 = vmatmul.mubr.msk.bf16.gmra.mrb[112].mxu0 %vm470_vm1, %v5708_v30 }
  0xe7   :  { %v1173_v40 = vmax.f32 %v709_v36, 0.0  ;;  %5617 = vmatprep.mubr.msk.bf16.mxu0 %vm470_vm1, %v5715_v33 }
  0xe8   :  { %v6243_v41 = vpack.c.bf16 %v1175_v38, %v1174_v37 }
  0xe9   :  { %v5511_v42 = vpop.f32.mrb[8].mxu0  ;;  %v1290_v43 = vpack.c.bf16 %v1173_v40, %v1172_v39 }
  0xea   :  { %v730_v44 = vadd.f32 %v5511_v42, %v6216_v10  ;;  %v721_v45 = vpop.f32.mrb[9].mxu0 }
  0xeb   :  { %v722_v47 = vadd.f32 %v6216_v10, %v721_v45  ;;  %v5512_v48 = vpop.f32.mrb[10].mxu0 }
  0xec   :  { %v733_v50 = vadd.f32 %v5512_v48, %v6216_v10  ;;  %v724_v51 = vpop.f32.mrb[11].mxu0  ;;  %v1178_v53 = vmax.f32 %v730_v44, 0.0  ;;  %v5725_v48 = vld [vmem:[%s8806_s4 + $0x4] ss:$8 sps:$4 sm:$0xff]  }
  0xed   :  { %v725_v52 = vadd.f32 %v6216_v10, %v724_v51  ;;  %v1176_v55 = vmax.f32 %v722_v47, 0.0  ;;  %2503 = vmatprep.subr.bf16.mxu0 %v5725_v48 }
  0xee   :  { %v1179_v54 = vmax.f32 %v733_v50, 0.0  ;;  %5618 = vmatmul.mubr.msk.bf16.gmra.mrb[116].mxu0 %vm470_vm1, %v5716_v46 }
  0xef   :  { %v1177_v56 = vmax.f32 %v725_v52, 0.0  ;;  %1476 = vmatprep.mubr.bf16.mxu0 %v8815_v49 }
  0xf0   :  { %v6254_v57 = vpack.c.bf16 %v1179_v54, %v1178_v53 }
  0xf1   :  { %v5515_v58 = vpop.f32.mrb[12].mxu0  ;;  %v6256_v59 = vpack.c.bf16 %v1177_v56, %v1176_v55 }
  0xf2   :  { %v746_v60 = vadd.f32 %v5515_v58, %v6216_v10  ;;  %v737_v61 = vpop.f32.mrb[13].mxu0 }
  0xf3   :  { %v738_v62 = vadd.f32 %v6216_v10, %v737_v61  ;;  %v5516_v63 = vpop.f32.mrb[14].mxu0  ;;  %v5728_v61 = vld [vmem:[%s8806_s4 + $0x14] ss:$8 sps:$4 sm:$0xff]  }
  0xf4   :  { %v749_v0 = vadd.f32 %v5516_v63, %v6216_v10  ;;  %v740_v1 = vpop.f32.mrb[15].mxu0  ;;  %v1182_v3 = vmax.f32 %v746_v60, 0.0  ;;  %v5726_v63 = vld [vmem:[%s8806_s4 + $0x10] ss:$8 sps:$4 sm:$0xff]  }
  0xf5   :  { %v741_v2 = vadd.f32 %v6216_v10, %v740_v1  ;;  %v1180_v5 = vmax.f32 %v738_v62, 0.0 }
  0xf6   :  { %v1183_v4 = vmax.f32 %v749_v0, 0.0  ;;  %1477 = vmatmul.mubr.bf16.vlgmr.msra.gmra.mrb[120].mxu0 %v1288_v26  ;;  %v5729_v0 = vld [vmem:[%s8806_s4 + $0x20] ss:$8 sps:$4 sm:$0xff]  }
  0xf7   :  { %v1181_v6 = vmax.f32 %v741_v2, 0.0  ;;  %1486 = vmatprep.mubr.bf16.mxu0 %v8815_v49 }
  0xf8   :  { %v6263_v7 = vpack.c.bf16 %v1183_v4, %v1182_v3  ;;  %v5731_v3 = vld [vmem:[%s8806_s4 + $0x24] ss:$8 sps:$4 sm:$0xff]  }
  0xf9   :  { %v5519_v8 = vpop.f32.mrb[16].mxu0  ;;  %v6265_v9 = vpack.c.bf16 %v1181_v6, %v1180_v5 }
  0xfa   :  { %v762_v11 = vadd.f32 %v5519_v8, %v6216_v10  ;;  %v753_v12 = vpop.f32.mrb[17].mxu0 }
  0xfb   :  { %v754_v13 = vadd.f32 %v6216_v10, %v753_v12  ;;  %v5520_v14 = vpop.f32.mrb[18].mxu0 }
  0xfc   :  { %v765_v15 = vadd.f32 %v5520_v14, %v6216_v10  ;;  %v756_v16 = vpop.f32.mrb[19].mxu0  ;;  %v1186_v18 = vmax.f32 %v762_v11, 0.0 }
  0xfd   :  { %v757_v17 = vadd.f32 %v6216_v10, %v756_v16  ;;  %v1184_v20 = vmax.f32 %v754_v13, 0.0 }
  0xfe   :  { %v1187_v19 = vmax.f32 %v765_v15, 0.0  ;;  %1487 = vmatmul.mubr.bf16.gmra.mrb[124].mxu0 %v1289_v25 }
  0xff   :  { %v1185_v21 = vmax.f32 %v757_v17, 0.0  ;;  %1496 = vmatprep.mubr.bf16.mxu0 %v8815_v49  ;;  %v5734_v17 = vld [vmem:[%s8806_s4 + $0x34] ss:$8 sps:$4 sm:$0xff]  }
 0x100   :  { %v6272_v22 = vpack.c.bf16 %v1187_v19, %v1186_v18  ;;  %v5732_v19 = vld [vmem:[%s8806_s4 + $0x30] ss:$8 sps:$4 sm:$0xff]  }
 0x101   :  { %v5523_v23 = vpop.f32.mrb[20].mxu0  ;;  %v6274_v24 = vpack.c.bf16 %v1185_v21, %v1184_v20 }
 0x102   :  { %v778_v26 = vadd.f32 %v5523_v23, %v6216_v10  ;;  %v769_v27 = vpop.f32.mrb[21].mxu0  ;;  %v5737_v23 = vld [vmem:[%s8806_s4 + $0x44] ss:$8 sps:$4 sm:$0xff]  }
 0x103   :  { %v770_v28 = vadd.f32 %v6216_v10, %v769_v27  ;;  %v5524_v29 = vpop.f32.mrb[22].mxu0  ;;  %v5735_v27 = vld [vmem:[%s8806_s4 + $0x40] ss:$8 sps:$4 sm:$0xff]  }
 0x104   :  { %v781_v30 = vadd.f32 %v5524_v29, %v6216_v10  ;;  %v772_v31 = vpop.f32.mrb[23].mxu0  ;;  %v1190_v32 = vmax.f32 %v778_v26, 0.0 }
 0x105   :  { %v773_v25 = vadd.f32 %v6216_v10, %v772_v31  ;;  %v1188_v34 = vmax.f32 %v770_v28, 0.0 }
 0x106   :  { %v1191_v33 = vmax.f32 %v781_v30, 0.0  ;;  %1497 = vmatmul.mubr.bf16.gmra.mrb[128].mxu0 %v1290_v43  ;;  %v5723_v43 = vld [vmem:[%s8806_s4] ss:$8 sps:$4 sm:$0xff]  }
 0x107   :  { %v1189_v35 = vmax.f32 %v773_v25, 0.0  ;;  %1506 = vmatprep.mubr.bf16.mxu0 %v8815_v49  ;;  %2504 = vmatpush1.bf16.msra.mxu0 %v5723_v43  ;;  %v5741_v43 = vld [vmem:[%s8806_s4 + $0x60] ss:$8 sps:$4 sm:$0xff]  }
 0x108   :  { %v6281_v36 = vpack.c.bf16 %v1191_v33, %v1190_v32  ;;  %2505 = vmatprep.subr.bf16.mxu0 %v5728_v61  ;;  %v5746_v61 = vld [vmem:[%s8806_s4 + $0x74] ss:$8 sps:$4 sm:$0xff]  }
 0x109   :  { %v5527_v37 = vpop.f32.mrb[24].mxu0  ;;  %v6283_v38 = vpack.c.bf16 %v1189_v35, %v1188_v34 }
 0x10a   :  { %v794_v39 = vadd.f32 %v5527_v37, %v6216_v10  ;;  %v785_v40 = vpop.f32.mrb[25].mxu0  ;;  %v5740_v37 = vld [vmem:[%s8806_s4 + $0x54] ss:$8 sps:$4 sm:$0xff]  }
 0x10b   :  { %v786_v42 = vadd.f32 %v6216_v10, %v785_v40  ;;  %v5528_v44 = vpop.f32.mrb[26].mxu0  ;;  %2506 = vmatpush1.bf16.msra.mxu0 %v5726_v63  ;;  %v5738_v40 = vld [vmem:[%s8806_s4 + $0x50] ss:$8 sps:$4 sm:$0xff]  }
 0x10c   :  { %v797_v45 = vadd.f32 %v5528_v44, %v6216_v10  ;;  %v788_v46 = vpop.f32.mrb[27].mxu0  ;;  %v1194_v50 = vmax.f32 %v794_v39, 0.0  ;;  %2507 = vmatprep.subr.bf16.mxu0 %v5731_v3 }
 0x10d   :  { %v789_v47 = vadd.f32 %v6216_v10, %v788_v46  ;;  %v1192_v52 = vmax.f32 %v786_v42, 0.0 }
 0x10e   :  { %v1195_v51 = vmax.f32 %v797_v45, 0.0  ;;  %1507 = vmatmul.mubr.bf16.gmra.mrb[132].mxu0 %v6243_v41  ;;  %v5743_v45 = vld [vmem:[%s8806_s4 + $0x64] ss:$8 sps:$4 sm:$0xff]  }
 0x10f   :  { %v1193_v53 = vmax.f32 %v789_v47, 0.0  ;;  %1516 = vmatprep.mubr.bf16.mxu0 %v8815_v49  ;;  %2508 = vmatpush1.bf16.msra.mxu0 %v5729_v0 }
 0x110   :  { %v6297_v54 = vpack.c.bf16 %v1195_v51, %v1194_v50  ;;  %2509 = vmatprep.subr.bf16.mxu0 %v5734_v17 }
 0x111   :  { %v5531_v55 = vpop.f32.mrb[28].mxu0  ;;  %v6299_v56 = vpack.c.bf16 %v1193_v53, %v1192_v52 }
 0x112   :  { %v810_v58 = vadd.f32 %v5531_v55, %v6216_v10  ;;  %v801_v60 = vpop.f32.mrb[29].mxu0 }
 0x113   :  { %v802_v41 = vadd.f32 %v6216_v10, %v801_v60  ;;  %v5532_v62 = vpop.f32.mrb[30].mxu0  ;;  %2510 = vmatpush1.bf16.msra.mxu0 %v5732_v19  ;;  %v5750_v19 = vld [vmem:[%s8806_s4 + $0x90] ss:$8 sps:$4 sm:$0xff]  }
 0x114   :  { %v813_v1 = vadd.f32 %v5532_v62, %v6216_v10  ;;  %v804_v2 = vpop.f32.mrb[31].mxu0  ;;  %v1198_v5 = vmax.f32 %v810_v58, 0.0  ;;  %2511 = vmatprep.subr.bf16.mxu0 %v5737_v23  ;;  %v5744_v62 = vld [vmem:[%s8806_s4 + $0x70] ss:$8 sps:$4 sm:$0xff]  }
 0x115   :  { %v805_v4 = vadd.f32 %v6216_v10, %v804_v2  ;;  %v1196_v8 = vmax.f32 %v802_v41, 0.0  ;;  %v5749_v2 = vld [vmem:[%s8806_s4 + $0x84] ss:$8 sps:$4 sm:$0xff]  }
 0x116   :  { %v1199_v6 = vmax.f32 %v813_v1, 0.0  ;;  %1517 = vmatmul.mubr.bf16.gmra.mrb[136].mxu0 %v6256_v59 }
 0x117   :  { %v1197_v11 = vmax.f32 %v805_v4, 0.0  ;;  %1526 = vmatprep.mubr.bf16.mxu0 %v8815_v49  ;;  %2512 = vmatpush1.bf16.msra.mxu0 %v5735_v27 }
 0x118   :  { %v6319_v12 = vpack.c.bf16 %v1199_v6, %v1198_v5  ;;  %2513 = vmatprep.subr.bf16.mxu0 %v5740_v37  ;;  %v5747_v5 = vld [vmem:[%s8806_s4 + $0x80] ss:$8 sps:$4 sm:$0xff]  }
 0x119   :  { %v5535_v13 = vpop.f32.mrb[32].mxu0  ;;  %v6321_v14 = vpack.c.bf16 %v1197_v11, %v1196_v8 }
 0x11a   :  { %v826_v15 = vadd.f32 %v5535_v13, %v6216_v10  ;;  %v817_v16 = vpop.f32.mrb[33].mxu0 }
 0x11b   :  { %v818_v59 = vadd.f32 %v6216_v10, %v817_v16  ;;  %v5536_v18 = vpop.f32.mrb[34].mxu0  ;;  %2514 = vmatpush1.bf16.msra.mxu0 %v5738_v40  ;;  %v5756_v40 = vld [vmem:[%s8806_s4 + $0xb0] ss:$8 sps:$4 sm:$0xff]  }
 0x11c   :  { %v829_v20 = vadd.f32 %v5536_v18, %v6216_v10  ;;  %v820_v21 = vpop.f32.mrb[35].mxu0  ;;  %v1202_v28 = vmax.f32 %v826_v15, 0.0  ;;  %2515 = vmatprep.subr.bf16.mxu0 %v5743_v45 }
 0x11d   :  { %v821_v26 = vadd.f32 %v6216_v10, %v820_v21  ;;  %v1200_v30 = vmax.f32 %v818_v59, 0.0  ;;  %v5752_v59 = vld [vmem:[%s8806_s4 + $0x94] ss:$8 sps:$4 sm:$0xff]  }
 0x11e   :  { %v1203_v29 = vmax.f32 %v829_v20, 0.0  ;;  %1527 = vmatmul.mubr.bf16.gmra.mrb[140].mxu0 %v6254_v57 }
 0x11f   :  { %v1201_v31 = vmax.f32 %v821_v26, 0.0  ;;  %1536 = vmatprep.mubr.bf16.mxu0 %v8815_v49  ;;  %2516 = vmatpush1.bf16.msra.mxu0 %v5741_v43  ;;  %v5755_v26 = vld [vmem:[%s8806_s4 + $0xa4] ss:$8 sps:$4 sm:$0xff]  }
 0x120   :  { %v1305_v25 = vpack.c.bf16 %v1203_v29, %v1202_v28  ;;  %2517 = vmatprep.subr.bf16.mxu0 %v5746_v61  ;;  %v5753_v29 = vld [vmem:[%s8806_s4 + $0xa0] ss:$8 sps:$4 sm:$0xff]   ;;  %v5764_v61 = vld [vmem:[%s8806_s4 + $0xd4] ss:$8 sps:$4 sm:$0xff]  }
 0x121   :  { %v5539_v32 = vpop.f32.mrb[36].mxu0  ;;  %v6341_v33 = vpack.c.bf16 %v1201_v31, %v1200_v30 }
 0x122   :  { %v842_v34 = vadd.f32 %v5539_v32, %v6216_v10  ;;  %v833_v35 = vpop.f32.mrb[37].mxu0  ;;  %1647 = vmatmul.mubr.bf16.vlgmr.msra.gmra.mrb[0].mxu1 %v1305_v25 }
 0x123   :  { %v834_v57 = vadd.f32 %v6216_v10, %v833_v35  ;;  %v5540_v39 = vpop.f32.mrb[38].mxu0  ;;  %1656 = vmatprep.mubr.bf16.mxu1 %v8815_v49  ;;  %2518 = vmatpush1.bf16.msra.mxu0 %v5744_v62 }
 0x124   :  { %v845_v42 = vadd.f32 %v5540_v39, %v6216_v10  ;;  %v836_v44 = vpop.f32.mrb[39].mxu0  ;;  %v1206_v47 = vmax.f32 %v842_v34, 0.0  ;;  %2519 = vmatprep.subr.bf16.mxu0 %v5749_v2 }
 0x125   :  { %v837_v46 = vadd.f32 %v6216_v10, %v836_v44  ;;  %v1204_v50 = vmax.f32 %v834_v57, 0.0  ;;  %v5758_v57 = vld [vmem:[%s8806_s4 + $0xb4] ss:$8 sps:$4 sm:$0xff]  }
 0x126   :  { %v1207_v48 = vmax.f32 %v845_v42, 0.0  ;;  %1537 = vmatmul.mubr.bf16.gmra.mrb[144].mxu0 %v6265_v9 }
 0x127   :  { %v1205_v51 = vmax.f32 %v837_v46, 0.0  ;;  %1546 = vmatprep.mubr.bf16.mxu0 %v8815_v49  ;;  %2520 = vmatpush1.bf16.msra.mxu0 %v5747_v5  ;;  %v5761_v46 = vld [vmem:[%s8806_s4 + $0xc4] ss:$8 sps:$4 sm:$0xff]  }
 0x128   :  { %v1307_v52 = vpack.c.bf16 %v1207_v48, %v1206_v47  ;;  %2521 = vmatprep.subr.bf16.mxu0 %v5752_v59  ;;  %v5759_v48 = vld [vmem:[%s8806_s4 + $0xc0] ss:$8 sps:$4 sm:$0xff]  }
 0x129   :  { %v1306_v53 = vpack.c.bf16 %v1205_v51, %v1204_v50  ;;  %v5543_v55 = vpop.f32.mrb[40].mxu0 }
 0x12a   :  { %v858_v58 = vadd.f32 %v5543_v55, %v6216_v10  ;;  %v849_v60 = vpop.f32.mrb[41].mxu0 }
 0x12b   :  { %1657 = vmatmul.mubr.bf16.gmra.mrb[4].mxu1 %v1306_v53  ;;  %v850_v41 = vadd.f32 %v6216_v10, %v849_v60  ;;  %v5544_v9 = vpop.f32.mrb[42].mxu0  ;;  %2522 = vmatpush1.bf16.msra.mxu0 %v5750_v19 }
 0x12c   :  { %v1210_v63 = vmax.f32 %v858_v58, 0.0  ;;  %v861_v0 = vadd.f32 %v5544_v9, %v6216_v10  ;;  %v852_v1 = vpop.f32.mrb[43].mxu0  ;;  %1666 = vmatprep.mubr.bf16.mxu1 %v8815_v49  ;;  %2523 = vmatprep.subr.bf16.mxu0 %v5755_v26  ;;  %v5762_v9 = vld [vmem:[%s8806_s4 + $0xd0] ss:$8 sps:$4 sm:$0xff]  }
 0x12d   :  { %v1208_v3 = vmax.f32 %v850_v41, 0.0  ;;  %v853_v4 = vadd.f32 %v6216_v10, %v852_v1 }
 0x12e   :  { %1547 = vmatmul.mubr.bf16.gmra.mrb[148].mxu0 %v6263_v7  ;;  %v1211_v6 = vmax.f32 %v861_v0, 0.0 }
 0x12f   :  { %v1209_v8 = vmax.f32 %v853_v4, 0.0  ;;  %1556 = vmatprep.mubr.bf16.mxu0 %v8815_v49  ;;  %2524 = vmatpush1.bf16.msra.mxu0 %v5753_v29  ;;  %v5767_v4 = vld [vmem:[%s8806_s4 + $0xe4] ss:$8 sps:$4 sm:$0xff]  }
 0x130   :  { %v1309_v11 = vpack.c.bf16 %v1211_v6, %v1210_v63  ;;  %2525 = vmatprep.subr.bf16.mxu0 %v5758_v57  ;;  %v5765_v6 = vld [vmem:[%s8806_s4 + $0xe0] ss:$8 sps:$4 sm:$0xff]  }
 0x131   :  { %v1308_v13 = vpack.c.bf16 %v1209_v8, %v1208_v3  ;;  %v5547_v15 = vpop.f32.mrb[44].mxu0 }
 0x132   :  { %v874_v16 = vadd.f32 %v5547_v15, %v6216_v10  ;;  %v865_v17 = vpop.f32.mrb[45].mxu0 }
 0x133   :  { %1667 = vmatmul.mubr.bf16.gmra.mrb[8].mxu1 %v1307_v52  ;;  %v866_v18 = vadd.f32 %v6216_v10, %v865_v17  ;;  %v5548_v7 = vpop.f32.mrb[46].mxu0  ;;  %2526 = vmatpush1.bf16.msra.mxu0 %v5756_v40 }
 0x134   :  { %1676 = vmatprep.mubr.bf16.mxu1 %v8815_v49  ;;  %v1214_v20 = vmax.f32 %v874_v16, 0.0  ;;  %v877_v21 = vadd.f32 %v5548_v7, %v6216_v10  ;;  %v868_v23 = vpop.f32.mrb[47].mxu0  ;;  %2527 = vmatprep.subr.bf16.mxu0 %v5761_v46  ;;  %v5770_v16 = vld [vmem:[%s8806_s4 + $0xf4] ss:$8 sps:$4 sm:$0xff]  }
 0x135   :  { %v1212_v27 = vmax.f32 %v866_v18, 0.0  ;;  %v869_v28 = vadd.f32 %v6216_v10, %v868_v23  ;;  %v5768_v18 = vld [vmem:[%s8806_s4 + $0xf0] ss:$8 sps:$4 sm:$0xff]  }
 0x136   :  { %1557 = vmatmul.mubr.bf16.gmra.mrb[152].mxu0 %v6274_v24  ;;  %v1215_v30 = vmax.f32 %v877_v21, 0.0 }
 0x137   :  { %1566 = vmatprep.mubr.bf16.mxu0 %v8815_v49  ;;  %v1213_v31 = vmax.f32 %v869_v28, 0.0  ;;  %2528 = vmatpush1.bf16.msra.mxu0 %v5759_v48 }
 0x138   :  { %v6400_v25 = vpack.c.bf16 %v1215_v30, %v1214_v20  ;;  %2529 = vmatprep.subr.bf16.mxu0 %v5764_v61 }
 0x139   :  { %v1310_v32 = vpack.c.bf16 %v1213_v31, %v1212_v27  ;;  %v5551_v34 = vpop.f32.mrb[48].mxu0 }
 0x13a   :  { %v890_v35 = vadd.f32 %v5551_v34, %v6216_v10  ;;  %v881_v37 = vpop.f32.mrb[49].mxu0 }
 0x13b   :  { %1677 = vmatmul.mubr.bf16.gmra.mrb[12].mxu1 %v1308_v13  ;;  %v882_v24 = vadd.f32 %v6216_v10, %v881_v37  ;;  %v5552_v39 = vpop.f32.mrb[50].mxu0  ;;  %2530 = vmatpush1.bf16.msra.mxu0 %v5762_v9 }
 0x13c   :  { %1686 = vmatprep.mubr.bf16.mxu1 %v8815_v49  ;;  %v1218_v42 = vmax.f32 %v890_v35, 0.0  ;;  %v893_v44 = vadd.f32 %v5552_v39, %v6216_v10  ;;  %v884_v45 = vpop.f32.mrb[51].mxu0  ;;  %2531 = vmatprep.subr.bf16.mxu0 %v5767_v4 }
 0x13d   :  { %v1216_v43 = vmax.f32 %v882_v24, 0.0  ;;  %v885_v47 = vadd.f32 %v6216_v10, %v884_v45 }
 0x13e   :  { %1567 = vmatmul.mubr.bf16.gmra.mrb[156].mxu0 %v6272_v22  ;;  %v1219_v50 = vmax.f32 %v893_v44, 0.0 }
 0x13f   :  { %1576 = vmatprep.mubr.bf16.mxu0 %v8815_v49  ;;  %v1217_v51 = vmax.f32 %v885_v47, 0.0  ;;  %2532 = vmatpush1.bf16.msra.mxu0 %v5765_v6 }
 0x140   :  { %v6421_v52 = vpack.c.bf16 %v1219_v50, %v1218_v42  ;;  %2533 = vmatprep.subr.bf16.mxu0 %v5770_v16 }
 0x141   :  { %v6423_v53 = vpack.c.bf16 %v1217_v51, %v1216_v43  ;;  %v5555_v55 = vpop.f32.mrb[52].mxu0 }
 0x142   :  { %v906_v58 = vadd.f32 %v5555_v55, %v6216_v10  ;;  %v897_v60 = vpop.f32.mrb[53].mxu0 }
 0x143   :  { %1687 = vmatmul.mubr.bf16.gmra.mrb[16].mxu1 %v1309_v11  ;;  %v898_v22 = vadd.f32 %v6216_v10, %v897_v60  ;;  %v5556_v41 = vpop.f32.mrb[54].mxu0  ;;  %2534 = vmatpush1.bf16.msra.mxu0 %v5768_v18 }
 0x144   :  { %1696 = vmatprep.mubr.bf16.mxu1 %v8815_v49  ;;  %v1222_v62 = vmax.f32 %v906_v58, 0.0  ;;  %v909_v63 = vadd.f32 %v5556_v41, %v6216_v10  ;;  %v900_v0 = vpop.f32.mrb[55].mxu0 }
 0x145   :  { %v1220_v1 = vmax.f32 %v898_v22, 0.0  ;;  %v901_v2 = vadd.f32 %v6216_v10, %v900_v0 }
 0x146   :  { %1577 = vmatmul.mubr.bf16.gmra.mrb[160].mxu0 %v6283_v38  ;;  %v1223_v3 = vmax.f32 %v909_v63, 0.0 }
 0x147   :  { %1586 = vmatprep.mubr.bf16.mxu0 %v8815_v49  ;;  %v1221_v5 = vmax.f32 %v901_v2, 0.0 }
 0x148   :  { %v6444_v8 = vpack.c.bf16 %v1223_v3, %v1222_v62 }
 0x149   :  { %v6446_v11 = vpack.c.bf16 %v1221_v5, %v1220_v1  ;;  %v5559_v13 = vpop.f32.mrb[56].mxu0 }
 0x14a   :  { %v922_v38 = vadd.f32 %v5559_v13, %v6216_v10  ;;  %v913_v15 = vpop.f32.mrb[57].mxu0 }
 0x14b   :  { %1697 = vmatmul.mubr.bf16.gmra.mrb[20].mxu1 %v1310_v32  ;;  %v914_v17 = vadd.f32 %v6216_v10, %v913_v15  ;;  %v5560_v59 = vpop.f32.mrb[58].mxu0 }
 0x14c   :  { %1706 = vmatprep.mubr.bf16.mxu1 %v8815_v49  ;;  %v1226_v7 = vmax.f32 %v922_v38, 0.0  ;;  %v925_v19 = vadd.f32 %v5560_v59, %v6216_v10  ;;  %v916_v20 = vpop.f32.mrb[59].mxu0 }
 0x14d   :  { %v1224_v21 = vmax.f32 %v914_v17, 0.0  ;;  %v917_v23 = vadd.f32 %v6216_v10, %v916_v20  ;;  %v5773_v20 = vld [vmem:[%s8807_s5 + $0x4] ss:$8 sps:$4 sm:$0xff]  }
 0x14e   :  { %1587 = vmatmul.mubr.bf16.gmra.mrb[164].mxu0 %v6281_v36  ;;  %v1227_v26 = vmax.f32 %v925_v19, 0.0  ;;  %3340 = vmatprep.subr.bf16.mxu1 %v5773_v20 }
 0x14f   :  { %1596 = vmatprep.mubr.bf16.mxu0 %v8815_v49  ;;  %v1225_v27 = vmax.f32 %v917_v23, 0.0 }
 0x150   :  { %v6461_v28 = vpack.c.bf16 %v1227_v26, %v1226_v7 }
 0x151   :  { %v6463_v29 = vpack.c.bf16 %v1225_v27, %v1224_v21  ;;  %v5563_v30 = vpop.f32.mrb[60].mxu0 }
 0x152   :  { %v938_v31 = vadd.f32 %v5563_v30, %v6216_v10  ;;  %v929_v32 = vpop.f32.mrb[61].mxu0 }
 0x153   :  { %1707 = vmatmul.mubr.bf16.gmra.mrb[24].mxu1 %v6400_v25  ;;  %v930_v34 = vadd.f32 %v6216_v10, %v929_v32  ;;  %v5564_v35 = vpop.f32.mrb[62].mxu0 }
 0x154   :  { %1716 = vmatprep.mubr.bf16.mxu1 %v8815_v49  ;;  %v1230_v36 = vmax.f32 %v938_v31, 0.0  ;;  %v941_v37 = vadd.f32 %v5564_v35, %v6216_v10  ;;  %v932_v57 = vpop.f32.mrb[63].mxu0 }
 0x155   :  { %v1228_v24 = vmax.f32 %v930_v34, 0.0  ;;  %v933_v39 = vadd.f32 %v6216_v10, %v932_v57 }
 0x156   :  { %1597 = vmatmul.mubr.bf16.gmra.mrb[168].mxu0 %v6299_v56  ;;  %v1231_v40 = vmax.f32 %v941_v37, 0.0 }
 0x157   :  { %1606 = vmatprep.mubr.bf16.mxu0 %v8815_v49  ;;  %v1229_v42 = vmax.f32 %v933_v39, 0.0 }
 0x158   :  { %v6473_v44 = vpack.c.bf16 %v1231_v40, %v1230_v36 }
 0x159   :  { %v6475_v25 = vpack.c.bf16 %v1229_v42, %v1228_v24  ;;  %v5567_v45 = vpop.f32.mrb[64].mxu0 }
 0x15a   :  { %v954_v46 = vadd.f32 %v5567_v45, %v6216_v10  ;;  %v945_v43 = vpop.f32.mrb[65].mxu0 }
 0x15b   :  { %1717 = vmatmul.mubr.bf16.gmra.mrb[28].mxu1 %v6423_v53  ;;  %v946_v47 = vadd.f32 %v6216_v10, %v945_v43  ;;  %v5568_v48 = vpop.f32.mrb[66].mxu0 }
 0x15c   :  { %1726 = vmatprep.mubr.bf16.mxu1 %v8815_v49  ;;  %v1234_v56 = vmax.f32 %v954_v46, 0.0  ;;  %v957_v50 = vadd.f32 %v5568_v48, %v6216_v10  ;;  %v948_v51 = vpop.f32.mrb[67].mxu0 }
 0x15d   :  { %v1232_v55 = vmax.f32 %v946_v47, 0.0  ;;  %v949_v58 = vadd.f32 %v6216_v10, %v948_v51 }
 0x15e   :  { %1607 = vmatmul.mubr.bf16.gmra.mrb[172].mxu0 %v6297_v54  ;;  %v1235_v60 = vmax.f32 %v957_v50, 0.0 }
 0x15f   :  { %1616 = vmatprep.mubr.bf16.mxu0 %v8815_v49  ;;  %v1233_v61 = vmax.f32 %v949_v58, 0.0 }
 0x160   :  { %v6485_v22 = vpack.c.bf16 %v1235_v60, %v1234_v56 }
 0x161   :  { %v5571_v53 = vpop.f32.mrb[68].mxu0  ;;  %v6487_v41 = vpack.c.bf16 %v1233_v61, %v1232_v55 }
 0x162   :  { %v970_v9 = vadd.f32 %v5571_v53, %v6216_v10  ;;  %v961_v62 = vpop.f32.mrb[69].mxu0 }
 0x163   :  { %1727 = vmatmul.mubr.bf16.gmra.mrb[32].mxu1 %v6421_v52  ;;  %v962_v63 = vadd.f32 %v6216_v10, %v961_v62  ;;  %v5572_v0 = vpop.f32.mrb[70].mxu0 }
 0x164   :  { %1736 = vmatprep.mubr.bf16.mxu1 %v8815_v49  ;;  %v1238_v54 = vmax.f32 %v970_v9, 0.0  ;;  %v973_v1 = vadd.f32 %v5572_v0, %v6216_v10  ;;  %v964_v2 = vpop.f32.mrb[71].mxu0 }
 0x165   :  { %v1236_v3 = vmax.f32 %v962_v63, 0.0  ;;  %v965_v4 = vadd.f32 %v6216_v10, %v964_v2  ;;  %v5776_v2 = vld [vmem:[%s8807_s5 + $0x14] ss:$8 sps:$4 sm:$0xff]  }
 0x166   :  { %1617 = vmatmul.mubr.bf16.gmra.mrb[176].mxu0 %v6321_v14  ;;  %v1239_v5 = vmax.f32 %v973_v1, 0.0  ;;  %v5771_v14 = vld [vmem:[%s8807_s5] ss:$8 sps:$4 sm:$0xff]   ;;  %v5774_v1 = vld [vmem:[%s8807_s5 + $0x10] ss:$8 sps:$4 sm:$0xff]  }
 0x167   :  { %1626 = vmatprep.mubr.bf16.mxu0 %v8815_v49  ;;  %v1237_v6 = vmax.f32 %v965_v4, 0.0  ;;  %3341 = vmatpush1.bf16.msra.mxu1 %v5771_v14  ;;  %v6559_v14 = vld [vmem:[%s8805_s2] ss:$0 sm:$0xff] }
 0x168   :  { %v6497_v13 = vpack.c.bf16 %v1239_v5, %v1238_v54  ;;  %3342 = vmatprep.subr.bf16.mxu1 %v5776_v2 }
 0x169   :  { %v5575_v52 = vpop.f32.mrb[72].mxu0  ;;  %v6499_v38 = vpack.c.bf16 %v1237_v6, %v1236_v3 }
 0x16a   :  { %v986_v15 = vadd.f32 %v5575_v52, %v6216_v10  ;;  %v977_v16 = vpop.f32.mrb[73].mxu0 }
 0x16b   :  { %1737 = vmatmul.mubr.bf16.gmra.mrb[36].mxu1 %v6446_v11  ;;  %v978_v17 = vadd.f32 %v6216_v10, %v977_v16  ;;  %v5576_v59 = vpop.f32.mrb[74].mxu0 }
 0x16c   :  { %1746 = vmatprep.mubr.bf16.mxu1 %v8815_v49  ;;  %v1242_v18 = vmax.f32 %v986_v15, 0.0  ;;  %v989_v7 = vadd.f32 %v5576_v59, %v6216_v10  ;;  %v980_v19 = vpop.f32.mrb[75].mxu0  ;;  %3343 = vmatpush1.bf16.msra.mxu1 %v5774_v1 }
 0x16d   :  { %v1240_v21 = vmax.f32 %v978_v17, 0.0  ;;  %v981_v11 = vadd.f32 %v6216_v10, %v980_v19 }
 0x16e   :  { %1627 = vmatmul.mubr.bf16.gmra.mrb[180].mxu0 %v6319_v12  ;;  %v1243_v23 = vmax.f32 %v989_v7, 0.0 }
 0x16f   :  { %1636 = vmatprep.mubr.bf16.mxu0 %v8815_v49  ;;  %v1241_v26 = vmax.f32 %v981_v11, 0.0 }
 0x170   :  { %v6515_v27 = vpack.c.bf16 %v1243_v23, %v1242_v18 }
 0x171   :  { %v5579_v30 = vpop.f32.mrb[76].mxu0  ;;  %v6517_v31 = vpack.c.bf16 %v1241_v26, %v1240_v21 }
 0x172   :  { %v1002_v32 = vadd.f32 %v5579_v30, %v6216_v10  ;;  %v993_v34 = vpop.f32.mrb[77].mxu0 }
 0x173   :  { %1747 = vmatmul.mubr.bf16.gmra.mrb[40].mxu1 %v6444_v8  ;;  %v994_v35 = vadd.f32 %v6216_v10, %v993_v34  ;;  %v5580_v36 = vpop.f32.mrb[78].mxu0 }
 0x174   :  { %1756 = vmatprep.mubr.bf16.mxu1 %v8815_v49  ;;  %v1246_v12 = vmax.f32 %v1002_v32, 0.0  ;;  %v1005_v37 = vadd.f32 %v5580_v36, %v6216_v10  ;;  %v996_v57 = vpop.f32.mrb[79].mxu0 }
 0x175   :  { %v1244_v24 = vmax.f32 %v994_v35, 0.0  ;;  %v997_v39 = vadd.f32 %v6216_v10, %v996_v57 }
 0x176   :  { %1637 = vmatmul.mubr.bf16.gmra.mrb[184].mxu0 %v6341_v33  ;;  %v1247_v40 = vmax.f32 %v1005_v37, 0.0 }
 0x177   :  { %v1245_v42 = vmax.f32 %v997_v39, 0.0 }
 0x178   :  { %v6526_v45 = vpack.c.bf16 %v1247_v40, %v1246_v12 }
 0x179   :  { %v5583_v46 = vpop.f32.mrb[80].mxu0  ;;  %v6528_v8 = vpack.c.bf16 %v1245_v42, %v1244_v24 }
 0x17a   :  { %v1018_v43 = vadd.f32 %v5583_v46, %v6216_v10  ;;  %v1009_v47 = vpop.f32.mrb[81].mxu0 }
 0x17b   :  { %1757 = vmatmul.mubr.bf16.gmra.mrb[44].mxu1 %v6463_v29  ;;  %v1010_v48 = vadd.f32 %v6216_v10, %v1009_v47  ;;  %v5584_v56 = vpop.f32.mrb[82].mxu0 }
 0x17c   :  { %1766 = vmatprep.mubr.bf16.mxu1 %v8815_v49  ;;  %v1250_v50 = vmax.f32 %v1018_v43, 0.0  ;;  %v1021_v33 = vadd.f32 %v5584_v56, %v6216_v10  ;;  %v1012_v51 = vpop.f32.mrb[83].mxu0 }
 0x17d   :  { %v1248_v55 = vmax.f32 %v1010_v48, 0.0  ;;  %v1013_v58 = vadd.f32 %v6216_v10, %v1012_v51 }
 0x17e   :  { %v1251_v60 = vmax.f32 %v1021_v33, 0.0  ;;  %v5779_v33 = vld [vmem:[%s8807_s5 + $0x24] ss:$8 sps:$4 sm:$0xff]  }
 0x17f   :  { %v1249_v61 = vmax.f32 %v1013_v58, 0.0  ;;  %3344 = vmatprep.subr.bf16.mxu1 %v5779_v33 }
 0x180   :  { %v6536_v53 = vpack.c.bf16 %v1251_v60, %v1250_v50 }
 0x181   :  { %v5587_v9 = vpop.f32.mrb[84].mxu0  ;;  %v6538_v62 = vpack.c.bf16 %v1249_v61, %v1248_v55 }
 0x182   :  { %v1034_v29 = vadd.f32 %v5587_v9, %v6216_v10  ;;  %v1025_v63 = vpop.f32.mrb[85].mxu0 }
 0x183   :  { %1767 = vmatmul.mubr.bf16.gmra.mrb[48].mxu1 %v6461_v28  ;;  %v1026_v0 = vadd.f32 %v6216_v10, %v1025_v63  ;;  %v5588_v54 = vpop.f32.mrb[86].mxu0 }
 0x184   :  { %1776 = vmatprep.mubr.bf16.mxu1 %v8815_v49  ;;  %v1254_v3 = vmax.f32 %v1034_v29, 0.0  ;;  %v1037_v4 = vadd.f32 %v5588_v54, %v6216_v10  ;;  %v1028_v5 = vpop.f32.mrb[87].mxu0 }
 0x185   :  { %v1252_v6 = vmax.f32 %v1026_v0, 0.0  ;;  %v1029_v28 = vadd.f32 %v6216_v10, %v1028_v5 }
 0x186   :  { %v1255_v52 = vmax.f32 %v1037_v4, 0.0 }
 0x187   :  { %v1253_v15 = vmax.f32 %v1029_v28, 0.0 }
 0x188   :  { %v6552_v16 = vpack.c.bf16 %v1255_v52, %v1254_v3 }
 0x189   :  { %v5591_v17 = vpop.f32.mrb[88].mxu0  ;;  %v6554_v59 = vpack.c.bf16 %v1253_v15, %v1252_v6 }
 0x18a   :  { %v1050_v18 = vadd.f32 %v6559_v14, %v5591_v17  ;;  %v1041_v7 = vpop.f32.mrb[89].mxu0 }
 0x18b   :  { %1777 = vmatmul.mubr.bf16.gmra.mrb[52].mxu1 %v6475_v25  ;;  %v1042_v10 = vadd.f32 %v6559_v14, %v1041_v7  ;;  %v5592_v19 = vpop.f32.mrb[90].mxu0 }
 0x18c   :  { %1786 = vmatprep.mubr.bf16.mxu1 %v8815_v49  ;;  %v1258_v20 = vmax.f32 %v1050_v18, 0.0  ;;  %v1053_v21 = vadd.f32 %v6559_v14, %v5592_v19  ;;  %v1044_v11 = vpop.f32.mrb[91].mxu0 }
 0x18d   :  { %v1256_v23 = vmax.f32 %v1042_v10, 0.0  ;;  %v1045_v26 = vadd.f32 %v6559_v14, %v1044_v11 }
 0x18e   :  { %v1259_v30 = vmax.f32 %v1053_v21, 0.0 }
 0x18f   :  { %v1257_v32 = vmax.f32 %v1045_v26, 0.0 }
 0x190   :  { %v6567_v34 = vpack.c.bf16 %v1259_v30, %v1258_v20 }
 0x191   :  { %v5595_v35 = vpop.f32.mrb[92].mxu0  ;;  %v6569_v36 = vpack.c.bf16 %v1257_v32, %v1256_v23 }
 0x192   :  { %v1066_v25 = vadd.f32 %v6559_v14, %v5595_v35  ;;  %v1057_v12 = vpop.f32.mrb[93].mxu0 }
 0x193   :  { %1787 = vmatmul.mubr.bf16.gmra.mrb[56].mxu1 %v6473_v44  ;;  %v1058_v37 = vadd.f32 %v6559_v14, %v1057_v12  ;;  %v5596_v57 = vpop.f32.mrb[94].mxu0  ;;  %v5777_v44 = vld [vmem:[%s8807_s5 + $0x20] ss:$8 sps:$4 sm:$0xff]   ;;  %v5780_v12 = vld [vmem:[%s8807_s5 + $0x30] ss:$8 sps:$4 sm:$0xff]  }
 0x194   :  { %1796 = vmatprep.mubr.bf16.mxu1 %v8815_v49  ;;  %v1262_v24 = vmax.f32 %v1066_v25, 0.0  ;;  %v1069_v39 = vadd.f32 %v6559_v14, %v5596_v57  ;;  %v1060_v40 = vpop.f32.mrb[95].mxu0  ;;  %3345 = vmatpush1.bf16.msra.mxu1 %v5777_v44 }
 0x195   :  { %v1260_v42 = vmax.f32 %v1058_v37, 0.0  ;;  %v1061_v46 = vadd.f32 %v6559_v14, %v1060_v40 }
 0x196   :  { %v1263_v43 = vmax.f32 %v1069_v39, 0.0 }
 0x197   :  { %v1261_v47 = vmax.f32 %v1061_v46, 0.0 }
 0x198   :  { %v6577_v48 = vpack.c.bf16 %v1263_v43, %v1262_v24 }
 0x199   :  { %v5599_v56 = vpop.f32.mrb[96].mxu0  ;;  %v6579_v50 = vpack.c.bf16 %v1261_v47, %v1260_v42 }
 0x19a   :  { %v1082_v51 = vadd.f32 %v6559_v14, %v5599_v56  ;;  %v1073_v55 = vpop.f32.mrb[97].mxu0 }
 0x19b   :  { %1797 = vmatmul.mubr.bf16.gmra.mrb[60].mxu1 %v6487_v41  ;;  %v1074_v58 = vadd.f32 %v6559_v14, %v1073_v55  ;;  %v5600_v60 = vpop.f32.mrb[98].mxu0 }
 0x19c   :  { %1806 = vmatprep.mubr.bf16.mxu1 %v8815_v49  ;;  %v1266_v61 = vmax.f32 %v1082_v51, 0.0  ;;  %v1085_v9 = vadd.f32 %v6559_v14, %v5600_v60  ;;  %v1076_v29 = vpop.f32.mrb[99].mxu0 }
 0x19d   :  { %v1264_v63 = vmax.f32 %v1074_v58, 0.0  ;;  %v1077_v0 = vadd.f32 %v6559_v14, %v1076_v29 }
 0x19e   :  { %v1267_v54 = vmax.f32 %v1085_v9, 0.0 }
 0x19f   :  { %v1265_v1 = vmax.f32 %v1077_v0, 0.0 }
 0x1a0   :  { %v6593_v2 = vpack.c.bf16 %v1267_v54, %v1266_v61 }
 0x1a1   :  { %v5603_v3 = vpop.f32.mrb[100].mxu0  ;;  %v6595_v41 = vpack.c.bf16 %v1265_v1, %v1264_v63 }
 0x1a2   :  { %v1098_v4 = vadd.f32 %v6559_v14, %v5603_v3  ;;  %v1089_v5 = vpop.f32.mrb[101].mxu0  ;;  %v5783_v3 = vld [vmem:[%s8807_s5 + $0x40] ss:$8 sps:$4 sm:$0xff]  }
 0x1a3   :  { %1807 = vmatmul.mubr.bf16.gmra.mrb[64].mxu1 %v6485_v22  ;;  %v1090_v6 = vadd.f32 %v6559_v14, %v1089_v5  ;;  %v5604_v28 = vpop.f32.mrb[102].mxu0 }
 0x1a4   :  { %1816 = vmatprep.mubr.bf16.mxu1 %v8815_v49  ;;  %v1270_v52 = vmax.f32 %v1098_v4, 0.0  ;;  %v1101_v15 = vadd.f32 %v6559_v14, %v5604_v28  ;;  %v1092_v17 = vpop.f32.mrb[103].mxu0  ;;  %v5785_v4 = vld [vmem:[%s8807_s5 + $0x44] ss:$8 sps:$4 sm:$0xff]  }
 0x1a5   :  { %v1268_v18 = vmax.f32 %v1090_v6, 0.0  ;;  %v1093_v7 = vadd.f32 %v6559_v14, %v1092_v17 }
 0x1a6   :  { %v1271_v10 = vmax.f32 %v1101_v15, 0.0 }
 0x1a7   :  { %v1269_v19 = vmax.f32 %v1093_v7, 0.0 }
 0x1a8   :  { %v6603_v20 = vpack.c.bf16 %v1271_v10, %v1270_v52 }
 0x1a9   :  { %v5607_v21 = vpop.f32.mrb[104].mxu0  ;;  %v6605_v11 = vpack.c.bf16 %v1269_v19, %v1268_v18 }
 0x1aa   :  { %v1105_v22 = vpop.f32.mrb[105].mxu0  ;;  %v1114_v30 = vadd.f32 %v6559_v14, %v5607_v21 }
 0x1ab   :  { %1817 = vmatmul.mubr.bf16.gmra.mrb[68].mxu1 %v6499_v38  ;;  %v5608_v23 = vpop.f32.mrb[106].mxu0  ;;  %v1106_v32 = vadd.f32 %v6559_v14, %v1105_v22  ;;  %v5782_v38 = vld [vmem:[%s8807_s5 + $0x34] ss:$8 sps:$4 sm:$0xff]  }
 0x1ac   :  { %1826 = vmatprep.mubr.bf16.mxu1 %v8815_v49  ;;  %v1108_v26 = vpop.f32.mrb[107].mxu0  ;;  %v1117_v35 = vadd.f32 %v6559_v14, %v5608_v23  ;;  %3346 = vmatprep.subr.bf16.mxu1 %v5782_v38  ;;  %v1274_v57 = vmax.f32 %v1114_v30, 0.0 }
 0x1ad   :  { %v1109_v25 = vadd.f32 %v6559_v14, %v1108_v26  ;;  %3347 = vmatpush1.bf16.msra.mxu1 %v5780_v12  ;;  %v1272_v24 = vmax.f32 %v1106_v32, 0.0 }
 0x1ae   :  { %v1275_v39 = vmax.f32 %v1117_v35, 0.0  ;;  %3348 = vmatprep.subr.bf16.mxu1 %v5785_v4 }
 0x1af   :  { %v1273_v40 = vmax.f32 %v1109_v25, 0.0 }
 0x1b0   :  { %v6623_v56 = vpack.c.bf16 %v1275_v39, %v1274_v57  ;;  %v5786_v57 = vld [vmem:[%s8807_s5 + $0x50] ss:$8 sps:$4 sm:$0xff]  }
 0x1b1   :  { %v5611_v37 = vpop.f32.mrb[108].mxu0  ;;  %v6621_v47 = vpack.c.bf16 %v1273_v40, %v1272_v24  ;;  %3349 = vmatpush1.bf16.msra.mxu1 %v5783_v3  ;;  %v5788_v24 = vld [vmem:[%s8807_s5 + $0x54] ss:$8 sps:$4 sm:$0xff]  }
 0x1b2   :  { %v1121_v42 = vpop.f32.mrb[109].mxu0  ;;  %v1130_v58 = vadd.f32 %v6559_v14, %v5611_v37  ;;  %3350 = vmatprep.subr.bf16.mxu1 %v5788_v24 }
 0x1b3   :  { %1827 = vmatmul.mubr.bf16.gmra.mrb[72].mxu1 %v6497_v13  ;;  %v5612_v46 = vpop.f32.mrb[110].mxu0  ;;  %v1122_v13 = vadd.f32 %v6559_v14, %v1121_v42 }
 0x1b4   :  { %1836 = vmatprep.mubr.bf16.mxu1 %v8815_v49  ;;  %v1124_v43 = vpop.f32.mrb[111].mxu0  ;;  %v1133_v60 = vadd.f32 %v6559_v14, %v5612_v46  ;;  %v1278_v29 = vmax.f32 %v1130_v58, 0.0 }
 0x1b5   :  { %v1125_v61 = vadd.f32 %v6559_v14, %v1124_v43  ;;  %v1276_v63 = vmax.f32 %v1122_v13, 0.0  ;;  %3351 = vmatpush1.bf16.msra.mxu1 %v5786_v57 }
 0x1b6   :  { %v1279_v0 = vmax.f32 %v1133_v60, 0.0 }
 0x1b7   :  { %v1277_v54 = vmax.f32 %v1125_v61, 0.0 }
 0x1b8   :  { %v6641_v28 = vpack.c.bf16 %v1279_v0, %v1278_v29 }
 0x1b9   :  { %v5615_v44 = vpop.f32.mrb[112].mxu0  ;;  %v6639_v6 = vpack.c.bf16 %v1277_v54, %v1276_v63 }
 0x1ba   :  { %v1137_v33 = vpop.f32.mrb[113].mxu0  ;;  %v1146_v10 = vadd.f32 %v6559_v14, %v5615_v44 }
 0x1bb   :  { %1837 = vmatmul.mubr.bf16.gmra.mrb[76].mxu1 %v6517_v31  ;;  %v5616_v51 = vpop.f32.mrb[114].mxu0  ;;  %v1138_v19 = vadd.f32 %v6559_v14, %v1137_v33 }
 0x1bc   :  { %1846 = vmatprep.mubr.bf16.mxu1 %v8815_v49  ;;  %v1140_v55 = vpop.f32.mrb[115].mxu0  ;;  %v1149_v21 = vadd.f32 %v6559_v14, %v5616_v51  ;;  %v1282_v23 = vmax.f32 %v1146_v10, 0.0 }
 0x1bd   :  { %v1141_v22 = vadd.f32 %v6559_v14, %v1140_v55  ;;  %v1280_v26 = vmax.f32 %v1138_v19, 0.0 }
 0x1be   :  { %v1283_v30 = vmax.f32 %v1149_v21, 0.0 }
 0x1bf   :  { %v1281_v32 = vmax.f32 %v1141_v22, 0.0 }
 0x1c0   :  { %v6669_v40 = vpack.c.bf16 %v1283_v30, %v1282_v23 }
 0x1c1   :  { %v5619_v9 = vpop.f32.mrb[116].mxu0  ;;  %v6667_v39 = vpack.c.bf16 %v1281_v32, %v1280_v26 }
 0x1c2   :  { %v1153_v1 = vpop.f32.mrb[117].mxu0  ;;  %v1162_v51 = vadd.f32 %v6559_v14, %v5619_v9 }
 0x1c3   :  { %1847 = vmatmul.mubr.bf16.gmra.mrb[80].mxu1 %v6515_v27  ;;  %v5620_v31 = vpop.f32.mrb[118].mxu0  ;;  %v1154_v55 = vadd.f32 %v6559_v14, %v1153_v1 }
 0x1c4   :  { %v1156_v5 = vpop.f32.mrb[119].mxu0  ;;  %1856 = vmatprep.mubr.bf16.mxu1 %v8815_v49  ;;  %v1165_v58 = vadd.f32 %v6559_v14, %v5620_v31  ;;  %v1286_v60 = vmax.f32 %v1162_v51, 0.0 }
 0x1c5   :  { %v1157_v13 = vadd.f32 %v6559_v14, %v1156_v5  ;;  %v1284_v61 = vmax.f32 %v1154_v55, 0.0 }
 0x1c6   :  { %v1287_v29 = vmax.f32 %v1165_v58, 0.0 }
 0x1c7   :  { %v1285_v63 = vmax.f32 %v1157_v13, 0.0 }
 0x1c8   :  { %v6695_v4 = vpack.c.bf16 %v1287_v29, %v1286_v60 }
 0x1c9   :  { %v1478_v52 = vpop.f32.mrb[120].mxu0  ;;  %v6693_v3 = vpack.c.bf16 %v1285_v63, %v1284_v61 }
 0x1ca   :  { %v1480_v27 = vpop.f32.mrb[121].mxu0 }
 0x1cb   :  { %v1482_v15 = vpop.f32.mrb[122].mxu0  ;;  %1857 = vmatmul.mubr.bf16.gmra.mrb[84].mxu1 %v6528_v8 }
 0x1cc   :  { %v6644_v17 = vpack.c.bf16 %v1482_v15, %v1478_v52  ;;  %v1484_v18 = vpop.f32.mrb[123].mxu0  ;;  %1866 = vmatprep.mubr.bf16.mxu1 %v8815_v49  ;;  %v5789_v15 = vld [vmem:[%s8807_s5 + $0x60] ss:$8 sps:$4 sm:$0xff]  }
 0x1cd   :  { %v6647_v7 = vpack.c.bf16 %v1484_v18, %v1480_v27  ;;  %v5791_v18 = vld [vmem:[%s8807_s5 + $0x64] ss:$8 sps:$4 sm:$0xff]  }
 0x1ce   :  { %3352 = vmatprep.subr.bf16.mxu1 %v5791_v18 }
 0x1cf   :  { %2535 = vmatprep.mubr.bf16.mxu0 %v6647_v7  ;;  %3353 = vmatpush1.bf16.msra.mxu1 %v5789_v15  ;;  %v5794_v15 = vld [vmem:[%s8807_s5 + $0x74] ss:$8 sps:$4 sm:$0xff]  }
 0x1d0   :  { %2536 = vmatmul.mubr.bf16.vlgmr.msra.gmra.mrb[188].mxu0 %v6644_v17  ;;  %3354 = vmatprep.subr.bf16.mxu1 %v5794_v15 }
 0x1d1   :  { %v1488_v8 = vpop.f32.mrb[124].mxu0 }
 0x1d2   :  { %v1490_v35 = vpop.f32.mrb[125].mxu0 }
 0x1d3   :  { %v1492_v25 = vpop.f32.mrb[126].mxu0  ;;  %1867 = vmatmul.mubr.bf16.gmra.mrb[88].mxu1 %v6526_v45 }
 0x1d4   :  { %v6656_v12 = vpack.c.bf16 %v1492_v25, %v1488_v8  ;;  %v1494_v38 = vpop.f32.mrb[127].mxu0  ;;  %1876 = vmatprep.mubr.bf16.mxu1 %v8815_v49 }
 0x1d5   :  { %v6659_v37 = vpack.c.bf16 %v1494_v38, %v1490_v35 }
 0x1d7   :  { %2545 = vmatprep.mubr.bf16.mxu0 %v6659_v37 }
 0x1d8   :  { %2546 = vmatmul.mubr.bf16.gmra.mrb[192].mxu0 %v6656_v12 }
 0x1d9   :  { %v1498_v45 = vpop.f32.mrb[128].mxu0 }
 0x1da   :  { %v1500_v42 = vpop.f32.mrb[129].mxu0 }
 0x1db   :  { %v1502_v46 = vpop.f32.mrb[130].mxu0  ;;  %1877 = vmatmul.mubr.bf16.gmra.mrb[92].mxu1 %v6538_v62 }
 0x1dc   :  { %v6674_v43 = vpack.c.bf16 %v1502_v46, %v1498_v45  ;;  %v1504_v44 = vpop.f32.mrb[131].mxu0  ;;  %1886 = vmatprep.mubr.bf16.mxu1 %v8815_v49 }
 0x1dd   :  { %v6677_v33 = vpack.c.bf16 %v1504_v44, %v1500_v42 }
 0x1df   :  { %2555 = vmatprep.mubr.bf16.mxu0 %v6677_v33 }
 0x1e0   :  { %2556 = vmatmul.mubr.bf16.gmra.mrb[196].mxu0 %v6674_v43 }
 0x1e1   :  { %v1508_v62 = vpop.f32.mrb[132].mxu0 }
 0x1e2   :  { %v1510_v0 = vpop.f32.mrb[133].mxu0 }
 0x1e3   :  { %v1512_v54 = vpop.f32.mrb[134].mxu0  ;;  %1887 = vmatmul.mubr.bf16.gmra.mrb[96].mxu1 %v6536_v53 }
 0x1e4   :  { %v6686_v9 = vpack.c.bf16 %v1512_v54, %v1508_v62  ;;  %v1514_v1 = vpop.f32.mrb[135].mxu0  ;;  %1896 = vmatprep.mubr.bf16.mxu1 %v8815_v49 }
 0x1e5   :  { %v6689_v31 = vpack.c.bf16 %v1514_v1, %v1510_v0 }
 0x1e6   :  { %v2197_v14 = vmax.bf16 %v6686_v9, %v6644_v17 }
 0x1e7   :  { %v2198_v5 = vmax.bf16 %v6689_v31, %v6647_v7  ;;  %2565 = vmatprep.mubr.bf16.mxu0 %v6689_v31 }
 0x1e8   :  { %2566 = vmatmul.mubr.bf16.gmra.mrb[200].mxu0 %v6686_v9 }
 0x1e9   :  { %v1518_v53 = vpop.f32.mrb[136].mxu0 }
 0x1ea   :  { %v1520_v52 = vpop.f32.mrb[137].mxu0 }
 0x1eb   :  { %v1522_v27 = vpop.f32.mrb[138].mxu0  ;;  %1897 = vmatmul.mubr.bf16.gmra.mrb[100].mxu1 %v6554_v59 }
 0x1ec   :  { %v6708_v10 = vpack.c.bf16 %v1522_v27, %v1518_v53  ;;  %v1524_v19 = vpop.f32.mrb[139].mxu0  ;;  %1906 = vmatprep.mubr.bf16.mxu1 %v8815_v49  ;;  %v5792_v27 = vld [vmem:[%s8807_s5 + $0x70] ss:$8 sps:$4 sm:$0xff]  }
 0x1ed   :  { %v2086_v21 = vpack.c.bf16 %v1524_v19, %v1520_v52  ;;  %3355 = vmatpush1.bf16.msra.mxu1 %v5792_v27 }
 0x1ee   :  { %v2199_v22 = vmax.bf16 %v6708_v10, %v6656_v12 }
 0x1ef   :  { %v2200_v59 = vmax.bf16 %v2086_v21, %v6659_v37  ;;  %2575 = vmatprep.mubr.bf16.mxu0 %v2086_v21 }
 0x1f0   :  { %2576 = vmatmul.mubr.bf16.gmra.mrb[204].mxu0 %v6708_v10 }
 0x1f1   :  { %v1528_v8 = vpop.f32.mrb[140].mxu0 }
 0x1f2   :  { %v1530_v23 = vpop.f32.mrb[141].mxu0 }
 0x1f3   :  { %v1532_v26 = vpop.f32.mrb[142].mxu0  ;;  %1907 = vmatmul.mubr.bf16.gmra.mrb[104].mxu1 %v6552_v16 }
 0x1f4   :  { %v2087_v30 = vpack.c.bf16 %v1532_v26, %v1528_v8  ;;  %v1534_v32 = vpop.f32.mrb[143].mxu0  ;;  %1916 = vmatprep.mubr.bf16.mxu1 %v8815_v49 }
 0x1f5   :  { %v2088_v35 = vpack.c.bf16 %v1534_v32, %v1530_v23  ;;  %v1648_v25 = vpop.f32.mrb[0].mxu1 }
 0x1f6   :  { %v2201_v38 = vmax.bf16 %v2087_v30, %v6674_v43  ;;  %v1650_v57 = vpop.f32.mrb[1].mxu1 }
 0x1f7   :  { %v2202_v24 = vmax.bf16 %v2088_v35, %v6677_v33  ;;  %v1652_v37 = vpop.f32.mrb[2].mxu1  ;;  %2585 = vmatprep.mubr.bf16.mxu0 %v2088_v35 }
 0x1f8   :  { %v6719_v45 = vpack.c.bf16 %v1652_v37, %v1648_v25  ;;  %v1654_v42 = vpop.f32.mrb[3].mxu1  ;;  %2586 = vmatmul.mubr.bf16.gmra.mrb[208].mxu0 %v2087_v30 }
 0x1f9   :  { %v6721_v46 = vpack.c.bf16 %v1654_v42, %v1650_v57  ;;  %v1538_v16 = vpop.f32.mrb[144].mxu0 }
 0x1fa   :  { %v1540_v44 = vpop.f32.mrb[145].mxu0 }
 0x1fb   :  { %v1542_v51 = vpop.f32.mrb[146].mxu0  ;;  %1917 = vmatmul.mubr.bf16.gmra.mrb[108].mxu1 %v6569_v36  ;;  %v6760_v57 = vmax.bf16 %v2202_v24, %v6721_v46 }
 0x1fc   :  { %v6724_v55 = vpack.c.bf16 %v1542_v51, %v1538_v16  ;;  %v1544_v58 = vpop.f32.mrb[147].mxu0  ;;  %1926 = vmatprep.mubr.bf16.mxu1 %v8815_v49 }
 0x1fd   :  { %v6727_v43 = vpack.c.bf16 %v1544_v58, %v1540_v44 }
 0x1fe   :  { %v1658_v33 = vpop.f32.mrb[4].mxu1 }
 0x1ff   :  { %v1660_v13 = vpop.f32.mrb[5].mxu1  ;;  %2595 = vmatprep.mubr.bf16.mxu0 %v6727_v43 }
 0x200   :  { %v1662_v62 = vpop.f32.mrb[6].mxu1  ;;  %2596 = vmatmul.mubr.bf16.gmra.mrb[212].mxu0 %v6724_v55 }
 0x201   :  { %v6731_v60 = vpack.c.bf16 %v1662_v62, %v1658_v33  ;;  %v1548_v61 = vpop.f32.mrb[148].mxu0  ;;  %v1664_v29 = vpop.f32.mrb[7].mxu1 }
 0x202   :  { %v6733_v63 = vpack.c.bf16 %v1664_v29, %v1660_v13  ;;  %v1550_v36 = vpop.f32.mrb[149].mxu0 }
 0x203   :  { %v1552_v0 = vpop.f32.mrb[150].mxu0  ;;  %1927 = vmatmul.mubr.bf16.gmra.mrb[112].mxu1 %v6567_v34 }
 0x204   :  { %v6736_v54 = vpack.c.bf16 %v1552_v0, %v1548_v61  ;;  %v1554_v1 = vpop.f32.mrb[151].mxu0  ;;  %1936 = vmatprep.mubr.bf16.mxu1 %v8815_v49  ;;  %v2257_v0 = vmax.bf16 %v2197_v14, %v6731_v60 }
 0x205   :  { %v2092_v53 = vpack.c.bf16 %v1554_v1, %v1550_v36 }
 0x206   :  { %v1668_v52 = vpop.f32.mrb[8].mxu1 }
 0x207   :  { %v6745_v18 = vmax.bf16 %v2200_v59, %v2092_v53  ;;  %v1670_v19 = vpop.f32.mrb[9].mxu1  ;;  %2605 = vmatprep.mubr.bf16.mxu0 %v2092_v53  ;;  %v6754_v59 = vmax.bf16 %v2201_v38, %v6719_v45 }
 0x208   :  { %v1672_v34 = vpop.f32.mrb[10].mxu1  ;;  %2606 = vmatmul.mubr.bf16.gmra.mrb[216].mxu0 %v6736_v54 }
 0x209   :  { %v6748_v21 = vpack.c.bf16 %v1672_v34, %v1668_v52  ;;  %v1558_v8 = vpop.f32.mrb[152].mxu0  ;;  %v1674_v23 = vpop.f32.mrb[11].mxu1  ;;  %v5795_v52 = vld [vmem:[%s8807_s5 + $0x80] ss:$8 sps:$4 sm:$0xff]  }
 0x20a   :  { %v6750_v26 = vpack.c.bf16 %v1674_v23, %v1670_v19  ;;  %v1560_v30 = vpop.f32.mrb[153].mxu0 }
 0x20b   :  { %v1562_v32 = vpop.f32.mrb[154].mxu0  ;;  %1937 = vmatmul.mubr.bf16.gmra.mrb[116].mxu1 %v6579_v50 }
 0x20c   :  { %v6756_v35 = vpack.c.bf16 %v1562_v32, %v1558_v8  ;;  %v1564_v25 = vpop.f32.mrb[155].mxu0  ;;  %1946 = vmatprep.mubr.bf16.mxu1 %v8815_v49  ;;  %v2260_v7 = vmax.bf16 %v6745_v18, %v6750_v26 }
 0x20d   :  { %v6762_v37 = vpack.c.bf16 %v1564_v25, %v1560_v30 }
 0x20e   :  { %v2261_v42 = vmax.bf16 %v6754_v59, %v6756_v35  ;;  %v1678_v16 = vpop.f32.mrb[12].mxu1 }
 0x20f   :  { %v2262_v50 = vmax.bf16 %v6760_v57, %v6762_v37  ;;  %v1680_v44 = vpop.f32.mrb[13].mxu1  ;;  %2615 = vmatprep.mubr.bf16.mxu0 %v6762_v37 }
 0x210   :  { %v1682_v38 = vpop.f32.mrb[14].mxu1  ;;  %2616 = vmatmul.mubr.bf16.gmra.mrb[220].mxu0 %v6756_v35 }
 0x211   :  { %v6770_v51 = vpack.c.bf16 %v1682_v38, %v1678_v16  ;;  %v1568_v58 = vpop.f32.mrb[156].mxu0  ;;  %v1684_v24 = vpop.f32.mrb[15].mxu1 }
 0x212   :  { %v6772_v33 = vpack.c.bf16 %v1684_v24, %v1680_v44  ;;  %v1570_v13 = vpop.f32.mrb[157].mxu0 }
 0x213   :  { %v1572_v62 = vpop.f32.mrb[158].mxu0  ;;  %1947 = vmatmul.mubr.bf16.gmra.mrb[120].mxu1 %v6577_v48  ;;  %v5797_v48 = vld [vmem:[%s8807_s5 + $0x84] ss:$8 sps:$4 sm:$0xff]  }
 0x214   :  { %v2095_v61 = vpack.c.bf16 %v1572_v62, %v1568_v58  ;;  %v1574_v29 = vpop.f32.mrb[159].mxu0  ;;  %1956 = vmatprep.mubr.bf16.mxu1 %v8815_v49  ;;  %3356 = vmatprep.subr.bf16.mxu1 %v5797_v48 }
 0x215   :  { %v2096_v36 = vpack.c.bf16 %v1574_v29, %v1570_v13  ;;  %3357 = vmatpush1.bf16.msra.mxu1 %v5795_v52  ;;  %v6825_v29 = vmax.bf16 %v2262_v50, %v6772_v33 }
 0x216   :  { %v2203_v1 = vmax.bf16 %v2095_v61, %v6724_v55  ;;  %v1688_v53 = vpop.f32.mrb[16].mxu1 }
 0x217   :  { %v2204_v27 = vmax.bf16 %v2096_v36, %v6727_v43  ;;  %v1690_v15 = vpop.f32.mrb[17].mxu1  ;;  %2625 = vmatprep.mubr.bf16.mxu0 %v2096_v36 }
 0x218   :  { %v2215_v19 = vmax.bf16 %v2257_v0, %v2203_v1  ;;  %v1692_v34 = vpop.f32.mrb[18].mxu1  ;;  %2626 = vmatmul.mubr.bf16.gmra.mrb[224].mxu0 %v2095_v61 }
 0x219   :  { %v2258_v17 = vmax.bf16 %v2204_v27, %v2198_v5  ;;  %v6791_v9 = vpack.c.bf16 %v1692_v34, %v1688_v53  ;;  %v1578_v14 = vpop.f32.mrb[160].mxu0  ;;  %v1694_v55 = vpop.f32.mrb[19].mxu1  ;;  %v2259_v5 = vmax.bf16 %v2199_v22, %v6748_v21  ;;  %v6816_v22 = vmax.bf16 %v2261_v42, %v6770_v51 }
 0x21a   :  { %v6793_v8 = vpack.c.bf16 %v1694_v55, %v1690_v15  ;;  %v1580_v23 = vpop.f32.mrb[161].mxu0 }
 0x21b   :  { %v1582_v30 = vpop.f32.mrb[162].mxu0  ;;  %1957 = vmatmul.mubr.bf16.gmra.mrb[124].mxu1 %v6595_v41  ;;  %v2209_v15 = vmax.bf16 %v2215_v19, %v6791_v9 }
 0x21c   :  { %v2216_v43 = vmax.bf16 %v6793_v8, %v6733_v63  ;;  %v2097_v32 = vpack.c.bf16 %v1582_v30, %v1578_v14  ;;  %v1584_v59 = vpop.f32.mrb[163].mxu0  ;;  %1966 = vmatprep.mubr.bf16.mxu1 %v8815_v49  ;;  %v5798_v30 = vld [vmem:[%s8807_s5 + $0x90] ss:$8 sps:$4 sm:$0xff]  }
 0x21d   :  { %v2098_v31 = vpack.c.bf16 %v1584_v59, %v1580_v23 }
 0x21e   :  { %v6805_v35 = vmax.bf16 %v2258_v17, %v2216_v43  ;;  %v2205_v41 = vmax.bf16 %v2097_v32, %v6736_v54  ;;  %v1698_v25 = vpop.f32.mrb[20].mxu1  ;;  %v5800_v43 = vld [vmem:[%s8807_s5 + $0x94] ss:$8 sps:$4 sm:$0xff]  }
 0x21f   :  { %v6808_v16 = vmax.bf16 %v2260_v7, %v2098_v31  ;;  %v1700_v44 = vpop.f32.mrb[21].mxu1  ;;  %2635 = vmatprep.mubr.bf16.mxu0 %v2098_v31  ;;  %3358 = vmatprep.subr.bf16.mxu1 %v5800_v43  ;;  %v5801_v43 = vld [vmem:[%s8807_s5 + $0xa0] ss:$8 sps:$4 sm:$0xff]  }
 0x220   :  { %v2217_v38 = vmax.bf16 %v2259_v5, %v2205_v41  ;;  %v1702_v58 = vpop.f32.mrb[22].mxu1  ;;  %2636 = vmatmul.mubr.bf16.gmra.mrb[228].mxu0 %v2097_v32  ;;  %3359 = vmatpush1.bf16.msra.mxu1 %v5798_v30 }
 0x221   :  { %v6810_v24 = vpack.c.bf16 %v1702_v58, %v1698_v25  ;;  %v1588_v18 = vpop.f32.mrb[164].mxu0  ;;  %v1704_v13 = vpop.f32.mrb[23].mxu1 }
 0x222   :  { %v6812_v62 = vpack.c.bf16 %v1704_v13, %v1700_v44  ;;  %v1590_v12 = vpop.f32.mrb[165].mxu0 }
 0x223   :  { %v1592_v10 = vpop.f32.mrb[166].mxu0  ;;  %1967 = vmatmul.mubr.bf16.gmra.mrb[128].mxu1 %v6593_v2  ;;  %v2211_v44 = vmax.bf16 %v2217_v38, %v6810_v24 }
 0x224   :  { %v6818_v54 = vpack.c.bf16 %v1592_v10, %v1588_v18  ;;  %v1594_v61 = vpop.f32.mrb[167].mxu0  ;;  %1976 = vmatprep.mubr.bf16.mxu1 %v8815_v49  ;;  %v2212_v18 = vmax.bf16 %v6808_v16, %v6812_v62 }
 0x225   :  { %v6827_v36 = vpack.c.bf16 %v1594_v61, %v1590_v12 }
 0x226   :  { %v2213_v0 = vmax.bf16 %v6816_v22, %v6818_v54  ;;  %v1708_v2 = vpop.f32.mrb[24].mxu1 }
 0x227   :  { %v2214_v42 = vmax.bf16 %v6825_v29, %v6827_v36  ;;  %v1710_v1 = vpop.f32.mrb[25].mxu1  ;;  %2645 = vmatprep.mubr.bf16.mxu0 %v6827_v36 }
 0x228   :  { %v1712_v53 = vpop.f32.mrb[26].mxu1  ;;  %2646 = vmatmul.mubr.bf16.gmra.mrb[232].mxu0 %v6818_v54 }
 0x229   :  { %v6835_v52 = vpack.c.bf16 %v1712_v53, %v1708_v2  ;;  %v1598_v57 = vpop.f32.mrb[168].mxu0  ;;  %v1714_v37 = vpop.f32.mrb[27].mxu1 }
 0x22a   :  { %v6837_v50 = vpack.c.bf16 %v1714_v37, %v1710_v1  ;;  %v1600_v48 = vpop.f32.mrb[169].mxu0 }
 0x22b   :  { %v1602_v27 = vpop.f32.mrb[170].mxu0  ;;  %1977 = vmatmul.mubr.bf16.gmra.mrb[132].mxu1 %v6605_v11  ;;  %v6874_v16 = vmax.bf16 %v2213_v0, %v6835_v52 }
 0x22c   :  { %v2101_v34 = vpack.c.bf16 %v1602_v27, %v1598_v57  ;;  %v1604_v17 = vpop.f32.mrb[171].mxu0  ;;  %1986 = vmatprep.mubr.bf16.mxu1 %v8815_v49  ;;  %v6880_v37 = vmax.bf16 %v2214_v42, %v6837_v50 }
 0x22d   :  { %v6842_v14 = vpack.c.bf16 %v1604_v17, %v1600_v48 }
 0x22e   :  { %v6844_v55 = vmax.bf16 %v2209_v15, %v2101_v34  ;;  %v1718_v23 = vpop.f32.mrb[28].mxu1 }
 0x22f   :  { %v2264_v11 = vmax.bf16 %v6805_v35, %v6842_v14  ;;  %v1720_v19 = vpop.f32.mrb[29].mxu1  ;;  %2655 = vmatprep.mubr.bf16.mxu0 %v6842_v14 }
 0x230   :  { %v1722_v32 = vpop.f32.mrb[30].mxu1  ;;  %2656 = vmatmul.mubr.bf16.gmra.mrb[236].mxu0 %v2101_v34 }
 0x231   :  { %v6855_v59 = vpack.c.bf16 %v1722_v32, %v1718_v23  ;;  %v1608_v7 = vpop.f32.mrb[172].mxu0  ;;  %v1724_v31 = vpop.f32.mrb[31].mxu1 }
 0x232   :  { %v6857_v5 = vpack.c.bf16 %v1724_v31, %v1720_v19  ;;  %v1610_v41 = vpop.f32.mrb[173].mxu0  ;;  %v5803_v19 = vld [vmem:[%s8807_s5 + $0xa4] ss:$8 sps:$4 sm:$0xff]  }
 0x233   :  { %v1612_v25 = vpop.f32.mrb[174].mxu0  ;;  %1987 = vmatmul.mubr.bf16.gmra.mrb[136].mxu1 %v6603_v20  ;;  %3360 = vmatprep.subr.bf16.mxu1 %v5803_v19 }
 0x234   :  { %v2103_v35 = vpack.c.bf16 %v1612_v25, %v1608_v7  ;;  %v1614_v58 = vpop.f32.mrb[175].mxu0  ;;  %1996 = vmatprep.mubr.bf16.mxu1 %v8815_v49  ;;  %v2287_v7 = vmax.bf16 %v6844_v55, %v6855_v59  ;;  %v6905_v25 = vmax.bf16 %v2264_v11, %v6857_v5  ;;  %3361 = vmatpush1.bf16.msra.mxu1 %v5801_v43 }
 0x235   :  { %v2104_v13 = vpack.c.bf16 %v1614_v58, %v1610_v41 }
 0x236   :  { %v6864_v12 = vmax.bf16 %v2211_v44, %v2103_v35  ;;  %v1728_v10 = vpop.f32.mrb[32].mxu1 }
 0x237   :  { %v6866_v22 = vmax.bf16 %v2212_v18, %v2104_v13  ;;  %v1730_v54 = vpop.f32.mrb[33].mxu1  ;;  %2665 = vmatprep.mubr.bf16.mxu0 %v2104_v13 }
 0x238   :  { %v1732_v61 = vpop.f32.mrb[34].mxu1  ;;  %2666 = vmatmul.mubr.bf16.gmra.mrb[240].mxu0 %v2103_v35 }
 0x239   :  { %v6868_v20 = vpack.c.bf16 %v1732_v61, %v1728_v10  ;;  %v1618_v38 = vpop.f32.mrb[176].mxu0  ;;  %v1734_v29 = vpop.f32.mrb[35].mxu1 }
 0x23a   :  { %v6870_v36 = vpack.c.bf16 %v1734_v29, %v1730_v54  ;;  %v1620_v2 = vpop.f32.mrb[177].mxu0 }
 0x23b   :  { %v1622_v1 = vpop.f32.mrb[178].mxu0  ;;  %1997 = vmatmul.mubr.bf16.gmra.mrb[140].mxu1 %v6621_v47  ;;  %v2223_v29 = vmax.bf16 %v6864_v12, %v6868_v20 }
 0x23c   :  { %v6876_v53 = vpack.c.bf16 %v1622_v1, %v1618_v38  ;;  %v1624_v57 = vpop.f32.mrb[179].mxu0  ;;  %2006 = vmatprep.mubr.bf16.mxu1 %v8815_v49 }
 0x23d   :  { %v6882_v48 = vpack.c.bf16 %v1624_v57, %v1620_v2  ;;  %v2224_v57 = vmax.bf16 %v6866_v22, %v6870_v36 }
 0x23e   :  { %v2225_v27 = vmax.bf16 %v6874_v16, %v6876_v53  ;;  %v1738_v15 = vpop.f32.mrb[36].mxu1 }
 0x23f   :  { %v2226_v47 = vmax.bf16 %v6880_v37, %v6882_v48  ;;  %v1740_v34 = vpop.f32.mrb[37].mxu1  ;;  %2675 = vmatprep.mubr.bf16.mxu0 %v6882_v48 }
 0x240   :  { %v1742_v0 = vpop.f32.mrb[38].mxu1  ;;  %2676 = vmatmul.mubr.bf16.gmra.mrb[244].mxu0 %v6876_v53 }
 0x241   :  { %v6890_v17 = vpack.c.bf16 %v1742_v0, %v1738_v15  ;;  %v1628_v14 = vpop.f32.mrb[180].mxu0  ;;  %v1744_v42 = vpop.f32.mrb[39].mxu1 }
 0x242   :  { %v6892_v23 = vpack.c.bf16 %v1744_v42, %v1740_v34  ;;  %v1630_v30 = vpop.f32.mrb[181].mxu0 }
 0x243   :  { %v1632_v32 = vpop.f32.mrb[182].mxu0  ;;  %2007 = vmatmul.mubr.bf16.gmra.mrb[144].mxu1 %v6623_v56 }
 0x244   :  { %v2107_v31 = vpack.c.bf16 %v1632_v32, %v1628_v14  ;;  %v1634_v41 = vpop.f32.mrb[183].mxu0  ;;  %2016 = vmatprep.mubr.bf16.mxu1 %v8815_v49  ;;  %v5804_v32 = vld [vmem:[%s8807_s5 + $0xb0] ss:$8 sps:$4 sm:$0xff]  }
 0x245   :  { %v6907_v44 = vpack.c.bf16 %v1634_v41, %v1630_v30 }
 0x246   :  { %v6909_v35 = vmax.bf16 %v2287_v7, %v2107_v31  ;;  %v1748_v58 = vpop.f32.mrb[40].mxu1  ;;  %v5806_v7 = vld [vmem:[%s8807_s5 + $0xb4] ss:$8 sps:$4 sm:$0xff]  }
 0x247   :  { %v2270_v56 = vmax.bf16 %v6905_v25, %v6907_v44  ;;  %v1750_v18 = vpop.f32.mrb[41].mxu1  ;;  %2685 = vmatprep.mubr.bf16.mxu0 %v6907_v44  ;;  %3362 = vmatprep.subr.bf16.mxu1 %v5806_v7  ;;  %v5810_v25 = vld [vmem:[%s8807_s5 + $0xd0] ss:$8 sps:$4 sm:$0xff]   ;;  %v5812_v44 = vld [vmem:[%s8807_s5 + $0xd4] ss:$8 sps:$4 sm:$0xff]  }
 0x248   :  { %v1752_v55 = vpop.f32.mrb[42].mxu1  ;;  %2686 = vmatmul.mubr.bf16.gmra.mrb[248].mxu0 %v2107_v31  ;;  %3363 = vmatpush1.bf16.msra.mxu1 %v5804_v32 }
 0x249   :  { %v6914_v13 = vpack.c.bf16 %v1752_v55, %v1748_v58  ;;  %v1638_v10 = vpop.f32.mrb[184].mxu0  ;;  %v1754_v54 = vpop.f32.mrb[43].mxu1 }
 0x24a   :  { %v6916_v11 = vpack.c.bf16 %v1754_v54, %v1750_v18  ;;  %v1640_v61 = vpop.f32.mrb[185].mxu0 }
 0x24b   :  { %v1642_v38 = vpop.f32.mrb[186].mxu0  ;;  %2017 = vmatmul.mubr.bf16.gmra.mrb[148].mxu1 %v6639_v6 }
 0x24c   :  { %v2109_v2 = vpack.c.bf16 %v1642_v38, %v1638_v10  ;;  %v1644_v1 = vpop.f32.mrb[187].mxu0  ;;  %2026 = vmatprep.mubr.bf16.mxu1 %v8815_v49 }
 0x24d   :  { %v2110_v15 = vpack.c.bf16 %v1644_v1, %v1640_v61 }
 0x24e   :  { %v6924_v34 = vmax.bf16 %v2223_v29, %v2109_v2  ;;  %v1758_v0 = vpop.f32.mrb[44].mxu1 }
 0x24f   :  { %v6926_v14 = vmax.bf16 %v2224_v57, %v2110_v15  ;;  %v1760_v42 = vpop.f32.mrb[45].mxu1  ;;  %2695 = vmatprep.mubr.bf16.mxu0 %v2110_v15 }
 0x250   :  { %v1762_v30 = vpop.f32.mrb[46].mxu1  ;;  %2696 = vmatmul.mubr.bf16.gmra.mrb[252].mxu0 %v2109_v2 }
 0x251   :  { %v6928_v6 = vpack.c.bf16 %v1762_v30, %v1758_v0  ;;  %v1764_v12 = vpop.f32.mrb[47].mxu1  ;;  %2705 = vmatprep.mubr.bf16.mxu0 %v6721_v46 }
 0x252   :  { %v6931_v43 = vpack.c.bf16 %v1764_v12, %v1760_v42 }
 0x253   :  { %2027 = vmatmul.mubr.bf16.gmra.mrb[152].mxu1 %v6641_v28 }
 0x254   :  { %2036 = vmatprep.mubr.bf16.mxu1 %v8815_v49 }
 0x256   :  { %v1768_v22 = vpop.f32.mrb[48].mxu1 }
 0x257   :  { %v1770_v19 = vpop.f32.mrb[49].mxu1 }
 0x258   :  { %v1772_v31 = vpop.f32.mrb[50].mxu1  ;;  %2706 = vmatmul.mubr.bf16.gmra.mrb[0].mxu0 %v6719_v45 }
 0x259   :  { %v6942_v46 = vpack.c.bf16 %v1772_v31, %v1768_v22  ;;  %v1774_v41 = vpop.f32.mrb[51].mxu1  ;;  %2715 = vmatprep.mubr.bf16.mxu0 %v6733_v63 }
 0x25a   :  { %v6945_v28 = vpack.c.bf16 %v1774_v41, %v1770_v19 }
 0x25b   :  { %2037 = vmatmul.mubr.bf16.gmra.mrb[156].mxu1 %v6667_v39 }
 0x25c   :  { %2046 = vmatprep.mubr.bf16.mxu1 %v8815_v49 }
 0x25e   :  { %v1778_v58 = vpop.f32.mrb[52].mxu1 }
 0x25f   :  { %v1780_v18 = vpop.f32.mrb[53].mxu1 }
 0x260   :  { %v1782_v55 = vpop.f32.mrb[54].mxu1  ;;  %2716 = vmatmul.mubr.bf16.gmra.mrb[4].mxu0 %v6731_v60 }
 0x261   :  { %v6950_v10 = vpack.c.bf16 %v1782_v55, %v1778_v58  ;;  %v1784_v45 = vpop.f32.mrb[55].mxu1  ;;  %2725 = vmatprep.mubr.bf16.mxu0 %v6750_v26 }
 0x262   :  { %v6953_v54 = vpack.c.bf16 %v1784_v45, %v1780_v18 }
 0x263   :  { %2047 = vmatmul.mubr.bf16.gmra.mrb[160].mxu1 %v6669_v40  ;;  %v5807_v40 = vld [vmem:[%s8807_s5 + $0xc0] ss:$8 sps:$4 sm:$0xff]  }
 0x264   :  { %2056 = vmatprep.mubr.bf16.mxu1 %v8815_v49 }
 0x266   :  { %v1788_v63 = vpop.f32.mrb[56].mxu1 }
 0x267   :  { %v1790_v39 = vpop.f32.mrb[57].mxu1 }
 0x268   :  { %v1792_v61 = vpop.f32.mrb[58].mxu1  ;;  %2726 = vmatmul.mubr.bf16.gmra.mrb[8].mxu0 %v6748_v21  ;;  %v5809_v21 = vld [vmem:[%s8807_s5 + $0xc4] ss:$8 sps:$4 sm:$0xff]  }
 0x269   :  { %v6958_v38 = vpack.c.bf16 %v1792_v61, %v1788_v63  ;;  %v1794_v29 = vpop.f32.mrb[59].mxu1  ;;  %2735 = vmatprep.mubr.bf16.mxu0 %v6772_v33  ;;  %3364 = vmatprep.subr.bf16.mxu1 %v5809_v21 }
 0x26a   :  { %v6961_v60 = vpack.c.bf16 %v1794_v29, %v1790_v39  ;;  %3365 = vmatpush1.bf16.msra.mxu1 %v5807_v40 }
 0x26b   :  { %2057 = vmatmul.mubr.bf16.gmra.mrb[164].mxu1 %v6693_v3  ;;  %3366 = vmatprep.subr.bf16.mxu1 %v5812_v44 }
 0x26c   :  { %2066 = vmatprep.mubr.bf16.mxu1 %v8815_v49 }
 0x26e   :  { %v1798_v26 = vpop.f32.mrb[60].mxu1  ;;  %3367 = vmatpush1.bf16.msra.mxu1 %v5810_v25 }
 0x26f   :  { %v1800_v2 = vpop.f32.mrb[61].mxu1 }
 0x270   :  { %v1802_v1 = vpop.f32.mrb[62].mxu1  ;;  %2736 = vmatmul.mubr.bf16.gmra.mrb[12].mxu0 %v6770_v51 }
 0x271   :  { %v6972_v33 = vpack.c.bf16 %v1802_v1, %v1798_v26  ;;  %v1804_v57 = vpop.f32.mrb[63].mxu1  ;;  %2745 = vmatprep.mubr.bf16.mxu0 %v6793_v8  ;;  %v2276_v8 = vmax.bf16 %v2270_v56, %v6916_v11  ;;  %v2278_v56 = vmax.bf16 %v6926_v14, %v6931_v43  ;;  %v2274_v14 = vmax.bf16 %v2226_v47, %v6892_v23  ;;  %v5815_v1 = vld [vmem:[%s8807_s5 + $0xe4] ss:$8 sps:$4 sm:$0xff]  }
 0x272   :  { %v6975_v3 = vpack.c.bf16 %v1804_v57, %v1800_v2  ;;  %v5813_v2 = vld [vmem:[%s8807_s5 + $0xe0] ss:$8 sps:$4 sm:$0xff]   ;;  %3368 = vmatprep.subr.bf16.mxu1 %v5815_v1  ;;  %v2277_v1 = vmax.bf16 %v6924_v34, %v6928_v6 }
 0x273   :  { %2067 = vmatmul.mubr.bf16.gmra.mrb[168].mxu1 %v6695_v4  ;;  %v2280_v39 = vmax.bf16 %v2274_v14, %v6945_v28 }
 0x274   :  { %3369 = vmatpush1.bf16.msra.mxu1 %v5813_v2 }
 0x276   :  { %v1808_v15 = vpop.f32.mrb[64].mxu1 }
 0x277   :  { %v1810_v0 = vpop.f32.mrb[65].mxu1 }
 0x278   :  { %v1812_v42 = vpop.f32.mrb[66].mxu1  ;;  %2746 = vmatmul.mubr.bf16.gmra.mrb[16].mxu0 %v6791_v9 }
 0x279   :  { %v6979_v30 = vpack.c.bf16 %v1812_v42, %v1808_v15  ;;  %v1814_v12 = vpop.f32.mrb[67].mxu1  ;;  %2755 = vmatprep.mubr.bf16.mxu0 %v6812_v62 }
 0x27a   :  { %v6982_v51 = vpack.c.bf16 %v1814_v12, %v1810_v0 }
 0x27b   :  { %v2227_v25 = vmax.bf16 %v6979_v30, %v6950_v10 }
 0x27c   :  { %v2228_v4 = vmax.bf16 %v6982_v51, %v6953_v54 }
 0x27e   :  { %v6990_v22 = vmax.bf16 %v2276_v8, %v2228_v4  ;;  %v1818_v19 = vpop.f32.mrb[68].mxu1 }
 0x27f   :  { %v1820_v32 = vpop.f32.mrb[69].mxu1 }
 0x280   :  { %v1822_v9 = vpop.f32.mrb[70].mxu1  ;;  %2756 = vmatmul.mubr.bf16.gmra.mrb[20].mxu0 %v6810_v24 }
 0x281   :  { %v6993_v7 = vpack.c.bf16 %v1822_v9, %v1818_v19  ;;  %v1824_v62 = vpop.f32.mrb[71].mxu1  ;;  %2765 = vmatprep.mubr.bf16.mxu0 %v6837_v50 }
 0x282   :  { %v6996_v31 = vpack.c.bf16 %v1824_v62, %v1820_v32 }
 0x284   :  { %v2230_v24 = vmax.bf16 %v6996_v31, %v6961_v60 }
 0x286   :  { %v7008_v41 = vmax.bf16 %v2278_v56, %v2230_v24  ;;  %v1828_v50 = vpop.f32.mrb[72].mxu1 }
 0x287   :  { %v1830_v58 = vpop.f32.mrb[73].mxu1 }
 0x288   :  { %v1832_v18 = vpop.f32.mrb[74].mxu1  ;;  %2766 = vmatmul.mubr.bf16.gmra.mrb[24].mxu0 %v6835_v52 }
 0x289   :  { %v7011_v55 = vpack.c.bf16 %v1832_v18, %v1828_v50  ;;  %v1834_v45 = vpop.f32.mrb[75].mxu1  ;;  %2775 = vmatprep.mubr.bf16.mxu0 %v6857_v5 }
 0x28a   :  { %v7018_v63 = vpack.c.bf16 %v1834_v45, %v1830_v58 }
 0x28c   :  { %v2232_v61 = vmax.bf16 %v7018_v63, %v6975_v3 }
 0x28e   :  { %v7023_v29 = vmax.bf16 %v2280_v39, %v2232_v61  ;;  %v1838_v52 = vpop.f32.mrb[76].mxu1 }
 0x28f   :  { %v1840_v26 = vpop.f32.mrb[77].mxu1 }
 0x290   :  { %v1842_v40 = vpop.f32.mrb[78].mxu1  ;;  %2776 = vmatmul.mubr.bf16.gmra.mrb[28].mxu0 %v6855_v59 }
 0x291   :  { %v7026_v5 = vpack.c.bf16 %v1842_v40, %v1838_v52  ;;  %v1844_v21 = vpop.f32.mrb[79].mxu1  ;;  %2785 = vmatprep.mubr.bf16.mxu0 %v6870_v36 }
 0x292   :  { %v7029_v37 = vpack.c.bf16 %v1844_v21, %v1840_v26 }
 0x296   :  { %v1848_v48 = vpop.f32.mrb[80].mxu1 }
 0x297   :  { %v1850_v47 = vpop.f32.mrb[81].mxu1 }
 0x298   :  { %v1852_v57 = vpop.f32.mrb[82].mxu1  ;;  %2786 = vmatmul.mubr.bf16.gmra.mrb[32].mxu0 %v6868_v20 }
 0x299   :  { %v7038_v59 = vpack.c.bf16 %v1852_v57, %v1848_v48  ;;  %v1854_v15 = vpop.f32.mrb[83].mxu1  ;;  %2795 = vmatprep.mubr.bf16.mxu0 %v6892_v23  ;;  %v2229_v48 = vmax.bf16 %v6993_v7, %v6958_v38 }
 0x29a   :  { %v7041_v36 = vpack.c.bf16 %v1854_v15, %v1850_v47 }
 0x29e   :  { %v1858_v0 = vpop.f32.mrb[84].mxu1 }
 0x29f   :  { %v1860_v42 = vpop.f32.mrb[85].mxu1 }
 0x2a0   :  { %v1862_v12 = vpop.f32.mrb[86].mxu1  ;;  %2796 = vmatmul.mubr.bf16.gmra.mrb[36].mxu0 %v6890_v17 }
 0x2a1   :  { %v7044_v8 = vpack.c.bf16 %v1862_v12, %v1858_v0  ;;  %v1864_v4 = vpop.f32.mrb[87].mxu1  ;;  %2805 = vmatprep.mubr.bf16.mxu0 %v6916_v11  ;;  %v2269_v11 = vmax.bf16 %v6909_v35, %v6914_v13  ;;  %v2283_v0 = vmax.bf16 %v2277_v1, %v2229_v48 }
 0x2a2   :  { %v7047_v20 = vpack.c.bf16 %v1864_v4, %v1860_v42 }
 0x2a3   :  { %v7049_v19 = vpop.f32.mrb[188].mxu0  ;;  %v2275_v18 = vmax.bf16 %v2269_v11, %v2227_v25  ;;  %v2231_v11 = vmax.bf16 %v7011_v55, %v6972_v33 }
 0x2a4   :  { %v7051_v32 = vpop.f32.mrb[189].mxu0 }
 0x2a5   :  { %v7053_v23 = vpop.f32.mrb[190].mxu0 }
 0x2a6   :  { %v1868_v9 = vpop.f32.mrb[88].mxu1  ;;  %v7055_v62 = vpop.f32.mrb[191].mxu0 }
 0x2a7   :  { %v1870_v44 = vpop.f32.mrb[89].mxu1 }
 0x2a8   :  { %v1872_v56 = vpop.f32.mrb[90].mxu1  ;;  %2806 = vmatmul.mubr.bf16.gmra.mrb[40].mxu0 %v6914_v13  ;;  %v5816_v13 = vld [vmem:[%s8807_s5 + $0xf0] ss:$8 sps:$4 sm:$0xff]  }
 0x2a9   :  { %v7062_v24 = vpack.c.bf16 %v1872_v56, %v1868_v9  ;;  %v1874_v50 = vpop.f32.mrb[91].mxu1  ;;  %2815 = vmatprep.mubr.bf16.mxu0 %v6931_v43  ;;  %v5818_v43 = vld [vmem:[%s8807_s5 + $0xf4] ss:$8 sps:$4 sm:$0xff]   ;;  %v2273_v56 = vmax.bf16 %v2225_v27, %v6890_v17 }
 0x2aa   :  { %v7065_v58 = vpack.c.bf16 %v1874_v50, %v1870_v44  ;;  %3370 = vmatprep.subr.bf16.mxu1 %v5818_v43 }
 0x2ab   :  { %v2233_v45 = vmax.bf16 %v7062_v24, %v7026_v5  ;;  %v7069_v14 = vpop.f32.mrb[192].mxu0  ;;  %3371 = vmatpush1.bf16.msra.mxu1 %v5816_v13 }
 0x2ac   :  { %v2234_v39 = vmax.bf16 %v7065_v58, %v7029_v37  ;;  %v7073_v61 = vpop.f32.mrb[193].mxu0  ;;  %4131 = vmatprep.subr.bf16.mxu1 %v8815_v49 }
 0x2ad   :  { %v7075_v52 = vmax.bf16 %v2275_v18, %v2233_v45  ;;  %v7077_v35 = vpop.f32.mrb[194].mxu0  ;;  %v2279_v45 = vmax.bf16 %v2273_v56, %v6942_v46 }
 0x2ae   :  { %v7086_v26 = vmax.bf16 %v6990_v22, %v2234_v39  ;;  %v1878_v40 = vpop.f32.mrb[92].mxu1  ;;  %v7088_v21 = vpop.f32.mrb[195].mxu0 }
 0x2af   :  { %v1880_v47 = vpop.f32.mrb[93].mxu1  ;;  %v2285_v43 = vmax.bf16 %v2279_v45, %v2231_v11 }
 0x2b0   :  { %v1882_v2 = vpop.f32.mrb[94].mxu1  ;;  %2816 = vmatmul.mubr.bf16.gmra.mrb[44].mxu0 %v6928_v6 }
 0x2b1   :  { %v7095_v57 = vpack.c.bf16 %v1882_v2, %v1878_v40  ;;  %v1884_v15 = vpop.f32.mrb[95].mxu1  ;;  %2825 = vmatprep.mubr.bf16.mxu0 %v6945_v28 }
 0x2b2   :  { %v7099_v22 = vpack.c.bf16 %v1884_v15, %v1880_v47 }
 0x2b3   :  { %v2235_v42 = vmax.bf16 %v7095_v57, %v7038_v59  ;;  %v7103_v12 = vpop.f32.mrb[196].mxu0 }
 0x2b4   :  { %8822 = vst [vmem:[#allocation2_spill] sm:$0xff] %v7103_v12  ;;  %v2236_v4 = vmax.bf16 %v7099_v22, %v7041_v36  ;;  %v7107_v9 = vpop.f32.mrb[197].mxu0 }
 0x2b5   :  { %8823 = vst [vmem:[#allocation3_spill] sm:$0xff] %v7107_v9  ;;  %v7109_v34 = vmax.bf16 %v2283_v0, %v2235_v42  ;;  %v7111_v6 = vpop.f32.mrb[198].mxu0 }
 0x2b6   :  { %8824 = vst [vmem:[#allocation4_spill] sm:$0xff] %v7111_v6  ;;  %v7114_v28 = vmax.bf16 %v7008_v41, %v2236_v4  ;;  %v1888_v25 = vpop.f32.mrb[96].mxu1  ;;  %v7116_v44 = vpop.f32.mrb[199].mxu0 }
 0x2b7   :  { %8825 = vst [vmem:[#allocation5_spill] sm:$0xff] %v7116_v44  ;;  %v1890_v50 = vpop.f32.mrb[97].mxu1 }
 0x2b8   :  { %v1892_v18 = vpop.f32.mrb[98].mxu1  ;;  %2826 = vmatmul.mubr.bf16.gmra.mrb[48].mxu0 %v6942_v46 }
 0x2b9   :  { %v7126_v39 = vpack.c.bf16 %v1892_v18, %v1888_v25  ;;  %v1894_v41 = vpop.f32.mrb[99].mxu1  ;;  %2835 = vmatprep.mubr.bf16.mxu0 %v6953_v54 }
 0x2ba   :  { %v7129_v13 = vpack.c.bf16 %v1894_v41, %v1890_v50 }
 0x2bb   :  { %v2237_v16 = vmax.bf16 %v7126_v39, %v7044_v8  ;;  %v7133_v53 = vpop.f32.mrb[200].mxu0 }
 0x2bc   :  { %v2238_v27 = vmax.bf16 %v7129_v13, %v7047_v20  ;;  %v7137_v17 = vpop.f32.mrb[201].mxu0 }
 0x2bd   :  { %v7139_v40 = vmax.bf16 %v2285_v43, %v2237_v16  ;;  %v7141_v46 = vpop.f32.mrb[202].mxu0 }
 0x2be   :  { %v7144_v48 = vmax.bf16 %v7023_v29, %v2238_v27  ;;  %v1898_v54 = vpop.f32.mrb[100].mxu1  ;;  %v7146_v47 = vpop.f32.mrb[203].mxu0 }
 0x2bf   :  { %v1900_v2 = vpop.f32.mrb[101].mxu1 }
 0x2c0   :  { %v1902_v1 = vpop.f32.mrb[102].mxu1  ;;  %2836 = vmatmul.mubr.bf16.gmra.mrb[52].mxu0 %v6950_v10 }
 0x2c1   :  { %v7149_v15 = vpack.c.bf16 %v1902_v1, %v1898_v54  ;;  %v1904_v0 = vpop.f32.mrb[103].mxu1  ;;  %2845 = vmatprep.mubr.bf16.mxu0 %v6961_v60 }
 0x2c2   :  { %v7152_v42 = vpack.c.bf16 %v1904_v0, %v1900_v2 }
 0x2c3   :  { %v7154_v4 = vpop.f32.mrb[204].mxu0 }
 0x2c4   :  { %v7156_v25 = vpop.f32.mrb[205].mxu0 }
 0x2c5   :  { %v7158_v29 = vpop.f32.mrb[206].mxu0 }
 0x2c6   :  { %v1908_v56 = vpop.f32.mrb[104].mxu1  ;;  %v7160_v11 = vpop.f32.mrb[207].mxu0 }
 0x2c7   :  { %v1910_v50 = vpop.f32.mrb[105].mxu1 }
 0x2c8   :  { %v1912_v18 = vpop.f32.mrb[106].mxu1  ;;  %2846 = vmatmul.mubr.bf16.gmra.mrb[56].mxu0 %v6958_v38 }
 0x2c9   :  { %v7163_v10 = vpack.c.bf16 %v1912_v18, %v1908_v56  ;;  %v1914_v45 = vpop.f32.mrb[107].mxu1  ;;  %2855 = vmatprep.mubr.bf16.mxu0 %v6975_v3 }
 0x2ca   :  { %v7166_v60 = vpack.c.bf16 %v1914_v45, %v1910_v50 }
 0x2cb   :  { %v7168_v41 = vpop.f32.mrb[208].mxu0 }
 0x2cc   :  { %8826 = vst [vmem:[#allocation6_spill] sm:$0xff] %v7168_v41  ;;  %v7170_v43 = vpop.f32.mrb[209].mxu0 }
 0x2cd   :  { %8827 = vst [vmem:[#allocation7_spill] sm:$0xff] %v7170_v43  ;;  %v7172_v16 = vpop.f32.mrb[210].mxu0 }
 0x2ce   :  { %8828 = vst [vmem:[#allocation8_spill] sm:$0xff] %v7172_v16  ;;  %v1918_v27 = vpop.f32.mrb[108].mxu1  ;;  %v7174_v54 = vpop.f32.mrb[211].mxu0 }
 0x2cf   :  { %8829 = vst [vmem:[#allocation9_spill] sm:$0xff] %v7174_v54  ;;  %v1920_v2 = vpop.f32.mrb[109].mxu1 }
 0x2d0   :  { %v1922_v1 = vpop.f32.mrb[110].mxu1  ;;  %2856 = vmatmul.mubr.bf16.gmra.mrb[60].mxu0 %v6972_v33 }
 0x2d1   :  { %v7177_v38 = vpack.c.bf16 %v1922_v1, %v1918_v27  ;;  %v1924_v0 = vpop.f32.mrb[111].mxu1  ;;  %2865 = vmatprep.mubr.bf16.mxu0 %v6982_v51 }
 0x2d2   :  { %v7180_v3 = vpack.c.bf16 %v1924_v0, %v1920_v2 }
 0x2d3   :  { %v7182_v56 = vpop.f32.mrb[212].mxu0 }
 0x2d4   :  { %v7184_v50 = vpop.f32.mrb[213].mxu0 }
 0x2d5   :  { %v7186_v18 = vpop.f32.mrb[214].mxu0 }
 0x2d6   :  { %v1928_v45 = vpop.f32.mrb[112].mxu1  ;;  %v7188_v49 = vpop.f32.mrb[215].mxu0 }
 0x2d7   :  { %v1930_v16 = vpop.f32.mrb[113].mxu1 }
 0x2d8   :  { %v1932_v41 = vpop.f32.mrb[114].mxu1  ;;  %2866 = vmatmul.mubr.bf16.gmra.mrb[64].mxu0 %v6979_v30 }
 0x2d9   :  { %v7191_v33 = vpack.c.bf16 %v1932_v41, %v1928_v45  ;;  %v1934_v27 = vpop.f32.mrb[115].mxu1  ;;  %2875 = vmatprep.mubr.bf16.mxu0 %v6996_v31 }
 0x2da   :  { %v7194_v51 = vpack.c.bf16 %v1934_v27, %v1930_v16 }
 0x2db   :  { %v2239_v2 = vmax.bf16 %v7191_v33, %v7149_v15  ;;  %v7198_v1 = vpop.f32.mrb[216].mxu0 }
 0x2dc   :  { %8830 = vst [vmem:[#allocation10_spill] sm:$0xff] %v7198_v1  ;;  %v2240_v0 = vmax.bf16 %v7194_v51, %v7152_v42  ;;  %v7202_v54 = vpop.f32.mrb[217].mxu0 }
 0x2dd   :  { %v7205_v44 = vmax.bf16 %v7075_v52, %v2239_v2  ;;  %v7207_v30 = vpop.f32.mrb[218].mxu0 }
 0x2de   :  { %8831 = vst [vmem:[#allocation11_spill] sm:$0xff] %v7207_v30  ;;  %v7210_v41 = vmax.bf16 %v7086_v26, %v2240_v0  ;;  %v1938_v31 = vpop.f32.mrb[116].mxu1  ;;  %v7212_v16 = vpop.f32.mrb[219].mxu0 }
 0x2df   :  { %v1940_v45 = vpop.f32.mrb[117].mxu1 }
 0x2e0   :  { %v1942_v27 = vpop.f32.mrb[118].mxu1  ;;  %2876 = vmatmul.mubr.bf16.gmra.mrb[68].mxu0 %v6993_v7 }
 0x2e1   :  { %v7215_v43 = vpack.c.bf16 %v1942_v27, %v1938_v31  ;;  %v1944_v6 = vpop.f32.mrb[119].mxu1  ;;  %2885 = vmatprep.mubr.bf16.mxu0 %v7018_v63 }
 0x2e2   :  { %v7218_v9 = vpack.c.bf16 %v1944_v6, %v1940_v45 }
 0x2e3   :  { %v2241_v52 = vmax.bf16 %v7215_v43, %v7163_v10  ;;  %v7222_v2 = vpop.f32.mrb[220].mxu0 }
 0x2e4   :  { %8832 = vst [vmem:[#allocation12_spill] sm:$0xff] %v7222_v2  ;;  %v2242_v26 = vmax.bf16 %v7218_v9, %v7166_v60  ;;  %v7226_v0 = vpop.f32.mrb[221].mxu0 }
 0x2e5   :  { %8833 = vst [vmem:[#allocation13_spill] sm:$0xff] %v7226_v0  ;;  %v7229_v30 = vmax.bf16 %v7109_v34, %v2241_v52  ;;  %v7231_v7 = vpop.f32.mrb[222].mxu0 }
 0x2e6   :  { %8834 = vst [vmem:[#allocation14_spill] sm:$0xff] %v7231_v7  ;;  %v7234_v31 = vmax.bf16 %v7114_v28, %v2242_v26  ;;  %v1948_v63 = vpop.f32.mrb[120].mxu1  ;;  %v7236_v6 = vpop.f32.mrb[223].mxu0 }
 0x2e7   :  { %8835 = vst [vmem:[#allocation15_spill] sm:$0xff] %v7236_v6  ;;  %v1950_v45 = vpop.f32.mrb[121].mxu1 }
 0x2e8   :  { %v1952_v27 = vpop.f32.mrb[122].mxu1  ;;  %2886 = vmatmul.mubr.bf16.gmra.mrb[72].mxu0 %v7011_v55 }
 0x2e9   :  { %v7239_v2 = vpack.c.bf16 %v1952_v27, %v1948_v63  ;;  %v1954_v12 = vpop.f32.mrb[123].mxu1  ;;  %2895 = vmatprep.mubr.bf16.mxu0 %v7029_v37 }
 0x2ea   :  { %v7242_v0 = vpack.c.bf16 %v1954_v12, %v1950_v45 }
 0x2eb   :  { %v2243_v34 = vmax.bf16 %v7239_v2, %v7177_v38  ;;  %v7246_v52 = vpop.f32.mrb[224].mxu0 }
 0x2ec   :  { %8836 = vst [vmem:[#allocation16_spill] sm:$0xff] %v7246_v52  ;;  %v2244_v28 = vmax.bf16 %v7242_v0, %v7180_v3  ;;  %v7250_v26 = vpop.f32.mrb[225].mxu0 }
 0x2ed   :  { %8837 = vst [vmem:[#allocation17_spill] sm:$0xff] %v7250_v26  ;;  %v7253_v7 = vmax.bf16 %v7139_v40, %v2243_v34  ;;  %v7255_v55 = vpop.f32.mrb[226].mxu0 }
 0x2ee   :  { %8838 = vst [vmem:[#allocation18_spill] sm:$0xff] %v7255_v55  ;;  %v7258_v63 = vmax.bf16 %v7144_v48, %v2244_v28  ;;  %v1958_v37 = vpop.f32.mrb[124].mxu1  ;;  %v7260_v12 = vpop.f32.mrb[227].mxu0 }
 0x2ef   :  { %8839 = vst [vmem:[#allocation19_spill] sm:$0xff] %v7260_v12  ;;  %v1960_v45 = vpop.f32.mrb[125].mxu1 }
 0x2f0   :  { %v1962_v27 = vpop.f32.mrb[126].mxu1  ;;  %2896 = vmatmul.mubr.bf16.gmra.mrb[76].mxu0 %v7026_v5 }
 0x2f1   :  { %v7263_v52 = vpack.c.bf16 %v1962_v27, %v1958_v37  ;;  %v1964_v6 = vpop.f32.mrb[127].mxu1  ;;  %2905 = vmatprep.mubr.bf16.mxu0 %v7041_v36 }
 0x2f2   :  { %v7266_v26 = vpack.c.bf16 %v1964_v6, %v1960_v45 }
 0x2f3   :  { %v7268_v40 = vpop.f32.mrb[228].mxu0 }
 0x2f4   :  { %8840 = vst [vmem:[#allocation20_spill] sm:$0xff] %v7268_v40  ;;  %v7270_v34 = vpop.f32.mrb[229].mxu0 }
 0x2f5   :  { %8841 = vst [vmem:[#allocation21_spill] sm:$0xff] %v7270_v34  ;;  %v7272_v48 = vpop.f32.mrb[230].mxu0 }
 0x2f6   :  { %8842 = vst [vmem:[#allocation22_spill] sm:$0xff] %v7272_v48  ;;  %v1968_v28 = vpop.f32.mrb[128].mxu1  ;;  %v7274_v55 = vpop.f32.mrb[231].mxu0 }
 0x2f7   :  { %8843 = vst [vmem:[#allocation23_spill] sm:$0xff] %v7274_v55  ;;  %v1970_v12 = vpop.f32.mrb[129].mxu1 }
 0x2f8   :  { %v1972_v1 = vpop.f32.mrb[130].mxu1  ;;  %2906 = vmatmul.mubr.bf16.gmra.mrb[80].mxu0 %v7038_v59 }
 0x2f9   :  { %v7277_v5 = vpack.c.bf16 %v1972_v1, %v1968_v28  ;;  %v1974_v37 = vpop.f32.mrb[131].mxu1  ;;  %2915 = vmatprep.mubr.bf16.mxu0 %v7047_v20 }
 0x2fa   :  { %v7280_v36 = vpack.c.bf16 %v1974_v37, %v1970_v12 }
 0x2fb   :  { %v7282_v6 = vpop.f32.mrb[232].mxu0 }
 0x2fc   :  { %8844 = vst [vmem:[#allocation24_spill] sm:$0xff] %v7282_v6  ;;  %v7284_v45 = vpop.f32.mrb[233].mxu0 }
 0x2fd   :  { %8845 = vst [vmem:[#allocation25_spill] sm:$0xff] %v7284_v45  ;;  %v7286_v27 = vpop.f32.mrb[234].mxu0 }
 0x2fe   :  { %8846 = vst [vmem:[#allocation26_spill] sm:$0xff] %v7286_v27  ;;  %v1978_v48 = vpop.f32.mrb[132].mxu1  ;;  %v7288_v40 = vpop.f32.mrb[235].mxu0 }
 0x2ff   :  { %8847 = vst [vmem:[#allocation27_spill] sm:$0xff] %v7288_v40  ;;  %v1980_v55 = vpop.f32.mrb[133].mxu1 }
 0x300   :  { %v1982_v34 = vpop.f32.mrb[134].mxu1  ;;  %2916 = vmatmul.mubr.bf16.gmra.mrb[84].mxu0 %v7044_v8 }
 0x301   :  { %v7291_v59 = vpack.c.bf16 %v1982_v34, %v1978_v48  ;;  %v1984_v1 = vpop.f32.mrb[135].mxu1  ;;  %2925 = vmatprep.mubr.bf16.mxu0 %v7065_v58 }
 0x302   :  { %v7294_v20 = vpack.c.bf16 %v1984_v1, %v1980_v55 }
 0x303   :  { %v7296_v12 = vpop.f32.mrb[236].mxu0 }
 0x304   :  { %8848 = vst [vmem:[#allocation28_spill] sm:$0xff] %v7296_v12  ;;  %v7298_v28 = vpop.f32.mrb[237].mxu0 }
 0x305   :  { %8849 = vst [vmem:[#allocation29_spill] sm:$0xff] %v7298_v28  ;;  %v7300_v37 = vpop.f32.mrb[238].mxu0 }
 0x306   :  { %8850 = vst [vmem:[#allocation30_spill] sm:$0xff] %v7300_v37  ;;  %v1988_v27 = vpop.f32.mrb[136].mxu1  ;;  %v7302_v6 = vpop.f32.mrb[239].mxu0 }
 0x307   :  { %8851 = vst [vmem:[#allocation31_spill] sm:$0xff] %v7302_v6  ;;  %v1990_v40 = vpop.f32.mrb[137].mxu1 }
 0x308   :  { %v1992_v45 = vpop.f32.mrb[138].mxu1  ;;  %2926 = vmatmul.mubr.bf16.gmra.mrb[88].mxu0 %v7062_v24 }
 0x309   :  { %v7305_v8 = vpack.c.bf16 %v1992_v45, %v1988_v27  ;;  %v1994_v34 = vpop.f32.mrb[139].mxu1  ;;  %2935 = vmatprep.mubr.bf16.mxu0 %v7099_v22 }
 0x30a   :  { %v7308_v58 = vpack.c.bf16 %v1994_v34, %v1990_v40 }
 0x30b   :  { %v2245_v55 = vmax.bf16 %v7305_v8, %v7263_v52  ;;  %v7312_v48 = vpop.f32.mrb[240].mxu0 }
 0x30c   :  { %8852 = vst [vmem:[#allocation32_spill] sm:$0xff] %v7312_v48  ;;  %v2246_v1 = vmax.bf16 %v7308_v58, %v7266_v26  ;;  %v7316_v37 = vpop.f32.mrb[241].mxu0 }
 0x30d   :  { %8853 = vst [vmem:[#allocation33_spill] sm:$0xff] %v7316_v37  ;;  %v7319_v12 = vmax.bf16 %v7205_v44, %v2245_v55  ;;  %v7321_v24 = vpop.f32.mrb[242].mxu0 }
 0x30e   :  { %8854 = vst [vmem:[#allocation34_spill] sm:$0xff] %v7321_v24  ;;  %v7324_v45 = vmax.bf16 %v7210_v41, %v2246_v1  ;;  %v1998_v22 = vpop.f32.mrb[140].mxu1  ;;  %v7326_v40 = vpop.f32.mrb[243].mxu0 }
 0x30f   :  { %8855 = vst [vmem:[#allocation35_spill] sm:$0xff] %v7326_v40  ;;  %v2000_v27 = vpop.f32.mrb[141].mxu1 }
 0x310   :  { %v2002_v34 = vpop.f32.mrb[142].mxu1  ;;  %2936 = vmatmul.mubr.bf16.gmra.mrb[92].mxu0 %v7095_v57 }
 0x311   :  { %v7329_v48 = vpack.c.bf16 %v2002_v34, %v1998_v22  ;;  %v2004_v6 = vpop.f32.mrb[143].mxu1  ;;  %2945 = vmatprep.mubr.bf16.mxu0 %v7129_v13 }
 0x312   :  { %v7332_v37 = vpack.c.bf16 %v2004_v6, %v2000_v27 }
 0x313   :  { %v2247_v44 = vmax.bf16 %v7329_v48, %v7277_v5  ;;  %v7336_v55 = vpop.f32.mrb[244].mxu0 }
 0x314   :  { %8856 = vst [vmem:[#allocation36_spill] sm:$0xff] %v7336_v55  ;;  %v2248_v41 = vmax.bf16 %v7332_v37, %v7280_v36  ;;  %v7340_v1 = vpop.f32.mrb[245].mxu0 }
 0x315   :  { %8857 = vst [vmem:[#allocation37_spill] sm:$0xff] %v7340_v1  ;;  %v7343_v24 = vmax.bf16 %v7229_v30, %v2247_v44  ;;  %v7345_v57 = vpop.f32.mrb[246].mxu0 }
 0x316   :  { %8858 = vst [vmem:[#allocation38_spill] sm:$0xff] %v7345_v57  ;;  %v7348_v22 = vmax.bf16 %v7234_v31, %v2248_v41  ;;  %v2008_v13 = vpop.f32.mrb[144].mxu1  ;;  %v7350_v6 = vpop.f32.mrb[247].mxu0 }
 0x317   :  { %8859 = vst [vmem:[#allocation39_spill] sm:$0xff] %v7350_v6  ;;  %v2010_v27 = vpop.f32.mrb[145].mxu1 }
 0x318   :  { %v2012_v34 = vpop.f32.mrb[146].mxu1  ;;  %2946 = vmatmul.mubr.bf16.gmra.mrb[96].mxu0 %v7126_v39 }
 0x319   :  { %v7353_v55 = vpack.c.bf16 %v2012_v34, %v2008_v13  ;;  %v2014_v40 = vpop.f32.mrb[147].mxu1  ;;  %2955 = vmatprep.mubr.bf16.mxu0 %v7152_v42 }
 0x31a   :  { %v7356_v1 = vpack.c.bf16 %v2014_v40, %v2010_v27 }
 0x31b   :  { %v2249_v30 = vmax.bf16 %v7353_v55, %v7291_v59  ;;  %v7360_v44 = vpop.f32.mrb[248].mxu0 }
 0x31c   :  { %8860 = vst [vmem:[#allocation40_spill] sm:$0xff] %v7360_v44  ;;  %v2250_v31 = vmax.bf16 %v7356_v1, %v7294_v20  ;;  %v7364_v41 = vpop.f32.mrb[249].mxu0 }
 0x31d   :  { %8861 = vst [vmem:[#allocation41_spill] sm:$0xff] %v7364_v41  ;;  %v7367_v57 = vmax.bf16 %v7253_v7, %v2249_v30  ;;  %v7369_v39 = vpop.f32.mrb[250].mxu0 }
 0x31e   :  { %8862 = vst [vmem:[#allocation42_spill] sm:$0xff] %v7369_v39  ;;  %v7372_v13 = vmax.bf16 %v7258_v63, %v2250_v31  ;;  %v2018_v42 = vpop.f32.mrb[148].mxu1  ;;  %v7374_v40 = vpop.f32.mrb[251].mxu0 }
 0x31f   :  { %8863 = vst [vmem:[#allocation43_spill] sm:$0xff] %v7374_v40  ;;  %v2020_v27 = vpop.f32.mrb[149].mxu1 }
 0x320   :  { %v2022_v34 = vpop.f32.mrb[150].mxu1  ;;  %2956 = vmatmul.mubr.bf16.gmra.mrb[100].mxu0 %v7149_v15 }
 0x321   :  { %v7377_v44 = vpack.c.bf16 %v2022_v34, %v2018_v42  ;;  %v2024_v6 = vpop.f32.mrb[151].mxu1  ;;  %2965 = vmatprep.mubr.bf16.mxu0 %v7166_v60 }
 0x322   :  { %v7380_v41 = vpack.c.bf16 %v2024_v6, %v2020_v27 }
 0x323   :  { %v7382_v7 = vpop.f32.mrb[252].mxu0 }
 0x324   :  { %8864 = vst [vmem:[#allocation44_spill] sm:$0xff] %v7382_v7  ;;  %v7384_v30 = vpop.f32.mrb[253].mxu0 }
 0x325   :  { %8865 = vst [vmem:[#allocation45_spill] sm:$0xff] %v7384_v30  ;;  %v7386_v63 = vpop.f32.mrb[254].mxu0 }
 0x326   :  { %8866 = vst [vmem:[#allocation46_spill] sm:$0xff] %v7386_v63  ;;  %v2028_v31 = vpop.f32.mrb[152].mxu1  ;;  %v7388_v39 = vpop.f32.mrb[255].mxu0 }
 0x327   :  { %8867 = vst [vmem:[#allocation47_spill] sm:$0xff] %v7388_v39  ;;  %v2030_v40 = vpop.f32.mrb[153].mxu1 }
 0x328   :  { %v2032_v28 = vpop.f32.mrb[154].mxu1  ;;  %2966 = vmatmul.mubr.bf16.gmra.mrb[104].mxu0 %v7163_v10 }
 0x329   :  { %v7391_v15 = vpack.c.bf16 %v2032_v28, %v2028_v31  ;;  %v2034_v42 = vpop.f32.mrb[155].mxu1  ;;  %2975 = vmatprep.mubr.bf16.mxu0 %v7180_v3 }
 0x32a   :  { %v7394_v60 = vpack.c.bf16 %v2034_v42, %v2030_v40 }
 0x32b   :  { %v7396_v6 = vpop.f32.mrb[0].mxu0 }
 0x32c   :  { %8868 = vst [vmem:[#allocation48_spill] sm:$0xff] %v7396_v6  ;;  %v7398_v27 = vpop.f32.mrb[1].mxu0 }
 0x32d   :  { %8869 = vst [vmem:[#allocation49_spill] sm:$0xff] %v7398_v27  ;;  %v7400_v34 = vpop.f32.mrb[2].mxu0 }
 0x32e   :  { %8870 = vst [vmem:[#allocation50_spill] sm:$0xff] %v7400_v34  ;;  %v2038_v63 = vpop.f32.mrb[156].mxu1  ;;  %v7402_v7 = vpop.f32.mrb[3].mxu0 }
 0x32f   :  { %8871 = vst [vmem:[#allocation51_spill] sm:$0xff] %v7402_v7  ;;  %v2040_v39 = vpop.f32.mrb[157].mxu1 }
 0x330   :  { %v2042_v30 = vpop.f32.mrb[158].mxu1  ;;  %2976 = vmatmul.mubr.bf16.gmra.mrb[108].mxu0 %v7177_v38 }
 0x331   :  { %v7405_v10 = vpack.c.bf16 %v2042_v30, %v2038_v63  ;;  %v2044_v28 = vpop.f32.mrb[159].mxu1  ;;  %2985 = vmatprep.mubr.bf16.mxu0 %v7194_v51 }
 0x332   :  { %v7408_v3 = vpack.c.bf16 %v2044_v28, %v2040_v39 }
 0x333   :  { %v7410_v40 = vpop.f32.mrb[4].mxu0 }
 0x334   :  { %8872 = vst [vmem:[#allocation52_spill] sm:$0xff] %v7410_v40  ;;  %v7412_v31 = vpop.f32.mrb[5].mxu0 }
 0x335   :  { %v7414_v42 = vpop.f32.mrb[6].mxu0 }
 0x336   :  { %8873 = vst [vmem:[#allocation53_spill] sm:$0xff] %v7414_v42  ;;  %v2048_v34 = vpop.f32.mrb[160].mxu1  ;;  %v7416_v6 = vpop.f32.mrb[7].mxu0 }
 0x337   :  { %8874 = vst [vmem:[#allocation54_spill] sm:$0xff] %v7416_v6  ;;  %v2050_v7 = vpop.f32.mrb[161].mxu1 }
 0x338   :  { %v2052_v27 = vpop.f32.mrb[162].mxu1  ;;  %2986 = vmatmul.mubr.bf16.gmra.mrb[112].mxu0 %v7191_v33 }
 0x339   :  { %v7419_v38 = vpack.c.bf16 %v2052_v27, %v2048_v34  ;;  %v2054_v30 = vpop.f32.mrb[163].mxu1  ;;  %2995 = vmatprep.mubr.bf16.mxu0 %v7218_v9 }
 0x33a   :  { %v7422_v51 = vpack.c.bf16 %v2054_v30, %v2050_v7 }
 0x33b   :  { %v2251_v39 = vmax.bf16 %v7419_v38, %v7377_v44  ;;  %v7426_v63 = vpop.f32.mrb[8].mxu0 }
 0x33c   :  { %8875 = vst [vmem:[#allocation55_spill] sm:$0xff] %v7426_v63  ;;  %v2252_v28 = vmax.bf16 %v7422_v51, %v7380_v41  ;;  %v7430_v42 = vpop.f32.mrb[9].mxu0 }
 0x33d   :  { %8876 = vst [vmem:[#allocation56_spill] sm:$0xff] %v7430_v42  ;;  %v7432_v40 = vpop.f32.mrb[10].mxu0  ;;  %v2305_v9 = vmax.bf16 %v7319_v12, %v2251_v39 }
 0x33e   :  { %v2306_v33 = vmax.bf16 %v7324_v45, %v2252_v28  ;;  %v2058_v27 = vpop.f32.mrb[164].mxu1  ;;  %v7435_v34 = vpop.f32.mrb[11].mxu0 }
 0x33f   :  { %v2060_v7 = vpop.f32.mrb[165].mxu1 }
 0x340   :  { %v2062_v30 = vpop.f32.mrb[166].mxu1  ;;  %2996 = vmatmul.mubr.bf16.gmra.mrb[116].mxu0 %v7215_v43  ;;  %3372 = vmatprep.mubr.bf16.mxu1 %v2306_v33 }
 0x341   :  { %v7439_v63 = vpack.c.bf16 %v2062_v30, %v2058_v27  ;;  %v2064_v6 = vpop.f32.mrb[167].mxu1  ;;  %3005 = vmatprep.mubr.bf16.mxu0 %v7242_v0  ;;  %3373 = vmatmul.mubr.bf16.vlgmr.msra.gmra.mrb[172].mxu1 %v2305_v9 }
 0x342   :  { %v7442_v42 = vpack.c.bf16 %v2064_v6, %v2060_v7 }
 0x343   :  { %v2253_v45 = vmax.bf16 %v7439_v63, %v7391_v15  ;;  %v7446_v28 = vpop.f32.mrb[12].mxu0 }
 0x344   :  { %8877 = vst [vmem:[#allocation57_spill] sm:$0xff] %v7446_v28  ;;  %v2254_v12 = vmax.bf16 %v7442_v42, %v7394_v60  ;;  %v7450_v39 = vpop.f32.mrb[13].mxu0 }
 0x345   :  { %8878 = vst [vmem:[#allocation58_spill] sm:$0xff] %v7450_v39  ;;  %v7452_v43 = vpop.f32.mrb[14].mxu0  ;;  %v2307_v0 = vmax.bf16 %v7343_v24, %v2253_v45 }
 0x346   :  { %v2308_v33 = vmax.bf16 %v7348_v22, %v2254_v12  ;;  %v2068_v27 = vpop.f32.mrb[168].mxu1  ;;  %v7455_v30 = vpop.f32.mrb[15].mxu0 }
 0x347   :  { %v2070_v6 = vpop.f32.mrb[169].mxu1 }
 0x348   :  { %v2072_v9 = vpop.f32.mrb[170].mxu1  ;;  %3006 = vmatmul.mubr.bf16.gmra.mrb[120].mxu0 %v7239_v2  ;;  %3382 = vmatprep.mubr.bf16.mxu1 %v2308_v33 }
 0x349   :  { %v7459_v7 = vpack.c.bf16 %v2072_v9, %v2068_v27  ;;  %v2074_v28 = vpop.f32.mrb[171].mxu1  ;;  %3015 = vmatprep.mubr.bf16.mxu0 %v7266_v26  ;;  %3383 = vmatmul.mubr.bf16.gmra.mrb[176].mxu1 %v2307_v0 }
 0x34a   :  { %v7462_v39 = vpack.c.bf16 %v2074_v28, %v2070_v6 }
 0x34b   :  { %v2255_v22 = vmax.bf16 %v7459_v7, %v7405_v10  ;;  %v7466_v12 = vpop.f32.mrb[16].mxu0 }
 0x34c   :  { %v2256_v24 = vmax.bf16 %v7462_v39, %v7408_v3  ;;  %v7470_v45 = vpop.f32.mrb[17].mxu0 }
 0x34d   :  { %v7472_v2 = vpop.f32.mrb[18].mxu0  ;;  %v2309_v26 = vmax.bf16 %v7367_v57, %v2255_v22  ;;  %v5819_v22 = vld [vmem:[%s8808_s7] sm:$0xff]  }
 0x34e   :  { %v2310_v33 = vmax.bf16 %v7372_v13, %v2256_v24  ;;  %v7475_v27 = vpop.f32.mrb[19].mxu0  ;;  %4132 = vmatpush1.bf16.msra.mxu1 %v5819_v22 }
 0x350   :  { %3016 = vmatmul.mubr.bf16.gmra.mrb[124].mxu0 %v7263_v52  ;;  %3392 = vmatprep.mubr.bf16.mxu1 %v2310_v33  ;;  %v5820_v33 = vld [vmem:[%s8808_s7 + $0x8] sm:$0xff]  }
 0x351   :  { %3025 = vmatprep.mubr.bf16.mxu0 %v7280_v36  ;;  %3393 = vmatmul.mubr.bf16.gmra.mrb[180].mxu1 %v2309_v26 }
 0x353   :  { %v7480_v28 = vpop.f32.mrb[20].mxu0 }
 0x354   :  { %v7482_v0 = vpop.f32.mrb[21].mxu0 }
 0x355   :  { %v7484_v6 = vpop.f32.mrb[22].mxu0 }
 0x356   :  { %v7486_v9 = vpop.f32.mrb[23].mxu0 }
 0x358   :  { %3026 = vmatmul.mubr.bf16.gmra.mrb[128].mxu0 %v7277_v5 }
 0x359   :  { %3035 = vmatprep.mubr.bf16.mxu0 %v7294_v20  ;;  %v8880_v20 = vmov 0  }
 0x35a   :  { %4133 = vmatprep.subr.bf16.mxu1 %v8880_v20 }
 0x35b   :  { %v7490_v13 = vpop.f32.mrb[24].mxu0  ;;  %4134 = vmatpush1.bf16.msra.mxu1 %v5820_v33  ;;  %v5822_v33 = vld [vmem:[%s8808_s7 + $0x18] sm:$0xff]  }
 0x35c   :  { %v7492_v57 = vpop.f32.mrb[25].mxu0  ;;  %4135 = vmatprep.subr.bf16.mxu1 %v8880_v20 }
 0x35d   :  { %v7494_v52 = vpop.f32.mrb[26].mxu0 }
 0x35e   :  { %v7496_v36 = vpop.f32.mrb[27].mxu0 }
 0x360   :  { %3036 = vmatmul.mubr.bf16.gmra.mrb[132].mxu0 %v7291_v59 }
 0x361   :  { %3045 = vmatprep.mubr.bf16.mxu0 %v7308_v58  ;;  %v5821_v58 = vld [vmem:[%s8808_s7 + $0x10] sm:$0xff]  }
 0x362   :  { %4136 = vmatpush1.bf16.msra.mxu1 %v5821_v58 }
 0x363   :  { %v7503_v5 = vpop.f32.mrb[28].mxu0  ;;  %4137 = vmatprep.subr.bf16.mxu1 %v8880_v20 }
 0x364   :  { %8879 = vst [vmem:[#allocation59_spill] sm:$0xff] %v7503_v5  ;;  %v7506_v24 = vpop.f32.mrb[29].mxu0 }
 0x365   :  { %8881 = vst [vmem:[#allocation60_spill] sm:$0xff] %v7506_v24  ;;  %v7511_v26 = vpop.f32.mrb[30].mxu0  ;;  %v9010_v24 = vld [vmem:[#allocation29_spill] sm:$0xff] }
 0x366   :  { %8882 = vst [vmem:[#allocation61_spill] sm:$0xff] %v7511_v26  ;;  %v7513_v59 = vpop.f32.mrb[31].mxu0  ;;  %4138 = vmatpush1.bf16.msra.mxu1 %v5822_v33  ;;  %v5824_v33 = vld [vmem:[%s8808_s7 + $0x28] sm:$0xff]  }
 0x367   :  { %8883 = vst [vmem:[#allocation62_spill] sm:$0xff] %v7513_v59  ;;  %4139 = vmatprep.subr.bf16.mxu1 %v8880_v20 }
 0x368   :  { %3046 = vmatmul.mubr.bf16.gmra.mrb[136].mxu0 %v7305_v8 }
 0x369   :  { %3055 = vmatprep.mubr.bf16.mxu0 %v7332_v37  ;;  %v5823_v37 = vld [vmem:[%s8808_s7 + $0x20] sm:$0xff]  }
 0x36a   :  { %4140 = vmatpush1.bf16.msra.mxu1 %v5823_v37 }
 0x36b   :  { %v7521_v22 = vpop.f32.mrb[32].mxu0  ;;  %4141 = vmatprep.subr.bf16.mxu1 %v8880_v20 }
 0x36c   :  { %8884 = vst [vmem:[#allocation63_spill] sm:$0xff] %v7521_v22  ;;  %v7524_v5 = vpop.f32.mrb[33].mxu0 }
 0x36d   :  { %8885 = vst [vmem:[#allocation64_spill] sm:$0xff] %v7524_v5  ;;  %v7529_v26 = vpop.f32.mrb[34].mxu0 }
 0x36e   :  { %8886 = vst [vmem:[#allocation65_spill] sm:$0xff] %v7529_v26  ;;  %v7531_v8 = vpop.f32.mrb[35].mxu0  ;;  %4142 = vmatpush1.bf16.msra.mxu1 %v5824_v33  ;;  %v5826_v33 = vld [vmem:[%s8808_s7 + $0x38] sm:$0xff]  }
 0x36f   :  { %8887 = vst [vmem:[#allocation66_spill] sm:$0xff] %v7531_v8  ;;  %4143 = vmatprep.subr.bf16.mxu1 %v8880_v20 }
 0x370   :  { %3056 = vmatmul.mubr.bf16.gmra.mrb[140].mxu0 %v7329_v48 }
 0x371   :  { %3065 = vmatprep.mubr.bf16.mxu0 %v7356_v1  ;;  %v5825_v1 = vld [vmem:[%s8808_s7 + $0x30] sm:$0xff]  }
 0x372   :  { %4144 = vmatpush1.bf16.msra.mxu1 %v5825_v1 }
 0x373   :  { %v7539_v58 = vpop.f32.mrb[36].mxu0  ;;  %4145 = vmatprep.subr.bf16.mxu1 %v8880_v20 }
 0x374   :  { %8888 = vst [vmem:[#allocation67_spill] sm:$0xff] %v7539_v58  ;;  %v7542_v22 = vpop.f32.mrb[37].mxu0 }
 0x375   :  { %8889 = vst [vmem:[#allocation68_spill] sm:$0xff] %v7542_v22  ;;  %v7547_v26 = vpop.f32.mrb[38].mxu0  ;;  %v8978_v22 = vld [vmem:[#allocation2_spill] sm:$0xff] }
 0x376   :  { %8890 = vst [vmem:[#allocation69_spill] sm:$0xff] %v7547_v26  ;;  %v7549_v48 = vpop.f32.mrb[39].mxu0  ;;  %4146 = vmatpush1.bf16.msra.mxu1 %v5826_v33  ;;  %v5828_v33 = vld [vmem:[%s8808_s7 + $0x48] sm:$0xff]  }
 0x377   :  { %8891 = vst [vmem:[#allocation70_spill] sm:$0xff] %v7549_v48  ;;  %4147 = vmatprep.subr.bf16.mxu1 %v8880_v20 }
 0x378   :  { %3066 = vmatmul.mubr.bf16.gmra.mrb[144].mxu0 %v7353_v55 }
 0x379   :  { %3075 = vmatprep.mubr.bf16.mxu0 %v7380_v41  ;;  %v5827_v41 = vld [vmem:[%s8808_s7 + $0x40] sm:$0xff]  }
 0x37a   :  { %4148 = vmatpush1.bf16.msra.mxu1 %v5827_v41 }
 0x37b   :  { %v7557_v37 = vpop.f32.mrb[40].mxu0  ;;  %4149 = vmatprep.subr.bf16.mxu1 %v8880_v20 }
 0x37c   :  { %8892 = vst [vmem:[#allocation71_spill] sm:$0xff] %v7557_v37  ;;  %v7560_v58 = vpop.f32.mrb[41].mxu0 }
 0x37d   :  { %8893 = vst [vmem:[#allocation72_spill] sm:$0xff] %v7560_v58  ;;  %v7565_v26 = vpop.f32.mrb[42].mxu0 }
 0x37e   :  { %8894 = vst [vmem:[#allocation73_spill] sm:$0xff] %v7565_v26  ;;  %v7567_v55 = vpop.f32.mrb[43].mxu0  ;;  %4150 = vmatpush1.bf16.msra.mxu1 %v5828_v33  ;;  %v5830_v33 = vld [vmem:[%s8808_s7 + $0x58] sm:$0xff]  }
 0x37f   :  { %8895 = vst [vmem:[#allocation74_spill] sm:$0xff] %v7567_v55  ;;  %4151 = vmatprep.subr.bf16.mxu1 %v8880_v20 }
 0x380   :  { %3076 = vmatmul.mubr.bf16.gmra.mrb[148].mxu0 %v7377_v44 }
 0x381   :  { %3085 = vmatprep.mubr.bf16.mxu0 %v7394_v60  ;;  %v5829_v60 = vld [vmem:[%s8808_s7 + $0x50] sm:$0xff]  }
 0x382   :  { %4152 = vmatpush1.bf16.msra.mxu1 %v5829_v60 }
 0x383   :  { %v7575_v1 = vpop.f32.mrb[44].mxu0  ;;  %4153 = vmatprep.subr.bf16.mxu1 %v8880_v20 }
 0x384   :  { %8896 = vst [vmem:[#allocation75_spill] sm:$0xff] %v7575_v1  ;;  %v7578_v37 = vpop.f32.mrb[45].mxu0 }
 0x385   :  { %8897 = vst [vmem:[#allocation76_spill] sm:$0xff] %v7578_v37  ;;  %v7583_v26 = vpop.f32.mrb[46].mxu0 }
 0x386   :  { %8898 = vst [vmem:[#allocation77_spill] sm:$0xff] %v7583_v26  ;;  %v7585_v44 = vpop.f32.mrb[47].mxu0  ;;  %4154 = vmatpush1.bf16.msra.mxu1 %v5830_v33  ;;  %v5832_v33 = vld [vmem:[%s8808_s7 + $0x68] sm:$0xff]  }
 0x387   :  { %8899 = vst [vmem:[#allocation78_spill] sm:$0xff] %v7585_v44  ;;  %4155 = vmatprep.subr.bf16.mxu1 %v8880_v20 }
 0x388   :  { %3086 = vmatmul.mubr.bf16.gmra.mrb[152].mxu0 %v7391_v15 }
 0x389   :  { %3095 = vmatprep.mubr.bf16.mxu0 %v7408_v3  ;;  %v5831_v3 = vld [vmem:[%s8808_s7 + $0x60] sm:$0xff]  }
 0x38a   :  { %4156 = vmatpush1.bf16.msra.mxu1 %v5831_v3 }
 0x38b   :  { %v7593_v41 = vpop.f32.mrb[48].mxu0  ;;  %4157 = vmatprep.subr.bf16.mxu1 %v8880_v20 }
 0x38c   :  { %8900 = vst [vmem:[#allocation79_spill] sm:$0xff] %v7593_v41  ;;  %v7596_v1 = vpop.f32.mrb[49].mxu0 }
 0x38d   :  { %8901 = vst [vmem:[#allocation80_spill] sm:$0xff] %v7596_v1  ;;  %v7601_v26 = vpop.f32.mrb[50].mxu0 }
 0x38e   :  { %8902 = vst [vmem:[#allocation81_spill] sm:$0xff] %v7601_v26  ;;  %v7603_v15 = vpop.f32.mrb[51].mxu0  ;;  %4158 = vmatpush1.bf16.msra.mxu1 %v5832_v33  ;;  %v5834_v33 = vld [vmem:[%s8808_s7 + $0x78] sm:$0xff]  }
 0x38f   :  { %8903 = vst [vmem:[#allocation82_spill] sm:$0xff] %v7603_v15  ;;  %4159 = vmatprep.subr.bf16.mxu1 %v8880_v20 }
 0x390   :  { %3096 = vmatmul.mubr.bf16.gmra.mrb[156].mxu0 %v7405_v10 }
 0x391   :  { %3105 = vmatprep.mubr.bf16.mxu0 %v7422_v51  ;;  %v5833_v51 = vld [vmem:[%s8808_s7 + $0x70] sm:$0xff]  }
 0x392   :  { %4160 = vmatpush1.bf16.msra.mxu1 %v5833_v51 }
 0x393   :  { %v7611_v60 = vpop.f32.mrb[52].mxu0  ;;  %4161 = vmatprep.subr.bf16.mxu1 %v8880_v20 }
 0x394   :  { %8904 = vst [vmem:[#allocation83_spill] sm:$0xff] %v7611_v60  ;;  %v7614_v41 = vpop.f32.mrb[53].mxu0 }
 0x395   :  { %8905 = vst [vmem:[#allocation84_spill] sm:$0xff] %v7614_v41  ;;  %v7619_v26 = vpop.f32.mrb[54].mxu0 }
 0x396   :  { %8906 = vst [vmem:[#allocation85_spill] sm:$0xff] %v7619_v26  ;;  %v7621_v10 = vpop.f32.mrb[55].mxu0  ;;  %4162 = vmatpush1.bf16.msra.mxu1 %v5834_v33 }
 0x397   :  { %8907 = vst [vmem:[#allocation86_spill] sm:$0xff] %v7621_v10 }
 0x398   :  { %3106 = vmatmul.mubr.bf16.gmra.mrb[160].mxu0 %v7419_v38 }
 0x399   :  { %3115 = vmatprep.mubr.bf16.mxu0 %v7442_v42 }
 0x39b   :  { %v7629_v3 = vpop.f32.mrb[56].mxu0 }
 0x39c   :  { %8908 = vst [vmem:[#allocation87_spill] sm:$0xff] %v7629_v3  ;;  %v7632_v60 = vpop.f32.mrb[57].mxu0 }
 0x39d   :  { %8909 = vst [vmem:[#allocation88_spill] sm:$0xff] %v7632_v60  ;;  %v7637_v26 = vpop.f32.mrb[58].mxu0 }
 0x39e   :  { %8910 = vst [vmem:[#allocation89_spill] sm:$0xff] %v7637_v26  ;;  %v7639_v38 = vpop.f32.mrb[59].mxu0 }
 0x39f   :  { %8911 = vst [vmem:[#allocation90_spill] sm:$0xff] %v7639_v38 }
 0x3a0   :  { %3116 = vmatmul.mubr.bf16.gmra.mrb[164].mxu0 %v7439_v63 }
 0x3a1   :  { %3125 = vmatprep.mubr.bf16.mxu0 %v7462_v39 }
 0x3a3   :  { %v7643_v42 = vpop.f32.mrb[60].mxu0 }
 0x3a4   :  { %8912 = vst [vmem:[#allocation91_spill] sm:$0xff] %v7643_v42  ;;  %v7645_v51 = vpop.f32.mrb[61].mxu0 }
 0x3a5   :  { %8913 = vst [vmem:[#allocation92_spill] sm:$0xff] %v7645_v51  ;;  %v7647_v3 = vpop.f32.mrb[62].mxu0 }
 0x3a6   :  { %8914 = vst [vmem:[#allocation93_spill] sm:$0xff] %v7647_v3  ;;  %v7649_v60 = vpop.f32.mrb[63].mxu0 }
 0x3a7   :  { %8915 = vst [vmem:[#allocation94_spill] sm:$0xff] %v7649_v60 }
 0x3a8   :  { %3126 = vmatmul.mubr.bf16.gmra.mrb[168].mxu0 %v7459_v7 }
 0x3a9   :  { %4901 = vmatprep.mubr.bf16.mxu0 %v8880_v20 }
 0x3ab   :  { %v7653_v26 = vpop.f32.mrb[64].mxu0 }
 0x3ac   :  { %8916 = vst [vmem:[#allocation95_spill] sm:$0xff] %v7653_v26  ;;  %v7655_v38 = vpop.f32.mrb[65].mxu0 }
 0x3ad   :  { %8917 = vst [vmem:[#allocation96_spill] sm:$0xff] %v7655_v38  ;;  %v7657_v33 = vpop.f32.mrb[66].mxu0 }
 0x3ae   :  { %8918 = vst [vmem:[#allocation97_spill] sm:$0xff] %v7657_v33  ;;  %v7659_v63 = vpop.f32.mrb[67].mxu0 }
 0x3af   :  { %8919 = vst [vmem:[#allocation98_spill] sm:$0xff] %v7659_v63 }
 0x3b3   :  { %v7661_v39 = vpop.f32.mrb[68].mxu0 }
 0x3b4   :  { %8920 = vst [vmem:[#allocation99_spill] sm:$0xff] %v7661_v39  ;;  %v7663_v42 = vpop.f32.mrb[69].mxu0 }
 0x3b5   :  { %8921 = vst [vmem:[#allocation100_spill] sm:$0xff] %v7663_v42  ;;  %v7665_v51 = vpop.f32.mrb[70].mxu0 }
 0x3b6   :  { %8922 = vst [vmem:[#allocation101_spill] sm:$0xff] %v7665_v51  ;;  %v7667_v3 = vpop.f32.mrb[71].mxu0 }
 0x3b7   :  { %8923 = vst [vmem:[#allocation102_spill] sm:$0xff] %v7667_v3 }
 0x3bb   :  { %v7669_v60 = vpop.f32.mrb[72].mxu0 }
 0x3bc   :  { %8924 = vst [vmem:[#allocation103_spill] sm:$0xff] %v7669_v60  ;;  %v7671_v7 = vpop.f32.mrb[73].mxu0 }
 0x3bd   :  { %8925 = vst [vmem:[#allocation104_spill] sm:$0xff] %v7671_v7  ;;  %v7673_v20 = vpop.f32.mrb[74].mxu0 }
 0x3be   :  { %8926 = vst [vmem:[#allocation105_spill] sm:$0xff] %v7673_v20  ;;  %v7675_v26 = vpop.f32.mrb[75].mxu0 }
 0x3bf   :  { %8927 = vst [vmem:[#allocation106_spill] sm:$0xff] %v7675_v26 }
 0x3c3   :  { %v7677_v38 = vpop.f32.mrb[76].mxu0 }
 0x3c4   :  { %8928 = vst [vmem:[#allocation107_spill] sm:$0xff] %v7677_v38  ;;  %v7679_v33 = vpop.f32.mrb[77].mxu0 }
 0x3c5   :  { %8929 = vst [vmem:[#allocation108_spill] sm:$0xff] %v7679_v33  ;;  %v7681_v63 = vpop.f32.mrb[78].mxu0 }
 0x3c6   :  { %8930 = vst [vmem:[#allocation109_spill] sm:$0xff] %v7681_v63  ;;  %v7683_v39 = vpop.f32.mrb[79].mxu0 }
 0x3c7   :  { %8931 = vst [vmem:[#allocation110_spill] sm:$0xff] %v7683_v39 }
 0x3cb   :  { %v7685_v42 = vpop.f32.mrb[80].mxu0 }
 0x3cc   :  { %8932 = vst [vmem:[#allocation111_spill] sm:$0xff] %v7685_v42  ;;  %v7687_v51 = vpop.f32.mrb[81].mxu0 }
 0x3cd   :  { %8933 = vst [vmem:[#allocation112_spill] sm:$0xff] %v7687_v51  ;;  %v7689_v3 = vpop.f32.mrb[82].mxu0 }
 0x3ce   :  { %8934 = vst [vmem:[#allocation113_spill] sm:$0xff] %v7689_v3  ;;  %v7691_v60 = vpop.f32.mrb[83].mxu0 }
 0x3cf   :  { %8935 = vst [vmem:[#allocation114_spill] sm:$0xff] %v7691_v60 }
 0x3d3   :  { %v7693_v7 = vpop.f32.mrb[84].mxu0 }
 0x3d4   :  { %8936 = vst [vmem:[#allocation115_spill] sm:$0xff] %v7693_v7  ;;  %v7695_v20 = vpop.f32.mrb[85].mxu0 }
 0x3d5   :  { %8937 = vst [vmem:[#allocation116_spill] sm:$0xff] %v7695_v20  ;;  %v7697_v26 = vpop.f32.mrb[86].mxu0 }
 0x3d6   :  { %8938 = vst [vmem:[#allocation117_spill] sm:$0xff] %v7697_v26  ;;  %v7699_v38 = vpop.f32.mrb[87].mxu0 }
 0x3d7   :  { %8939 = vst [vmem:[#allocation118_spill] sm:$0xff] %v7699_v38 }
 0x3db   :  { %v7701_v33 = vpop.f32.mrb[88].mxu0 }
 0x3dc   :  { %8940 = vst [vmem:[#allocation119_spill] sm:$0xff] %v7701_v33  ;;  %v7703_v63 = vpop.f32.mrb[89].mxu0 }
 0x3dd   :  { %8941 = vst [vmem:[#allocation120_spill] sm:$0xff] %v7703_v63  ;;  %v7705_v39 = vpop.f32.mrb[90].mxu0 }
 0x3de   :  { %8942 = vst [vmem:[#allocation121_spill] sm:$0xff] %v7705_v39  ;;  %v7707_v42 = vpop.f32.mrb[91].mxu0 }
 0x3df   :  { %8943 = vst [vmem:[#allocation122_spill] sm:$0xff] %v7707_v42 }
 0x3e3   :  { %v7709_v51 = vpop.f32.mrb[92].mxu0 }
 0x3e4   :  { %8944 = vst [vmem:[#allocation123_spill] sm:$0xff] %v7709_v51  ;;  %v7711_v3 = vpop.f32.mrb[93].mxu0 }
 0x3e5   :  { %8945 = vst [vmem:[#allocation124_spill] sm:$0xff] %v7711_v3  ;;  %v7713_v60 = vpop.f32.mrb[94].mxu0 }
 0x3e6   :  { %8946 = vst [vmem:[#allocation125_spill] sm:$0xff] %v7713_v60  ;;  %v7715_v7 = vpop.f32.mrb[95].mxu0 }
 0x3e7   :  { %8947 = vst [vmem:[#allocation126_spill] sm:$0xff] %v7715_v7 }
 0x3eb   :  { %v7717_v20 = vpop.f32.mrb[96].mxu0 }
 0x3ec   :  { %8948 = vst [vmem:[#allocation127_spill] sm:$0xff] %v7717_v20  ;;  %v7719_v26 = vpop.f32.mrb[97].mxu0 }
 0x3ed   :  { %8949 = vst [vmem:[#allocation128_spill] sm:$0xff] %v7719_v26  ;;  %v7721_v38 = vpop.f32.mrb[98].mxu0 }
 0x3ee   :  { %8950 = vst [vmem:[#allocation129_spill] sm:$0xff] %v7721_v38  ;;  %v7723_v33 = vpop.f32.mrb[99].mxu0 }
 0x3ef   :  { %8951 = vst [vmem:[#allocation130_spill] sm:$0xff] %v7723_v33 }
 0x3f3   :  { %v7725_v63 = vpop.f32.mrb[100].mxu0 }
 0x3f4   :  { %8952 = vst [vmem:[#allocation131_spill] sm:$0xff] %v7725_v63  ;;  %v7727_v39 = vpop.f32.mrb[101].mxu0  ;;  %v3170_v63 = vlaneseq }
 0x3f5   :  { %8953 = vst [vmem:[#allocation132_spill] sm:$0xff] %v7727_v39  ;;  %v7729_v42 = vpop.f32.mrb[102].mxu0 }
 0x3f6   :  { %8954 = vst [vmem:[#allocation133_spill] sm:$0xff] %v7729_v42  ;;  %v7731_v51 = vpop.f32.mrb[103].mxu0  ;;  %v7749_v42 = vshrl.u32 %v3170_v63, 7 }
 0x3f7   :  { %8955 = vst [vmem:[#allocation134_spill] sm:$0xff] %v7731_v51 }
 0x3f8   :  { %8964 = vst [vmem:[#allocation143_spill] sm:$0xff] %v7749_v42 }
 0x3fb   :  { %v7733_v3 = vpop.f32.mrb[104].mxu0 }
 0x3fc   :  { %8956 = vst [vmem:[#allocation135_spill] sm:$0xff] %v7733_v3  ;;  %v7735_v60 = vpop.f32.mrb[105].mxu0 }
 0x3fd   :  { %8957 = vst [vmem:[#allocation136_spill] sm:$0xff] %v7735_v60  ;;  %v7737_v7 = vpop.f32.mrb[106].mxu0 }
 0x3fe   :  { %8958 = vst [vmem:[#allocation137_spill] sm:$0xff] %v7737_v7  ;;  %v7739_v20 = vpop.f32.mrb[107].mxu0  ;;  %v8818_v7 = vsub.s32 0, %v7749_v42 }
 0x3ff   :  { %8959 = vst [vmem:[#allocation138_spill] sm:$0xff] %v7739_v20 }
 0x403   :  { %v7741_v26 = vpop.f32.mrb[108].mxu0 }
 0x404   :  { %8960 = vst [vmem:[#allocation139_spill] sm:$0xff] %v7741_v26  ;;  %v7743_v38 = vpop.f32.mrb[109].mxu0  ;;  %v3168_v26 = vld [vmem:[%s8809_s6] sm:$0x3] }
 0x405   :  { %8961 = vst [vmem:[#allocation140_spill] sm:$0xff] %v7743_v38  ;;  %v7745_v33 = vpop.f32.mrb[110].mxu0  ;;  %v7766_v63 = vrot.slane %v3168_v26, %v8818_v7 }
 0x406   :  { %8962 = vst [vmem:[#allocation141_spill] sm:$0xff] %v7745_v33  ;;  %v7747_v39 = vpop.f32.mrb[111].mxu0  ;;  %v8819_v33 = vsub.s32 1, %v7749_v42 }
 0x407   :  { %8963 = vst [vmem:[#allocation142_spill] sm:$0xff] %v7747_v39 }
 0x40b   :  { %v7751_v51 = vpop.f32.mrb[112].mxu0 }
 0x40c   :  { %8965 = vst [vmem:[#allocation144_spill] sm:$0xff] %v7751_v51  ;;  %v7753_v3 = vpop.f32.mrb[113].mxu0  ;;  %v7770_v51 = vrot.slane %v3168_v26, %v8819_v33 }
 0x40d   :  { %8966 = vst [vmem:[#allocation145_spill] sm:$0xff] %v7753_v3  ;;  %v7755_v60 = vpop.f32.mrb[114].mxu0 }
 0x40e   :  { %8967 = vst [vmem:[#allocation146_spill] sm:$0xff] %v7755_v60  ;;  %v7758_v20 = vpop.f32.mrb[115].mxu0 }
 0x40f   :  { %8968 = vst [vmem:[#allocation147_spill] sm:$0xff] %v7758_v20 }
 0x413   :  { %v7772_v3 = vpop.f32.mrb[116].mxu0 }
 0x414   :  { %8969 = vst [vmem:[#allocation148_spill] sm:$0xff] %v7772_v3  ;;  %v7774_v60 = vpop.f32.mrb[117].mxu0  ;;  %v3374_v39 = vpop.f32.mrb[172].mxu1 }
 0x415   :  { %8970 = vst [vmem:[#allocation149_spill] sm:$0xff] %v7774_v60  ;;  %v7776_v20 = vpop.f32.mrb[118].mxu0  ;;  %v7779_v38 = vadd.f32 %v3374_v39, %v7766_v63  ;;  %v3376_v10 = vpop.f32.mrb[173].mxu1 }
 0x416   :  { %8971 = vst [vmem:[#allocation150_spill] sm:$0xff] %v7776_v20  ;;  %v7781_v41 = vpop.f32.mrb[119].mxu0  ;;  %v7784_v7 = vadd.f32 %v3376_v10, %v7770_v51  ;;  %v3378_v15 = vpop.f32.mrb[174].mxu1 }
 0x417   :  { %8972 = vst [vmem:[#allocation151_spill] sm:$0xff] %v7781_v41  ;;  %v7787_v26 = vadd.f32 %v3378_v15, %v7766_v63  ;;  %v3380_v33 = vpop.f32.mrb[175].mxu1  ;;  %v3403_v42 = vadd.f32 %v7779_v38, %v7049_v19  ;;  %v3415_v20 = vadd.f32 %v7779_v38, %v7133_v53  ;;  %v3427_v39 = vadd.f32 %v7779_v38, %v7182_v56 }
 0x418   :  { %v7796_v3 = vadd.f32 %v3380_v33, %v7770_v51  ;;  %v3404_v10 = vadd.f32 %v7784_v7, %v7051_v32  ;;  %v3416_v15 = vadd.f32 %v7784_v7, %v7137_v17  ;;  %v3428_v41 = vadd.f32 %v7784_v7, %v7184_v50 }
 0x419   :  { %v3405_v19 = vadd.f32 %v7787_v26, %v7053_v23  ;;  %v3643_v60 = vmax.f32 %v3403_v42, 0.0  ;;  %v3417_v53 = vadd.f32 %v7787_v26, %v7141_v46  ;;  %v3655_v56 = vmax.f32 %v3415_v20, 0.0 }
 0x41a   :  { %v3406_v33 = vadd.f32 %v7796_v3, %v7055_v62  ;;  %v3644_v1 = vmax.f32 %v3404_v10, 0.0  ;;  %v3418_v32 = vadd.f32 %v7796_v3, %v7146_v47  ;;  %v3656_v44 = vmax.f32 %v3416_v15, 0.0 }
 0x41b   :  { %v7812_v17 = vpop.f32.mrb[120].mxu0  ;;  %v3645_v37 = vmax.f32 %v3405_v19, 0.0  ;;  %v3657_v50 = vmax.f32 %v3417_v53, 0.0  ;;  %v3430_v23 = vadd.f32 %v7796_v3, %v7188_v49  ;;  %v3668_v42 = vmax.f32 %v3428_v41, 0.0 }
 0x41c   :  { %8973 = vst [vmem:[#allocation152_spill] sm:$0xff] %v7812_v17  ;;  %v7816_v55 = vpop.f32.mrb[121].mxu0  ;;  %v3384_v46 = vpop.f32.mrb[176].mxu1  ;;  %v3646_v20 = vmax.f32 %v3406_v33, 0.0  ;;  %v3658_v58 = vmax.f32 %v3418_v32, 0.0  ;;  %v3429_v62 = vadd.f32 %v7787_v26, %v7186_v18  ;;  %v3667_v10 = vmax.f32 %v3427_v39, 0.0 }
 0x41d   :  { %8974 = vst [vmem:[#allocation153_spill] sm:$0xff] %v7816_v55  ;;  %v7820_v48 = vpop.f32.mrb[122].mxu0  ;;  %v7823_v47 = vadd.f32 %v3384_v46, %v7766_v63  ;;  %v3386_v15 = vpop.f32.mrb[177].mxu1  ;;  %v3883_v19 = vpack.c.bf16 %v3645_v37, %v3643_v60  ;;  %v7825_v53 = vpack.c.bf16 %v3657_v50, %v3655_v56  ;;  %v3670_v49 = vmax.f32 %v3430_v23, 0.0 }
 0x41e   :  { %8975 = vst [vmem:[#allocation154_spill] sm:$0xff] %v7820_v48  ;;  %v7827_v41 = vpop.f32.mrb[123].mxu0  ;;  %v7830_v17 = vadd.f32 %v3386_v15, %v7770_v51  ;;  %v3388_v33 = vpop.f32.mrb[178].mxu1  ;;  %v3884_v32 = vpack.c.bf16 %v3646_v20, %v3644_v1  ;;  %v7832_v55 = vpack.c.bf16 %v3658_v58, %v3656_v44  ;;  %v3669_v18 = vmax.f32 %v3429_v62, 0.0 }
 0x41f   :  { %8976 = vst [vmem:[#allocation155_spill] sm:$0xff] %v7827_v41  ;;  %v7835_v39 = vadd.f32 %v3388_v33, %v7766_v63  ;;  %v3390_v46 = vpop.f32.mrb[179].mxu1  ;;  %v3407_v37 = vadd.f32 %v7823_v47, %v7069_v14  ;;  %v3419_v60 = vadd.f32 %v7823_v47, %v7154_v4  ;;  %v7841_v56 = vpack.c.bf16 %v3670_v49, %v3668_v42 }
 0x420   :  { %v7844_v50 = vadd.f32 %v3390_v46, %v7770_v51  ;;  %4163 = vmatprep.mubr.bf16.mxu1 %v3884_v32  ;;  %v3408_v58 = vadd.f32 %v7830_v17, %v7073_v61  ;;  %v3420_v1 = vadd.f32 %v7830_v17, %v7156_v25  ;;  %v7850_v44 = vpack.c.bf16 %v3669_v18, %v3667_v10  ;;  %v8977_v46 = vld [vmem:[#allocation10_spill] sm:$0xff] }
 0x421   :  { %4164 = vmatmul.mubr.bf16.vlgmr.msra.gmra.mrb[184].mxu1 %v3883_v19  ;;  %v3409_v14 = vadd.f32 %v7835_v39, %v7077_v35  ;;  %v3647_v23 = vmax.f32 %v3407_v37, 0.0  ;;  %v3421_v4 = vadd.f32 %v7835_v39, %v7158_v29  ;;  %v3659_v42 = vmax.f32 %v3419_v60, 0.0 }
 0x422   :  { %v3410_v20 = vadd.f32 %v7844_v50, %v7088_v21  ;;  %v3648_v62 = vmax.f32 %v3408_v58, 0.0  ;;  %v3422_v61 = vadd.f32 %v7844_v50, %v7160_v11  ;;  %v3660_v15 = vmax.f32 %v3420_v1, 0.0 }
 0x423   :  { %v3017_v25 = vpop.f32.mrb[124].mxu0  ;;  %v3649_v10 = vmax.f32 %v3409_v14, 0.0  ;;  %v3661_v49 = vmax.f32 %v3421_v4, 0.0  ;;  %v7862_v19 = vadd.f32 %v7830_v17, %v7202_v54  ;;  %v7866_v35 = vadd.f32 %v7844_v50, %v7212_v16 }
 0x424   :  { %v3595_v29 = vadd.f32 %v7779_v38, %v3017_v25  ;;  %v3019_v33 = vpop.f32.mrb[125].mxu0  ;;  %v3394_v21 = vpop.f32.mrb[180].mxu1  ;;  %v3650_v32 = vmax.f32 %v3410_v20, 0.0  ;;  %v3662_v18 = vmax.f32 %v3422_v61, 0.0  ;;  %v7871_v11 = vadd.f32 %v7823_v47, %v8977_v46 }
 0x425   :  { %v3596_v37 = vadd.f32 %v7784_v7, %v3019_v33  ;;  %v3021_v60 = vpop.f32.mrb[126].mxu0  ;;  %v7875_v54 = vadd.f32 %v3394_v21, %v7766_v63  ;;  %v3396_v58 = vpop.f32.mrb[181].mxu1  ;;  %v3885_v1 = vpack.c.bf16 %v3649_v10, %v3647_v23  ;;  %v7877_v16 = vpack.c.bf16 %v3661_v49, %v3659_v42  ;;  %v8979_v49 = vld [vmem:[#allocation3_spill] sm:$0xff] }
 0x426   :  { %v3835_v14 = vmax.f32 %v3595_v29, 0.0  ;;  %v3597_v4 = vadd.f32 %v7787_v26, %v3021_v60  ;;  %v3023_v25 = vpop.f32.mrb[127].mxu0  ;;  %v7881_v20 = vadd.f32 %v3396_v58, %v7770_v51  ;;  %v3398_v61 = vpop.f32.mrb[182].mxu1  ;;  %v3886_v46 = vpack.c.bf16 %v3650_v32, %v3648_v62  ;;  %v8980_v32 = vld [vmem:[#allocation4_spill] sm:$0xff]  ;;  %v8981_v58 = vld [vmem:[#allocation7_spill] sm:$0xff] }
 0x427   :  { %v3836_v48 = vmax.f32 %v3596_v37, 0.0  ;;  %v3598_v33 = vadd.f32 %v7796_v3, %v3023_v25  ;;  %v7885_v41 = vadd.f32 %v3398_v61, %v7766_v63  ;;  %v3400_v21 = vpop.f32.mrb[183].mxu1  ;;  %v3411_v23 = vadd.f32 %v7875_v54, %v8978_v22 }
 0x428   :  { %v3837_v42 = vmax.f32 %v3597_v4, 0.0  ;;  %v7890_v10 = vadd.f32 %v3400_v21, %v7770_v51  ;;  %4171 = vmatprep.mubr.bf16.mxu1 %v3886_v46  ;;  %v3412_v29 = vadd.f32 %v7881_v20, %v8979_v49  ;;  %v7894_v60 = vpack.c.bf16 %v3662_v18, %v3660_v15  ;;  %v8983_v4 = vld [vmem:[#allocation5_spill] sm:$0xff]  ;;  %v8986_v49 = vld [vmem:[#allocation6_spill] sm:$0xff] }
 0x429   :  { %v3838_v62 = vmax.f32 %v3598_v33, 0.0  ;;  %4172 = vmatmul.mubr.bf16.gmra.mrb[188].mxu1 %v3885_v1  ;;  %v3413_v63 = vadd.f32 %v7885_v41, %v8980_v32  ;;  %v3651_v37 = vmax.f32 %v3411_v23, 0.0  ;;  %v3424_v25 = vadd.f32 %v7881_v20, %v8981_v58  ;;  %v8984_v46 = vld [vmem:[#allocation9_spill] sm:$0xff] }
 0x42a   :  { %v7900_v22 = vpack.c.bf16 %v3837_v42, %v3835_v14  ;;  %v3414_v51 = vadd.f32 %v7890_v10, %v8983_v4  ;;  %v3652_v61 = vmax.f32 %v3412_v29, 0.0  ;;  %v3426_v21 = vadd.f32 %v7890_v10, %v8984_v46 }
 0x42b   :  { %v7906_v15 = vpack.c.bf16 %v3838_v62, %v3836_v48  ;;  %v3027_v18 = vpop.f32.mrb[128].mxu0  ;;  %v3653_v1 = vmax.f32 %v3413_v63, 0.0  ;;  %v3664_v33 = vmax.f32 %v3424_v25, 0.0  ;;  %v3423_v23 = vadd.f32 %v7875_v54, %v8986_v49 }
 0x42c   :  { %8982 = vst [vmem:[#allocation10_spill] sm:$0xff] %v7900_v22  ;;  %v3599_v32 = vadd.f32 %v7823_v47, %v3027_v18  ;;  %v3029_v58 = vpop.f32.mrb[129].mxu0  ;;  %v3654_v14 = vmax.f32 %v3414_v51, 0.0  ;;  %v3666_v42 = vmax.f32 %v3426_v21, 0.0  ;;  %v8987_v22 = vld [vmem:[#allocation8_spill] sm:$0xff]  ;;  %v3672_v62 = vmax.f32 %v7862_v19, 0.0 }
 0x42d   :  { %8985 = vst [vmem:[#allocation2_spill] sm:$0xff] %v7906_v15  ;;  %v3425_v4 = vadd.f32 %v7885_v41, %v8987_v22  ;;  %v3600_v29 = vadd.f32 %v7830_v17, %v3029_v58  ;;  %v3031_v8 = vpop.f32.mrb[130].mxu0  ;;  %v3887_v46 = vpack.c.bf16 %v3653_v1, %v3651_v37  ;;  %v3663_v48 = vmax.f32 %v3423_v23, 0.0  ;;  %v8988_v58 = vld [vmem:[#allocation11_spill] sm:$0xff]  ;;  %v8989_v1 = vld [vmem:[#allocation13_spill] sm:$0xff] }
 0x42e   :  { %v3839_v63 = vmax.f32 %v3599_v32, 0.0  ;;  %v3601_v25 = vadd.f32 %v7835_v39, %v3031_v8  ;;  %v3033_v15 = vpop.f32.mrb[131].mxu0  ;;  %v3888_v49 = vpack.c.bf16 %v3654_v14, %v3652_v61  ;;  %v7916_v5 = vpack.c.bf16 %v3666_v42, %v3664_v33 }
 0x42f   :  { %v3840_v18 = vmax.f32 %v3600_v29, 0.0  ;;  %v3602_v51 = vadd.f32 %v7844_v50, %v3033_v15  ;;  %v3665_v21 = vmax.f32 %v3425_v4, 0.0  ;;  %v3674_v22 = vmax.f32 %v7866_v35, 0.0  ;;  %v8990_v15 = vld [vmem:[#allocation15_spill] sm:$0xff]  ;;  %v8992_v4 = vld [vmem:[#allocation12_spill] sm:$0xff] }
 0x430   :  { %v3841_v59 = vmax.f32 %v3601_v25, 0.0  ;;  %4179 = vmatprep.mubr.bf16.mxu1 %v3888_v49  ;;  %v3433_v37 = vadd.f32 %v7835_v39, %v8988_v58  ;;  %v3671_v19 = vmax.f32 %v7871_v11, 0.0  ;;  %v3436_v8 = vadd.f32 %v7881_v20, %v8989_v1  ;;  %v8995_v49 = vld [vmem:[#allocation17_spill] sm:$0xff] }
 0x431   :  { %v3842_v23 = vmax.f32 %v3602_v51, 0.0  ;;  %4180 = vmatmul.mubr.bf16.gmra.mrb[192].mxu1 %v3887_v46  ;;  %v7925_v61 = vpack.c.bf16 %v3665_v21, %v3663_v48  ;;  %v7927_v33 = vpack.c.bf16 %v3674_v22, %v3672_v62  ;;  %v3438_v32 = vadd.f32 %v7890_v10, %v8990_v15  ;;  %v8994_v48 = vld [vmem:[#allocation14_spill] sm:$0xff]  ;;  %v8996_v22 = vld [vmem:[#allocation19_spill] sm:$0xff] }
 0x432   :  { %v7931_v35 = vpack.c.bf16 %v3841_v59, %v3839_v63  ;;  %4187 = vmatprep.mubr.bf16.mxu1 %v7832_v55  ;;  %v3673_v14 = vmax.f32 %v3433_v37, 0.0  ;;  %v3676_v42 = vmax.f32 %v3436_v8, 0.0  ;;  %v3435_v11 = vadd.f32 %v7875_v54, %v8992_v4 }
 0x433   :  { %v7936_v29 = vpack.c.bf16 %v3842_v23, %v3840_v18  ;;  %v3037_v25 = vpop.f32.mrb[132].mxu0  ;;  %v3678_v46 = vmax.f32 %v3438_v32, 0.0  ;;  %v3437_v62 = vadd.f32 %v7885_v41, %v8994_v48  ;;  %v3440_v51 = vadd.f32 %v7784_v7, %v8995_v49 }
 0x434   :  { %8991 = vst [vmem:[#allocation3_spill] sm:$0xff] %v7931_v35  ;;  %v3603_v59 = vadd.f32 %v7875_v54, %v3037_v25  ;;  %v3039_v63 = vpop.f32.mrb[133].mxu0  ;;  %v7943_v21 = vpack.c.bf16 %v3673_v14, %v3671_v19  ;;  %v3675_v55 = vmax.f32 %v3435_v11, 0.0  ;;  %v3442_v58 = vadd.f32 %v7796_v3, %v8996_v22  ;;  %v8997_v25 = vld [vmem:[#allocation16_spill] sm:$0xff]  ;;  %v8998_v22 = vld [vmem:[#allocation18_spill] sm:$0xff] }
 0x435   :  { %8993 = vst [vmem:[#allocation4_spill] sm:$0xff] %v7936_v29  ;;  %v3604_v18 = vadd.f32 %v7881_v20, %v3039_v63  ;;  %v3041_v37 = vpop.f32.mrb[134].mxu0  ;;  %v7948_v1 = vpack.c.bf16 %v3678_v46, %v3676_v42  ;;  %v3677_v8 = vmax.f32 %v3437_v62, 0.0  ;;  %v3680_v23 = vmax.f32 %v3440_v51, 0.0  ;;  %v8999_v51 = vld [vmem:[#allocation21_spill] sm:$0xff] }
 0x436   :  { %v3843_v15 = vmax.f32 %v3603_v59, 0.0  ;;  %v3605_v32 = vadd.f32 %v7885_v41, %v3041_v37  ;;  %v3043_v4 = vpop.f32.mrb[135].mxu0  ;;  %v3682_v48 = vmax.f32 %v3442_v58, 0.0  ;;  %v3439_v19 = vadd.f32 %v7779_v38, %v8997_v25  ;;  %v9000_v25 = vld [vmem:[#allocation23_spill] sm:$0xff] }
 0x437   :  { %v3844_v14 = vmax.f32 %v3604_v18, 0.0  ;;  %v3606_v11 = vadd.f32 %v7890_v10, %v3043_v4  ;;  %v7954_v49 = vpack.c.bf16 %v3677_v8, %v3675_v55  ;;  %v3441_v63 = vadd.f32 %v7787_v26, %v8998_v22  ;;  %v9001_v4 = vld [vmem:[#allocation20_spill] sm:$0xff] }
 0x438   :  { %v3845_v42 = vmax.f32 %v3605_v32, 0.0  ;;  %v7958_v46 = vpack.c.bf16 %v3682_v48, %v3680_v23  ;;  %v3679_v62 = vmax.f32 %v3439_v19, 0.0  ;;  %v3444_v59 = vadd.f32 %v7830_v17, %v8999_v51  ;;  %v9003_v32 = vld [vmem:[#allocation22_spill] sm:$0xff]  ;;  %v9004_v19 = vld [vmem:[#allocation25_spill] sm:$0xff] }
 0x439   :  { %v3846_v37 = vmax.f32 %v3606_v11, 0.0  ;;  %4188 = vmatmul.mubr.bf16.gmra.mrb[196].mxu1 %v7825_v53  ;;  %v3681_v58 = vmax.f32 %v3441_v63, 0.0  ;;  %v3446_v18 = vadd.f32 %v7844_v50, %v9000_v25  ;;  %v3443_v55 = vadd.f32 %v7823_v47, %v9001_v4 }
 0x43a   :  { %v7967_v8 = vpack.c.bf16 %v3845_v42, %v3843_v15  ;;  %4195 = vmatprep.mubr.bf16.mxu1 %v7894_v60  ;;  %v3684_v23 = vmax.f32 %v3444_v59, 0.0  ;;  %v3445_v48 = vadd.f32 %v7835_v39, %v9003_v32  ;;  %v3448_v11 = vadd.f32 %v7881_v20, %v9004_v19 }
 0x43b   :  { %v7974_v22 = vpack.c.bf16 %v3846_v37, %v3844_v14  ;;  %v3047_v53 = vpop.f32.mrb[136].mxu0  ;;  %v7976_v63 = vpack.c.bf16 %v3681_v58, %v3679_v62  ;;  %v3686_v51 = vmax.f32 %v3446_v18, 0.0  ;;  %v3683_v25 = vmax.f32 %v3443_v55, 0.0  ;;  %v9008_v14 = vld [vmem:[#allocation24_spill] sm:$0xff]  ;;  %v9009_v62 = vld [vmem:[#allocation26_spill] sm:$0xff] }
 0x43c   :  { %9002 = vst [vmem:[#allocation7_spill] sm:$0xff] %v7967_v8  ;;  %v3607_v4 = vadd.f32 %v7779_v38, %v3047_v53  ;;  %v3049_v15 = vpop.f32.mrb[137].mxu0  ;;  %v3685_v42 = vmax.f32 %v3445_v48, 0.0  ;;  %v9006_v8 = vld [vmem:[#allocation27_spill] sm:$0xff]  ;;  %v3688_v59 = vmax.f32 %v3448_v11, 0.0  ;;  %v3447_v37 = vadd.f32 %v7875_v54, %v9008_v14 }
 0x43d   :  { %9005 = vst [vmem:[#allocation5_spill] sm:$0xff] %v7974_v22  ;;  %v3450_v60 = vadd.f32 %v7890_v10, %v9006_v8  ;;  %v3608_v32 = vadd.f32 %v7784_v7, %v3049_v15  ;;  %v3051_v35 = vpop.f32.mrb[138].mxu0  ;;  %v7982_v29 = vpack.c.bf16 %v3686_v51, %v3684_v23  ;;  %v3449_v58 = vadd.f32 %v7885_v41, %v9009_v62 }
 0x43e   :  { %v3847_v18 = vmax.f32 %v3607_v4, 0.0  ;;  %v3609_v55 = vadd.f32 %v7787_v26, %v3051_v35  ;;  %v3053_v19 = vpop.f32.mrb[139].mxu0  ;;  %v7989_v48 = vpack.c.bf16 %v3685_v42, %v3683_v25  ;;  %v3687_v15 = vmax.f32 %v3447_v37, 0.0  ;;  %v9012_v25 = vld [vmem:[#allocation28_spill] sm:$0xff] }
 0x43f   :  { %9007 = vst [vmem:[#allocation9_spill] sm:$0xff] %v7982_v29  ;;  %v3690_v53 = vmax.f32 %v3450_v60, 0.0  ;;  %v3848_v8 = vmax.f32 %v3608_v32, 0.0  ;;  %v3610_v11 = vadd.f32 %v7796_v3, %v3053_v19  ;;  %v3689_v22 = vmax.f32 %v3449_v58, 0.0  ;;  %v9011_v29 = vld [vmem:[#allocation31_spill] sm:$0xff]  ;;  %v9013_v60 = vld [vmem:[#allocation30_spill] sm:$0xff] }
 0x440   :  { %v3849_v23 = vmax.f32 %v3609_v55, 0.0  ;;  %v3452_v14 = vadd.f32 %v7784_v7, %v9010_v24  ;;  %v3454_v4 = vadd.f32 %v7796_v3, %v9011_v29  ;;  %v3451_v42 = vadd.f32 %v7779_v38, %v9012_v25  ;;  %v9015_v58 = vld [vmem:[#allocation33_spill] sm:$0xff] }
 0x441   :  { %v7992_v51 = vpack.c.bf16 %v3690_v53, %v3688_v59  ;;  %v3850_v62 = vmax.f32 %v3610_v11, 0.0  ;;  %4196 = vmatmul.mubr.bf16.gmra.mrb[200].mxu1 %v7877_v16  ;;  %v7999_v35 = vpack.c.bf16 %v3689_v22, %v3687_v15  ;;  %v3453_v32 = vadd.f32 %v7787_v26, %v9013_v60  ;;  %v9017_v53 = vld [vmem:[#allocation35_spill] sm:$0xff] }
 0x442   :  { %v8005_v37 = vpack.c.bf16 %v3849_v23, %v3847_v18  ;;  %4203 = vmatprep.mubr.bf16.mxu1 %v7916_v5  ;;  %v3692_v59 = vmax.f32 %v3452_v14, 0.0  ;;  %v3694_v24 = vmax.f32 %v3454_v4, 0.0  ;;  %v3456_v29 = vadd.f32 %v7830_v17, %v9015_v58  ;;  %v9018_v5 = vld [vmem:[#allocation32_spill] sm:$0xff] }
 0x443   :  { %v8010_v55 = vpack.c.bf16 %v3850_v62, %v3848_v8  ;;  %v3057_v16 = vpop.f32.mrb[140].mxu0  ;;  %v3691_v22 = vmax.f32 %v3451_v42, 0.0  ;;  %v3693_v19 = vmax.f32 %v3453_v32, 0.0  ;;  %v3458_v11 = vadd.f32 %v7844_v50, %v9017_v53  ;;  %v9020_v42 = vld [vmem:[#allocation34_spill] sm:$0xff] }
 0x444   :  { %9014 = vst [vmem:[#allocation6_spill] sm:$0xff] %v8005_v37  ;;  %v3611_v15 = vadd.f32 %v7823_v47, %v3057_v16  ;;  %v3059_v25 = vpop.f32.mrb[141].mxu0  ;;  %v8015_v18 = vpack.c.bf16 %v3694_v24, %v3692_v59  ;;  %v3696_v23 = vmax.f32 %v3456_v29, 0.0  ;;  %v3455_v14 = vadd.f32 %v7823_v47, %v9018_v5  ;;  %v9021_v59 = vld [vmem:[#allocation37_spill] sm:$0xff] }
 0x445   :  { %9016 = vst [vmem:[#allocation8_spill] sm:$0xff] %v8010_v55  ;;  %v3612_v4 = vadd.f32 %v7830_v17, %v3059_v25  ;;  %v3061_v60 = vpop.f32.mrb[142].mxu0  ;;  %v8020_v8 = vpack.c.bf16 %v3693_v19, %v3691_v22  ;;  %v3698_v62 = vmax.f32 %v3458_v11, 0.0  ;;  %v3457_v32 = vadd.f32 %v7835_v39, %v9020_v42  ;;  %v9022_v19 = vld [vmem:[#allocation39_spill] sm:$0xff]  ;;  %v9023_v42 = vld [vmem:[#allocation36_spill] sm:$0xff] }
 0x446   :  { %v3851_v58 = vmax.f32 %v3611_v15, 0.0  ;;  %v3613_v53 = vadd.f32 %v7835_v39, %v3061_v60  ;;  %v3063_v16 = vpop.f32.mrb[143].mxu0  ;;  %v3695_v37 = vmax.f32 %v3455_v14, 0.0  ;;  %v3460_v24 = vadd.f32 %v7881_v20, %v9021_v59  ;;  %v9025_v59 = vld [vmem:[#allocation38_spill] sm:$0xff] }
 0x447   :  { %9019 = vst [vmem:[#allocation11_spill] sm:$0xff] %v8020_v8  ;;  %v3852_v29 = vmax.f32 %v3612_v4, 0.0  ;;  %v3614_v5 = vadd.f32 %v7844_v50, %v3063_v16  ;;  %v8028_v55 = vpack.c.bf16 %v3698_v62, %v3696_v23  ;;  %v3697_v25 = vmax.f32 %v3457_v32, 0.0  ;;  %v9026_v16 = vld [vmem:[#allocation41_spill] sm:$0xff] }
 0x448   :  { %v3853_v22 = vmax.f32 %v3613_v53, 0.0  ;;  %v3462_v11 = vadd.f32 %v7890_v10, %v9022_v19  ;;  %v3700_v8 = vmax.f32 %v3460_v24, 0.0  ;;  %v3459_v15 = vadd.f32 %v7875_v54, %v9023_v42  ;;  %v9028_v24 = vld [vmem:[#allocation43_spill] sm:$0xff]  ;;  %v9030_v42 = vld [vmem:[#allocation40_spill] sm:$0xff] }
 0x449   :  { %v3854_v60 = vmax.f32 %v3614_v5, 0.0  ;;  %4204 = vmatmul.mubr.bf16.gmra.mrb[204].mxu1 %v7925_v61  ;;  %v8035_v14 = vpack.c.bf16 %v3697_v25, %v3695_v37  ;;  %v3461_v4 = vadd.f32 %v7885_v41, %v9025_v59  ;;  %v3464_v23 = vadd.f32 %v7784_v7, %v9026_v16 }
 0x44a   :  { %v8041_v62 = vpack.c.bf16 %v3853_v22, %v3851_v58  ;;  %4211 = vmatprep.mubr.bf16.mxu1 %v7841_v56  ;;  %v3702_v32 = vmax.f32 %v3462_v11, 0.0  ;;  %v3699_v53 = vmax.f32 %v3459_v15, 0.0  ;;  %v3466_v19 = vadd.f32 %v7796_v3, %v9028_v24  ;;  %v9032_v56 = vld [vmem:[#allocation42_spill] sm:$0xff] }
 0x44b   :  { %9024 = vst [vmem:[#allocation13_spill] sm:$0xff] %v8035_v14  ;;  %v8046_v5 = vpack.c.bf16 %v3854_v60, %v3852_v29  ;;  %v3067_v61 = vpop.f32.mrb[144].mxu0  ;;  %v3701_v37 = vmax.f32 %v3461_v4, 0.0  ;;  %v3704_v25 = vmax.f32 %v3464_v23, 0.0  ;;  %v3463_v59 = vadd.f32 %v7779_v38, %v9030_v42  ;;  %v9034_v4 = vld [vmem:[#allocation45_spill] sm:$0xff] }
 0x44c   :  { %9027 = vst [vmem:[#allocation15_spill] sm:$0xff] %v8041_v62  ;;  %v3615_v14 = vadd.f32 %v7875_v54, %v3067_v61  ;;  %v3069_v16 = vpop.f32.mrb[145].mxu0  ;;  %v8051_v58 = vpack.c.bf16 %v3702_v32, %v3700_v8  ;;  %v3706_v22 = vmax.f32 %v3466_v19, 0.0  ;;  %v3465_v11 = vadd.f32 %v7787_v26, %v9032_v56  ;;  %v9035_v56 = vld [vmem:[#allocation47_spill] sm:$0xff] }
 0x44d   :  { %9029 = vst [vmem:[#allocation12_spill] sm:$0xff] %v8046_v5  ;;  %v3616_v15 = vadd.f32 %v7881_v20, %v3069_v16  ;;  %v3071_v24 = vpop.f32.mrb[146].mxu0  ;;  %v8056_v29 = vpack.c.bf16 %v3701_v37, %v3699_v53  ;;  %v3703_v60 = vmax.f32 %v3463_v59, 0.0  ;;  %v3468_v23 = vadd.f32 %v7830_v17, %v9034_v4  ;;  %v9037_v59 = vld [vmem:[#allocation44_spill] sm:$0xff] }
 0x44e   :  { %9031 = vst [vmem:[#allocation14_spill] sm:$0xff] %v8051_v58  ;;  %v3855_v62 = vmax.f32 %v3615_v14, 0.0  ;;  %v3617_v42 = vadd.f32 %v7885_v41, %v3071_v24  ;;  %v3073_v61 = vpop.f32.mrb[147].mxu0  ;;  %v8061_v5 = vpack.c.bf16 %v3706_v22, %v3704_v25  ;;  %v3705_v8 = vmax.f32 %v3465_v11, 0.0  ;;  %v9038_v14 = vld [vmem:[#allocation46_spill] sm:$0xff]  ;;  %v9039_v22 = vld [vmem:[#allocation49_spill] sm:$0xff] }
 0x44f   :  { %9033 = vst [vmem:[#allocation17_spill] sm:$0xff] %v8056_v29  ;;  %v3856_v32 = vmax.f32 %v3616_v15, 0.0  ;;  %v3618_v19 = vadd.f32 %v7890_v10, %v3073_v61  ;;  %v3470_v16 = vadd.f32 %v7844_v50, %v9035_v56  ;;  %v3708_v58 = vmax.f32 %v3468_v23, 0.0  ;;  %v9040_v15 = vld [vmem:[#allocation51_spill] sm:$0xff] }
 0x450   :  { %v3857_v53 = vmax.f32 %v3617_v42, 0.0  ;;  %v8066_v37 = vpack.c.bf16 %v3705_v8, %v3703_v60  ;;  %v3467_v4 = vadd.f32 %v7823_v47, %v9037_v59  ;;  %v3469_v24 = vadd.f32 %v7835_v39, %v9038_v14  ;;  %v9042_v8 = vld [vmem:[#allocation48_spill] sm:$0xff] }
 0x451   :  { %v3858_v29 = vmax.f32 %v3618_v19, 0.0  ;;  %4212 = vmatmul.mubr.bf16.gmra.mrb[208].mxu1 %v7850_v44  ;;  %v3710_v25 = vmax.f32 %v3470_v16, 0.0  ;;  %v3472_v11 = vadd.f32 %v7881_v20, %v9039_v22  ;;  %v3474_v61 = vadd.f32 %v7890_v10, %v9040_v15 }
 0x452   :  { %9036 = vst [vmem:[#allocation19_spill] sm:$0xff] %v8066_v37  ;;  %v8077_v23 = vpack.c.bf16 %v3857_v53, %v3855_v62  ;;  %4219 = vmatprep.mubr.bf16.mxu1 %v7927_v33  ;;  %v3707_v60 = vmax.f32 %v3467_v4, 0.0  ;;  %v3709_v42 = vmax.f32 %v3469_v24, 0.0  ;;  %v3471_v56 = vadd.f32 %v7875_v54, %v9042_v8  ;;  %v9044_v62 = vld [vmem:[#allocation50_spill] sm:$0xff] }
 0x453   :  { %v8082_v59 = vpack.c.bf16 %v3858_v29, %v3856_v32  ;;  %v3077_v19 = vpop.f32.mrb[148].mxu0  ;;  %v8084_v44 = vpack.c.bf16 %v3710_v25, %v3708_v58  ;;  %v3712_v16 = vmax.f32 %v3472_v11, 0.0  ;;  %v3714_v14 = vmax.f32 %v3474_v61, 0.0  ;;  %v9045_v29 = vld [vmem:[#allocation54_spill] sm:$0xff] }
 0x454   :  { %9041 = vst [vmem:[#allocation16_spill] sm:$0xff] %v8077_v23  ;;  %v3619_v22 = vadd.f32 %v7779_v38, %v3077_v19  ;;  %v3079_v37 = vpop.f32.mrb[149].mxu0  ;;  %v8087_v15 = vpack.c.bf16 %v3709_v42, %v3707_v60  ;;  %v3473_v33 = vadd.f32 %v7885_v41, %v9044_v62  ;;  %v3711_v53 = vmax.f32 %v3471_v56, 0.0  ;;  %v9046_v42 = vld [vmem:[#allocation52_spill] sm:$0xff] }
 0x455   :  { %9043 = vst [vmem:[#allocation18_spill] sm:$0xff] %v8082_v59  ;;  %v3620_v4 = vadd.f32 %v7784_v7, %v3079_v37  ;;  %v3081_v24 = vpop.f32.mrb[150].mxu0  ;;  %v8092_v8 = vpack.c.bf16 %v3714_v14, %v3712_v16  ;;  %v3476_v58 = vadd.f32 %v7784_v7, %v7412_v31  ;;  %v3478_v32 = vadd.f32 %v7796_v3, %v9045_v29  ;;  %v9047_v31 = vld [vmem:[#allocation53_spill] sm:$0xff] }
 0x456   :  { %v3859_v25 = vmax.f32 %v3619_v22, 0.0  ;;  %v3621_v11 = vadd.f32 %v7787_v26, %v3081_v24  ;;  %v3083_v61 = vpop.f32.mrb[151].mxu0  ;;  %v3713_v60 = vmax.f32 %v3473_v33, 0.0  ;;  %v3475_v19 = vadd.f32 %v7779_v38, %v9046_v42  ;;  %v9048_v33 = vld [vmem:[#allocation56_spill] sm:$0xff] }
 0x457   :  { %v3860_v56 = vmax.f32 %v3620_v4, 0.0  ;;  %v3622_v37 = vadd.f32 %v7796_v3, %v3083_v61  ;;  %v3716_v62 = vmax.f32 %v3476_v58, 0.0  ;;  %v3718_v16 = vmax.f32 %v3478_v32, 0.0  ;;  %v9050_v32 = vld [vmem:[#allocation55_spill] sm:$0xff] }
 0x458   :  { %v3861_v14 = vmax.f32 %v3621_v11, 0.0  ;;  %v8102_v23 = vpack.c.bf16 %v3713_v60, %v3711_v53  ;;  %v3477_v59 = vadd.f32 %v7787_v26, %v9047_v31  ;;  %v3715_v29 = vmax.f32 %v3475_v19, 0.0 }
 0x459   :  { %v3862_v22 = vmax.f32 %v3622_v37, 0.0  ;;  %4220 = vmatmul.mubr.bf16.gmra.mrb[212].mxu1 %v7943_v21  ;;  %v8107_v24 = vpack.c.bf16 %v3718_v16, %v3716_v62  ;;  %v3480_v42 = vadd.f32 %v7830_v17, %v9048_v33  ;;  %v3482_v4 = vadd.f32 %v7844_v50, %v7435_v34  ;;  %v9052_v62 = vld [vmem:[#allocation58_spill] sm:$0xff] }
 0x45a   :  { %v8113_v58 = vpack.c.bf16 %v3861_v14, %v3859_v25  ;;  %4227 = vmatprep.mubr.bf16.mxu1 %v7948_v1  ;;  %v3717_v53 = vmax.f32 %v3477_v59, 0.0  ;;  %v3479_v11 = vadd.f32 %v7823_v47, %v9050_v32  ;;  %v3481_v61 = vadd.f32 %v7835_v39, %v7432_v40 }
 0x45b   :  { %v8120_v21 = vpack.c.bf16 %v3862_v22, %v3860_v56  ;;  %v3087_v60 = vpop.f32.mrb[152].mxu0  ;;  %v3720_v19 = vmax.f32 %v3480_v42, 0.0  ;;  %v3722_v37 = vmax.f32 %v3482_v4, 0.0  ;;  %v3484_v16 = vadd.f32 %v7881_v20, %v9052_v62 }
 0x45c   :  { %9049 = vst [vmem:[#allocation21_spill] sm:$0xff] %v8113_v58  ;;  %v3623_v34 = vadd.f32 %v7823_v47, %v3087_v60  ;;  %v3089_v25 = vpop.f32.mrb[153].mxu0  ;;  %v8125_v14 = vpack.c.bf16 %v3717_v53, %v3715_v29  ;;  %v3719_v1 = vmax.f32 %v3479_v11, 0.0  ;;  %v3721_v59 = vmax.f32 %v3481_v61, 0.0  ;;  %v9053_v60 = vld [vmem:[#allocation57_spill] sm:$0xff] }
 0x45d   :  { %9051 = vst [vmem:[#allocation23_spill] sm:$0xff] %v8120_v21  ;;  %v3624_v31 = vadd.f32 %v7830_v17, %v3089_v25  ;;  %v3091_v33 = vpop.f32.mrb[154].mxu0  ;;  %v8128_v32 = vpack.c.bf16 %v3722_v37, %v3720_v19  ;;  %v3486_v40 = vadd.f32 %v7890_v10, %v7455_v30  ;;  %v3724_v56 = vmax.f32 %v3484_v16, 0.0  ;;  %v9105_v58 = vld [vmem:[#allocation13_spill] sm:$0xff] }
 0x45e   :  { %v3863_v22 = vmax.f32 %v3623_v34, 0.0  ;;  %v3625_v42 = vadd.f32 %v7835_v39, %v3091_v33  ;;  %v3093_v4 = vpop.f32.mrb[155].mxu0  ;;  %v8133_v62 = vpack.c.bf16 %v3721_v59, %v3719_v1  ;;  %v3483_v29 = vadd.f32 %v7875_v54, %v9053_v60 }
 0x45f   :  { %v3864_v53 = vmax.f32 %v3624_v31, 0.0  ;;  %v3626_v11 = vadd.f32 %v7844_v50, %v3093_v4  ;;  %v3726_v61 = vmax.f32 %v3486_v40, 0.0  ;;  %v3485_v19 = vadd.f32 %v7885_v41, %v7452_v43 }
 0x460   :  { %v3865_v37 = vmax.f32 %v3625_v42, 0.0  ;;  %v3723_v25 = vmax.f32 %v3483_v29, 0.0  ;;  %v3488_v30 = vadd.f32 %v7784_v7, %v7470_v45  ;;  %v3490_v16 = vadd.f32 %v7796_v3, %v7475_v27 }
 0x461   :  { %v3866_v34 = vmax.f32 %v3626_v11, 0.0  ;;  %4228 = vmatmul.mubr.bf16.gmra.mrb[216].mxu1 %v7954_v49  ;;  %v8145_v1 = vpack.c.bf16 %v3726_v61, %v3724_v56  ;;  %v3725_v59 = vmax.f32 %v3485_v19, 0.0  ;;  %v3487_v31 = vadd.f32 %v7779_v38, %v7466_v12  ;;  %v5835_v12 = vld [vmem:[%s8810_s8] ss:$8 sps:$4 sm:$0xff]  }
 0x462   :  { %v8149_v33 = vpack.c.bf16 %v3865_v37, %v3863_v22  ;;  %4235 = vmatprep.mubr.bf16.mxu1 %v7958_v46  ;;  %v3728_v43 = vmax.f32 %v3488_v30, 0.0  ;;  %v3730_v40 = vmax.f32 %v3490_v16, 0.0  ;;  %v3489_v45 = vadd.f32 %v7787_v26, %v7472_v2 }
 0x463   :  { %v8154_v42 = vpack.c.bf16 %v3866_v34, %v3864_v53  ;;  %v3097_v27 = vpop.f32.mrb[156].mxu0  ;;  %v8156_v4 = vpack.c.bf16 %v3725_v59, %v3723_v25  ;;  %v3727_v49 = vmax.f32 %v3487_v31, 0.0  ;;  %v3492_v56 = vadd.f32 %v7830_v17, %v7482_v0  ;;  %v5837_v53 = vld [vmem:[%s8810_s8 + $0x4] ss:$8 sps:$4 sm:$0xff]  }
 0x464   :  { %9054 = vst [vmem:[#allocation20_spill] sm:$0xff] %v8149_v33  ;;  %v3627_v46 = vadd.f32 %v7875_v54, %v3097_v27  ;;  %v3099_v22 = vpop.f32.mrb[157].mxu0  ;;  %v8164_v60 = vpack.c.bf16 %v3730_v40, %v3728_v43  ;;  %v3729_v29 = vmax.f32 %v3489_v45, 0.0  ;;  %v3494_v2 = vadd.f32 %v7844_v50, %v7486_v9  ;;  %4869 = vmatprep.subr.bf16.mxu0 %v5837_v53  ;;  %v9058_v53 = vld [vmem:[#allocation60_spill] sm:$0xff] }
 0x465   :  { %9055 = vst [vmem:[#allocation22_spill] sm:$0xff] %v8154_v42  ;;  %v3628_v11 = vadd.f32 %v7881_v20, %v3099_v22  ;;  %v3101_v0 = vpop.f32.mrb[158].mxu0  ;;  %v3732_v61 = vmax.f32 %v3492_v56, 0.0  ;;  %v3491_v19 = vadd.f32 %v7823_v47, %v7480_v28  ;;  %v3493_v37 = vadd.f32 %v7835_v39, %v7484_v6  ;;  %4870 = vmatpush1.bf16.msra.mxu0 %v5835_v12  ;;  %v9087_v42 = vld [vmem:[#allocation11_spill] sm:$0xff] }
 0x466   :  { %v3867_v25 = vmax.f32 %v3627_v46, 0.0  ;;  %v3629_v30 = vadd.f32 %v7885_v41, %v3101_v0  ;;  %v3103_v16 = vpop.f32.mrb[159].mxu0  ;;  %v8177_v34 = vpack.c.bf16 %v3729_v29, %v3727_v49  ;;  %v3734_v9 = vmax.f32 %v3494_v2, 0.0  ;;  %v9057_v29 = vld [vmem:[#allocation9_spill] sm:$0xff] }
 0x467   :  { %v3868_v59 = vmax.f32 %v3628_v11, 0.0  ;;  %v3630_v31 = vadd.f32 %v7890_v10, %v3103_v16  ;;  %v3731_v43 = vmax.f32 %v3491_v19, 0.0  ;;  %v3733_v40 = vmax.f32 %v3493_v37, 0.0  ;;  %v9060_v19 = vld [vmem:[#allocation62_spill] sm:$0xff]  ;;  %v9061_v16 = vld [vmem:[#allocation59_spill] sm:$0xff] }
 0x468   :  { %v3869_v45 = vmax.f32 %v3629_v30, 0.0  ;;  %v8180_v27 = vpack.c.bf16 %v3734_v9, %v3732_v61  ;;  %v3496_v28 = vadd.f32 %v7881_v20, %v7492_v57  ;;  %v3498_v6 = vadd.f32 %v7890_v10, %v7496_v36 }
 0x469   :  { %v3870_v56 = vmax.f32 %v3630_v31, 0.0  ;;  %4236 = vmatmul.mubr.bf16.gmra.mrb[220].mxu1 %v7976_v63  ;;  %v8187_v49 = vpack.c.bf16 %v3733_v40, %v3731_v43  ;;  %v3495_v46 = vadd.f32 %v7875_v54, %v7490_v13  ;;  %v3497_v12 = vadd.f32 %v7885_v41, %v7494_v52 }
 0x46a   :  { %v8193_v22 = vpack.c.bf16 %v3869_v45, %v3867_v25  ;;  %4243 = vmatprep.mubr.bf16.mxu1 %v9057_v29  ;;  %v3736_v2 = vmax.f32 %v3496_v28, 0.0  ;;  %v3738_v57 = vmax.f32 %v3498_v6, 0.0  ;;  %v3500_v36 = vadd.f32 %v7784_v7, %v9058_v53  ;;  %v9062_v45 = vld [vmem:[#allocation61_spill] sm:$0xff]  ;;  %v9063_v29 = vld [vmem:[#allocation64_spill] sm:$0xff] }
 0x46b   :  { %v8198_v11 = vpack.c.bf16 %v3870_v56, %v3868_v59  ;;  %v3107_v63 = vpop.f32.mrb[160].mxu0  ;;  %v3735_v0 = vmax.f32 %v3495_v46, 0.0  ;;  %v3737_v61 = vmax.f32 %v3497_v12, 0.0  ;;  %v3502_v13 = vadd.f32 %v7796_v3, %v9060_v19 }
 0x46c   :  { %9056 = vst [vmem:[#allocation25_spill] sm:$0xff] %v8193_v22  ;;  %v3631_v37 = vadd.f32 %v7779_v38, %v3107_v63  ;;  %v3109_v52 = vpop.f32.mrb[161].mxu0  ;;  %v8203_v25 = vpack.c.bf16 %v3738_v57, %v3736_v2  ;;  %v3740_v30 = vmax.f32 %v3500_v36, 0.0  ;;  %v3499_v9 = vadd.f32 %v7779_v38, %v9061_v16 }
 0x46d   :  { %9059 = vst [vmem:[#allocation27_spill] sm:$0xff] %v8198_v11  ;;  %v3632_v31 = vadd.f32 %v7784_v7, %v3109_v52  ;;  %v3111_v43 = vpop.f32.mrb[162].mxu0  ;;  %v8208_v59 = vpack.c.bf16 %v3737_v61, %v3735_v0  ;;  %v3742_v40 = vmax.f32 %v3502_v13, 0.0  ;;  %v3501_v28 = vadd.f32 %v7787_v26, %v9062_v45  ;;  %v9064_v61 = vld [vmem:[#allocation66_spill] sm:$0xff]  ;;  %v9065_v52 = vld [vmem:[#allocation63_spill] sm:$0xff]  ;;  %v9067_v45 = vld [vmem:[#allocation68_spill] sm:$0xff] }
 0x46e   :  { %v3871_v6 = vmax.f32 %v3631_v37, 0.0  ;;  %v3633_v56 = vadd.f32 %v7787_v26, %v3111_v43  ;;  %v3113_v46 = vpop.f32.mrb[163].mxu0  ;;  %v3739_v12 = vmax.f32 %v3499_v9, 0.0  ;;  %v3504_v2 = vadd.f32 %v7830_v17, %v9063_v29  ;;  %v9066_v43 = vld [vmem:[#allocation65_spill] sm:$0xff] }
 0x46f   :  { %v3872_v57 = vmax.f32 %v3632_v31, 0.0  ;;  %v3634_v53 = vadd.f32 %v7796_v3, %v3113_v46  ;;  %v8216_v36 = vpack.c.bf16 %v3742_v40, %v3740_v30  ;;  %v3741_v63 = vmax.f32 %v3501_v28, 0.0  ;;  %v9069_v46 = vld [vmem:[#allocation70_spill] sm:$0xff] }
 0x470   :  { %v3873_v0 = vmax.f32 %v3633_v56, 0.0  ;;  %v3506_v19 = vadd.f32 %v7844_v50, %v9064_v61  ;;  %v3744_v13 = vmax.f32 %v3504_v2, 0.0  ;;  %v3503_v37 = vadd.f32 %v7823_v47, %v9065_v52 }
 0x471   :  { %v3874_v16 = vmax.f32 %v3634_v53, 0.0  ;;  %4244 = vmatmul.mubr.bf16.gmra.mrb[224].mxu1 %v7989_v48  ;;  %v8223_v9 = vpack.c.bf16 %v3741_v63, %v3739_v12  ;;  %v3505_v31 = vadd.f32 %v7835_v39, %v9066_v43  ;;  %v3508_v30 = vadd.f32 %v7881_v20, %v9067_v45  ;;  %v9071_v63 = vld [vmem:[#allocation67_spill] sm:$0xff] }
 0x472   :  { %v8229_v40 = vpack.c.bf16 %v3873_v0, %v3871_v6  ;;  %4251 = vmatprep.mubr.bf16.mxu1 %v7992_v51  ;;  %v3746_v28 = vmax.f32 %v3506_v19, 0.0  ;;  %v3743_v56 = vmax.f32 %v3503_v37, 0.0  ;;  %v3510_v29 = vadd.f32 %v7890_v10, %v9069_v46  ;;  %v9072_v51 = vld [vmem:[#allocation69_spill] sm:$0xff] }
 0x473   :  { %v8234_v2 = vpack.c.bf16 %v3874_v16, %v3872_v57  ;;  %v3117_v48 = vpop.f32.mrb[164].mxu0  ;;  %v3745_v12 = vmax.f32 %v3505_v31, 0.0  ;;  %v3748_v53 = vmax.f32 %v3508_v30, 0.0  ;;  %v3507_v61 = vadd.f32 %v7875_v54, %v9071_v63  ;;  %v9073_v31 = vld [vmem:[#allocation72_spill] sm:$0xff] }
 0x474   :  { %9068 = vst [vmem:[#allocation24_spill] sm:$0xff] %v8229_v40  ;;  %v3635_v52 = vadd.f32 %v7823_v47, %v3117_v48  ;;  %v3119_v43 = vpop.f32.mrb[165].mxu0  ;;  %v8239_v6 = vpack.c.bf16 %v3746_v28, %v3744_v13  ;;  %v3750_v0 = vmax.f32 %v3510_v29, 0.0  ;;  %v3509_v19 = vadd.f32 %v7885_v41, %v9072_v51  ;;  %v9074_v51 = vld [vmem:[#allocation74_spill] sm:$0xff] }
 0x475   :  { %9070 = vst [vmem:[#allocation26_spill] sm:$0xff] %v8234_v2  ;;  %v3636_v37 = vadd.f32 %v7830_v17, %v3119_v43  ;;  %v3121_v45 = vpop.f32.mrb[166].mxu0  ;;  %v8244_v57 = vpack.c.bf16 %v3745_v12, %v3743_v56  ;;  %v3747_v16 = vmax.f32 %v3507_v61, 0.0  ;;  %v3512_v30 = vadd.f32 %v7784_v7, %v9073_v31  ;;  %v9075_v61 = vld [vmem:[#allocation71_spill] sm:$0xff] }
 0x476   :  { %v3875_v46 = vmax.f32 %v3635_v52, 0.0  ;;  %v3637_v63 = vadd.f32 %v7835_v39, %v3121_v45  ;;  %v3123_v48 = vpop.f32.mrb[167].mxu0  ;;  %v8249_v40 = vpack.c.bf16 %v3750_v0, %v3748_v53  ;;  %v3749_v13 = vmax.f32 %v3509_v19, 0.0  ;;  %v9076_v52 = vld [vmem:[#allocation73_spill] sm:$0xff]  ;;  %v9077_v0 = vld [vmem:[#allocation76_spill] sm:$0xff] }
 0x477   :  { %v3876_v28 = vmax.f32 %v3636_v37, 0.0  ;;  %v3638_v29 = vadd.f32 %v7844_v50, %v3123_v48  ;;  %v3514_v43 = vadd.f32 %v7796_v3, %v9074_v51  ;;  %v3752_v2 = vmax.f32 %v3512_v30, 0.0  ;;  %v9078_v37 = vld [vmem:[#allocation78_spill] sm:$0xff] }
 0x478   :  { %v3877_v56 = vmax.f32 %v3637_v63, 0.0  ;;  %v8254_v12 = vpack.c.bf16 %v3749_v13, %v3747_v16  ;;  %v3511_v31 = vadd.f32 %v7779_v38, %v9075_v61  ;;  %v3513_v45 = vadd.f32 %v7787_v26, %v9076_v52  ;;  %v9080_v13 = vld [vmem:[#allocation75_spill] sm:$0xff] }
 0x479   :  { %v3878_v22 = vmax.f32 %v3638_v29, 0.0  ;;  %4252 = vmatmul.mubr.bf16.gmra.mrb[228].mxu1 %v7999_v35  ;;  %v3754_v53 = vmax.f32 %v3514_v43, 0.0  ;;  %v3516_v19 = vadd.f32 %v7830_v17, %v9077_v0  ;;  %v3518_v48 = vadd.f32 %v7844_v50, %v9078_v37 }
 0x47a   :  { %v8265_v30 = vpack.c.bf16 %v3877_v56, %v3875_v46  ;;  %4259 = vmatprep.mubr.bf16.mxu1 %v8015_v18  ;;  %v3751_v16 = vmax.f32 %v3511_v31, 0.0  ;;  %v3753_v63 = vmax.f32 %v3513_v45, 0.0  ;;  %v3515_v51 = vadd.f32 %v7823_v47, %v9080_v13  ;;  %v9082_v46 = vld [vmem:[#allocation77_spill] sm:$0xff] }
 0x47b   :  { %v8270_v61 = vpack.c.bf16 %v3878_v22, %v3876_v28  ;;  %v3127_v29 = vpop.f32.mrb[168].mxu0  ;;  %v8272_v35 = vpack.c.bf16 %v3754_v53, %v3752_v2  ;;  %v3756_v43 = vmax.f32 %v3516_v19, 0.0  ;;  %v3758_v52 = vmax.f32 %v3518_v48, 0.0  ;;  %v9083_v22 = vld [vmem:[#allocation80_spill] sm:$0xff]  ;;  %v9084_v28 = vld [vmem:[#allocation82_spill] sm:$0xff] }
 0x47c   :  { %9079 = vst [vmem:[#allocation29_spill] sm:$0xff] %v8265_v30  ;;  %v3639_v0 = vadd.f32 %v7875_v54, %v3127_v29  ;;  %v3129_v11 = vpop.f32.mrb[169].mxu0  ;;  %v8275_v37 = vpack.c.bf16 %v3753_v63, %v3751_v16  ;;  %v3517_v18 = vadd.f32 %v7835_v39, %v9082_v46  ;;  %v3755_v56 = vmax.f32 %v3515_v51, 0.0  ;;  %v9085_v29 = vld [vmem:[#allocation79_spill] sm:$0xff] }
 0x47d   :  { %9081 = vst [vmem:[#allocation31_spill] sm:$0xff] %v8270_v61  ;;  %v3640_v31 = vadd.f32 %v7881_v20, %v3129_v11  ;;  %v3131_v45 = vpop.f32.mrb[170].mxu0  ;;  %v8280_v13 = vpack.c.bf16 %v3758_v52, %v3756_v43  ;;  %v3520_v2 = vadd.f32 %v7881_v20, %v9083_v22  ;;  %v3522_v53 = vadd.f32 %v7890_v10, %v9084_v28  ;;  %v9086_v22 = vld [vmem:[#allocation81_spill] sm:$0xff] }
 0x47e   :  { %v3879_v19 = vmax.f32 %v3639_v0, 0.0  ;;  %v3641_v48 = vadd.f32 %v7885_v41, %v3131_v45  ;;  %v3133_v16 = vpop.f32.mrb[171].mxu0  ;;  %v3757_v63 = vmax.f32 %v3517_v18, 0.0  ;;  %v3519_v46 = vadd.f32 %v7875_v54, %v9085_v29  ;;  %v9088_v18 = vld [vmem:[#allocation84_spill] sm:$0xff] }
 0x47f   :  { %v3880_v51 = vmax.f32 %v3640_v31, 0.0  ;;  %v3642_v11 = vadd.f32 %v7890_v10, %v3133_v16  ;;  %v3760_v30 = vmax.f32 %v3520_v2, 0.0  ;;  %v3762_v43 = vmax.f32 %v3522_v53, 0.0  ;;  %v9089_v31 = vld [vmem:[#allocation86_spill] sm:$0xff]  ;;  %v9091_v53 = vld [vmem:[#allocation83_spill] sm:$0xff] }
 0x480   :  { %v3881_v52 = vmax.f32 %v3641_v48, 0.0  ;;  %v8290_v61 = vpack.c.bf16 %v3757_v63, %v3755_v56  ;;  %v3521_v33 = vadd.f32 %v7885_v41, %v9086_v22  ;;  %v3759_v28 = vmax.f32 %v3519_v46, 0.0  ;;  %v9092_v63 = vld [vmem:[#allocation85_spill] sm:$0xff] }
 0x481   :  { %v3882_v0 = vmax.f32 %v3642_v11, 0.0  ;;  %4260 = vmatmul.mubr.bf16.gmra.mrb[232].mxu1 %v9087_v42  ;;  %v8295_v45 = vpack.c.bf16 %v3762_v43, %v3760_v30  ;;  %v3524_v29 = vadd.f32 %v7784_v7, %v9088_v18  ;;  %v3526_v16 = vadd.f32 %v7796_v3, %v9089_v31  ;;  %v9094_v43 = vld [vmem:[#allocation88_spill] sm:$0xff]  ;;  %v9095_v31 = vld [vmem:[#allocation90_spill] sm:$0xff] }
 0x482   :  { %v8301_v2 = vpack.c.bf16 %v3881_v52, %v3879_v19  ;;  %4267 = vmatprep.mubr.bf16.mxu1 %v8028_v55  ;;  %v3761_v56 = vmax.f32 %v3521_v33, 0.0  ;;  %v3523_v48 = vadd.f32 %v7779_v38, %v9091_v53  ;;  %v3525_v46 = vadd.f32 %v7787_v26, %v9092_v63 }
 0x483   :  { %v8308_v42 = vpack.c.bf16 %v3882_v0, %v3880_v51  ;;  %v3764_v30 = vmax.f32 %v3524_v29, 0.0  ;;  %v3766_v11 = vmax.f32 %v3526_v16, 0.0  ;;  %v3528_v22 = vadd.f32 %v7830_v17, %v9094_v43  ;;  %v9097_v51 = vld [vmem:[#allocation89_spill] sm:$0xff]  ;;  %v9099_v43 = vld [vmem:[#allocation92_spill] sm:$0xff] }
 0x484   :  { %9090 = vst [vmem:[#allocation28_spill] sm:$0xff] %v8301_v2  ;;  %v8312_v18 = vpack.c.bf16 %v3761_v56, %v3759_v28  ;;  %v3763_v19 = vmax.f32 %v3523_v48, 0.0  ;;  %v3765_v52 = vmax.f32 %v3525_v46, 0.0  ;;  %v3530_v55 = vadd.f32 %v7844_v50, %v9095_v31  ;;  %v9096_v2 = vld [vmem:[#allocation87_spill] sm:$0xff]  ;;  %v9100_v56 = vld [vmem:[#allocation94_spill] sm:$0xff] }
 0x485   :  { %9093 = vst [vmem:[#allocation30_spill] sm:$0xff] %v8308_v42  ;;  %v8316_v33 = vpack.c.bf16 %v3766_v11, %v3764_v30  ;;  %v3768_v53 = vmax.f32 %v3528_v22, 0.0  ;;  %v3527_v63 = vadd.f32 %v7823_v47, %v9096_v2  ;;  %v3529_v0 = vadd.f32 %v7835_v39, %v9097_v51  ;;  %v9101_v30 = vld [vmem:[#allocation91_spill] sm:$0xff]  ;;  %v9102_v22 = vld [vmem:[#allocation93_spill] sm:$0xff] }
 0x486   :  { %v8322_v29 = vpack.c.bf16 %v3765_v52, %v3763_v19  ;;  %v3770_v16 = vmax.f32 %v3530_v55, 0.0  ;;  %v3532_v28 = vadd.f32 %v7881_v20, %v9099_v43  ;;  %v3534_v48 = vadd.f32 %v7890_v10, %v9100_v56  ;;  %v9104_v52 = vld [vmem:[#allocation96_spill] sm:$0xff] }
 0x487   :  { %v3767_v46 = vmax.f32 %v3527_v63, 0.0  ;;  %v3769_v31 = vmax.f32 %v3529_v0, 0.0  ;;  %v3531_v11 = vadd.f32 %v7875_v54, %v9101_v30  ;;  %v3533_v2 = vadd.f32 %v7885_v41, %v9102_v22  ;;  %v9107_v0 = vld [vmem:[#allocation98_spill] sm:$0xff] }
 0x488   :  { %9098 = vst [vmem:[#allocation33_spill] sm:$0xff] %v8322_v29  ;;  %v8332_v42 = vpack.c.bf16 %v3770_v16, %v3768_v53  ;;  %v3772_v51 = vmax.f32 %v3532_v28, 0.0  ;;  %v3774_v19 = vmax.f32 %v3534_v48, 0.0  ;;  %v3536_v55 = vadd.f32 %v7784_v7, %v9104_v52  ;;  %v9108_v30 = vld [vmem:[#allocation14_spill] sm:$0xff]  ;;  %v9110_v16 = vld [vmem:[#allocation95_spill] sm:$0xff]  ;;  %v9111_v48 = vld [vmem:[#allocation97_spill] sm:$0xff] }
 0x489   :  { %4268 = vmatmul.mubr.bf16.gmra.mrb[236].mxu1 %v9105_v58  ;;  %v8337_v43 = vpack.c.bf16 %v3769_v31, %v3767_v46  ;;  %v3771_v56 = vmax.f32 %v3531_v11, 0.0  ;;  %v3773_v63 = vmax.f32 %v3533_v2, 0.0  ;;  %v3538_v21 = vadd.f32 %v7796_v3, %v9107_v0  ;;  %v9113_v46 = vld [vmem:[#allocation100_spill] sm:$0xff]  ;;  %v9114_v11 = vld [vmem:[#allocation102_spill] sm:$0xff] }
 0x48a   :  { %9103 = vst [vmem:[#allocation35_spill] sm:$0xff] %v8332_v42  ;;  %4275 = vmatprep.mubr.bf16.mxu1 %v9108_v30  ;;  %v8342_v29 = vpack.c.bf16 %v3774_v19, %v3772_v51  ;;  %v3776_v53 = vmax.f32 %v3536_v55, 0.0  ;;  %v3535_v28 = vadd.f32 %v7779_v38, %v9110_v16  ;;  %v3537_v22 = vadd.f32 %v7787_v26, %v9111_v48  ;;  %v9115_v51 = vld [vmem:[#allocation99_spill] sm:$0xff]  ;;  %v9116_v55 = vld [vmem:[#allocation101_spill] sm:$0xff] }
 0x48b   :  { %9106 = vst [vmem:[#allocation32_spill] sm:$0xff] %v8337_v43  ;;  %v8348_v52 = vpack.c.bf16 %v3773_v63, %v3771_v56  ;;  %v3778_v58 = vmax.f32 %v3538_v21, 0.0  ;;  %v3540_v31 = vadd.f32 %v7830_v17, %v9113_v46  ;;  %v3542_v2 = vadd.f32 %v7844_v50, %v9114_v11  ;;  %v9117_v63 = vld [vmem:[#allocation104_spill] sm:$0xff]  ;;  %v9119_v11 = vld [vmem:[#allocation106_spill] sm:$0xff]  ;;  %v9121_v42 = vld [vmem:[#allocation103_spill] sm:$0xff] }
 0x48c   :  { %9109 = vst [vmem:[#allocation34_spill] sm:$0xff] %v8342_v29  ;;  %v3775_v0 = vmax.f32 %v3535_v28, 0.0  ;;  %v3777_v30 = vmax.f32 %v3537_v22, 0.0  ;;  %v3539_v19 = vadd.f32 %v7823_v47, %v9115_v51  ;;  %v3541_v16 = vadd.f32 %v7835_v39, %v9116_v55 }
 0x48d   :  { %9112 = vst [vmem:[#allocation37_spill] sm:$0xff] %v8348_v52  ;;  %v8358_v29 = vpack.c.bf16 %v3778_v58, %v3776_v53  ;;  %v3780_v48 = vmax.f32 %v3540_v31, 0.0  ;;  %v3782_v56 = vmax.f32 %v3542_v2, 0.0  ;;  %v3544_v21 = vadd.f32 %v7881_v20, %v9117_v63  ;;  %v9122_v53 = vld [vmem:[#allocation105_spill] sm:$0xff]  ;;  %v9124_v63 = vld [vmem:[#allocation108_spill] sm:$0xff] }
 0x48e   :  { %v8362_v52 = vpack.c.bf16 %v3777_v30, %v3775_v0  ;;  %v3779_v46 = vmax.f32 %v3539_v19, 0.0  ;;  %v3781_v43 = vmax.f32 %v3541_v16, 0.0  ;;  %v3546_v28 = vadd.f32 %v7890_v10, %v9119_v11  ;;  %v9125_v30 = vld [vmem:[#allocation110_spill] sm:$0xff]  ;;  %v9126_v16 = vld [vmem:[#allocation17_spill] sm:$0xff] }
 0x48f   :  { %v8366_v22 = vpack.c.bf16 %v3782_v56, %v3780_v48  ;;  %v3784_v51 = vmax.f32 %v3544_v21, 0.0  ;;  %v3543_v55 = vadd.f32 %v7875_v54, %v9121_v42  ;;  %v3545_v58 = vadd.f32 %v7885_v41, %v9122_v53  ;;  %v9127_v21 = vld [vmem:[#allocation107_spill] sm:$0xff]  ;;  %v9128_v42 = vld [vmem:[#allocation109_spill] sm:$0xff]  ;;  %v9130_v53 = vld [vmem:[#allocation112_spill] sm:$0xff] }
 0x490   :  { %9118 = vst [vmem:[#allocation39_spill] sm:$0xff] %v8362_v52  ;;  %v8372_v31 = vpack.c.bf16 %v3781_v43, %v3779_v46  ;;  %v3786_v2 = vmax.f32 %v3546_v28, 0.0  ;;  %v3548_v0 = vadd.f32 %v7784_v7, %v9124_v63  ;;  %v3550_v19 = vadd.f32 %v7796_v3, %v9125_v30 }
 0x491   :  { %9120 = vst [vmem:[#allocation36_spill] sm:$0xff] %v8366_v22  ;;  %4276 = vmatmul.mubr.bf16.gmra.mrb[240].mxu1 %v9126_v16  ;;  %v3783_v48 = vmax.f32 %v3543_v55, 0.0  ;;  %v3785_v56 = vmax.f32 %v3545_v58, 0.0  ;;  %v3547_v11 = vadd.f32 %v7779_v38, %v9127_v21  ;;  %v3549_v22 = vadd.f32 %v7787_v26, %v9128_v42  ;;  %v9132_v58 = vld [vmem:[#allocation114_spill] sm:$0xff]  ;;  %v9134_v42 = vld [vmem:[#allocation111_spill] sm:$0xff] }
 0x492   :  { %9123 = vst [vmem:[#allocation38_spill] sm:$0xff] %v8372_v31  ;;  %4283 = vmatprep.mubr.bf16.mxu1 %v8061_v5  ;;  %v8384_v43 = vpack.c.bf16 %v3786_v2, %v3784_v51  ;;  %v3788_v46 = vmax.f32 %v3548_v0, 0.0  ;;  %v3790_v28 = vmax.f32 %v3550_v19, 0.0  ;;  %v3552_v63 = vadd.f32 %v7830_v17, %v9130_v53  ;;  %v9135_v51 = vld [vmem:[#allocation113_spill] sm:$0xff]  ;;  %v9137_v53 = vld [vmem:[#allocation116_spill] sm:$0xff] }
 0x493   :  { %v8388_v30 = vpack.c.bf16 %v3785_v56, %v3783_v48  ;;  %v3787_v16 = vmax.f32 %v3547_v11, 0.0  ;;  %v3789_v55 = vmax.f32 %v3549_v22, 0.0  ;;  %v3554_v31 = vadd.f32 %v7844_v50, %v9132_v58  ;;  %v9138_v56 = vld [vmem:[#allocation118_spill] sm:$0xff] }
 0x494   :  { %9129 = vst [vmem:[#allocation41_spill] sm:$0xff] %v8384_v43  ;;  %v8392_v21 = vpack.c.bf16 %v3790_v28, %v3788_v46  ;;  %v3792_v52 = vmax.f32 %v3552_v63, 0.0  ;;  %v3551_v5 = vadd.f32 %v7823_v47, %v9134_v42  ;;  %v3553_v2 = vadd.f32 %v7835_v39, %v9135_v51  ;;  %v9139_v46 = vld [vmem:[#allocation115_spill] sm:$0xff]  ;;  %v9140_v63 = vld [vmem:[#allocation117_spill] sm:$0xff] }
 0x495   :  { %9131 = vst [vmem:[#allocation43_spill] sm:$0xff] %v8388_v30  ;;  %v8398_v0 = vpack.c.bf16 %v3789_v55, %v3787_v16  ;;  %v3794_v19 = vmax.f32 %v3554_v31, 0.0  ;;  %v3556_v48 = vadd.f32 %v7881_v20, %v9137_v53  ;;  %v3558_v22 = vadd.f32 %v7890_v10, %v9138_v56  ;;  %v9141_v55 = vld [vmem:[#allocation120_spill] sm:$0xff]  ;;  %v9143_v56 = vld [vmem:[#allocation122_spill] sm:$0xff] }
 0x496   :  { %9133 = vst [vmem:[#allocation40_spill] sm:$0xff] %v8392_v21  ;;  %v3791_v11 = vmax.f32 %v3551_v5, 0.0  ;;  %v3793_v58 = vmax.f32 %v3553_v2, 0.0  ;;  %v3555_v28 = vadd.f32 %v7875_v54, %v9139_v46  ;;  %v3557_v42 = vadd.f32 %v7885_v41, %v9140_v63  ;;  %v9144_v2 = vld [vmem:[#allocation19_spill] sm:$0xff] }
 0x497   :  { %9136 = vst [vmem:[#allocation42_spill] sm:$0xff] %v8398_v0  ;;  %v8408_v21 = vpack.c.bf16 %v3794_v19, %v3792_v52  ;;  %v3796_v51 = vmax.f32 %v3556_v48, 0.0  ;;  %v3798_v16 = vmax.f32 %v3558_v22, 0.0  ;;  %v3560_v31 = vadd.f32 %v7784_v7, %v9141_v55  ;;  %v9146_v63 = vld [vmem:[#allocation119_spill] sm:$0xff]  ;;  %v9147_v19 = vld [vmem:[#allocation121_spill] sm:$0xff] }
 0x498   :  { %v8412_v0 = vpack.c.bf16 %v3793_v58, %v3791_v11  ;;  %v3795_v53 = vmax.f32 %v3555_v28, 0.0  ;;  %v3797_v30 = vmax.f32 %v3557_v42, 0.0  ;;  %v3562_v5 = vadd.f32 %v7796_v3, %v9143_v56  ;;  %v9149_v58 = vld [vmem:[#allocation124_spill] sm:$0xff]  ;;  %v9150_v42 = vld [vmem:[#allocation126_spill] sm:$0xff] }
 0x499   :  { %4284 = vmatmul.mubr.bf16.gmra.mrb[244].mxu1 %v9144_v2  ;;  %v8417_v46 = vpack.c.bf16 %v3798_v16, %v3796_v51  ;;  %v3800_v43 = vmax.f32 %v3560_v31, 0.0  ;;  %v3559_v52 = vadd.f32 %v7779_v38, %v9146_v63  ;;  %v3561_v48 = vadd.f32 %v7787_v26, %v9147_v19  ;;  %v9151_v31 = vld [vmem:[#allocation123_spill] sm:$0xff]  ;;  %v9152_v2 = vld [vmem:[#allocation125_spill] sm:$0xff] }
 0x49a   :  { %9142 = vst [vmem:[#allocation45_spill] sm:$0xff] %v8412_v0  ;;  %4291 = vmatprep.mubr.bf16.mxu1 %v8084_v44  ;;  %v8424_v22 = vpack.c.bf16 %v3797_v30, %v3795_v53  ;;  %v3802_v11 = vmax.f32 %v3562_v5, 0.0  ;;  %v3564_v28 = vadd.f32 %v7830_v17, %v9149_v58  ;;  %v3566_v55 = vadd.f32 %v7844_v50, %v9150_v42  ;;  %v9153_v53 = vld [vmem:[#allocation128_spill] sm:$0xff]  ;;  %v9154_v42 = vld [vmem:[#allocation130_spill] sm:$0xff]  ;;  %v9156_v0 = vld [vmem:[#allocation127_spill] sm:$0xff] }
 0x49b   :  { %9145 = vst [vmem:[#allocation47_spill] sm:$0xff] %v8417_v46  ;;  %v3799_v51 = vmax.f32 %v3559_v52, 0.0  ;;  %v3801_v16 = vmax.f32 %v3561_v48, 0.0  ;;  %v3563_v56 = vadd.f32 %v7823_v47, %v9151_v31  ;;  %v3565_v63 = vadd.f32 %v7835_v39, %v9152_v2 }
 0x49c   :  { %9148 = vst [vmem:[#allocation44_spill] sm:$0xff] %v8424_v22  ;;  %v8434_v19 = vpack.c.bf16 %v3802_v11, %v3800_v43  ;;  %v3804_v44 = vmax.f32 %v3564_v28, 0.0  ;;  %v3806_v30 = vmax.f32 %v3566_v55, 0.0  ;;  %v3568_v5 = vadd.f32 %v7881_v20, %v9153_v53  ;;  %v9157_v43 = vld [vmem:[#allocation129_spill] sm:$0xff]  ;;  %v9159_v53 = vld [vmem:[#allocation132_spill] sm:$0xff] }
 0x49d   :  { %v8438_v22 = vpack.c.bf16 %v3801_v16, %v3799_v51  ;;  %v3803_v58 = vmax.f32 %v3563_v56, 0.0  ;;  %v3805_v46 = vmax.f32 %v3565_v63, 0.0  ;;  %v3570_v52 = vadd.f32 %v7890_v10, %v9154_v42  ;;  %v9160_v16 = vld [vmem:[#allocation134_spill] sm:$0xff] }
 0x49e   :  { %v8442_v48 = vpack.c.bf16 %v3806_v30, %v3804_v44  ;;  %v3808_v31 = vmax.f32 %v3568_v5, 0.0  ;;  %v3567_v2 = vadd.f32 %v7875_v54, %v9156_v0  ;;  %v3569_v11 = vadd.f32 %v7885_v41, %v9157_v43  ;;  %v9161_v44 = vld [vmem:[#allocation131_spill] sm:$0xff]  ;;  %v9162_v5 = vld [vmem:[#allocation133_spill] sm:$0xff] }
 0x49f   :  { %v8448_v28 = vpack.c.bf16 %v3805_v46, %v3803_v58  ;;  %v3810_v55 = vmax.f32 %v3570_v52, 0.0  ;;  %v3572_v51 = vadd.f32 %v7784_v7, %v9159_v53  ;;  %v3574_v56 = vadd.f32 %v7796_v3, %v9160_v16  ;;  %v9164_v52 = vld [vmem:[#allocation136_spill] sm:$0xff] }
 0x4a0   :  { %9155 = vst [vmem:[#allocation46_spill] sm:$0xff] %v8442_v48  ;;  %v3807_v63 = vmax.f32 %v3567_v2, 0.0  ;;  %v3809_v42 = vmax.f32 %v3569_v11, 0.0  ;;  %v3571_v30 = vadd.f32 %v7779_v38, %v9161_v44  ;;  %v3573_v0 = vadd.f32 %v7787_v26, %v9162_v5  ;;  %v5838_v2 = vld [vmem:[%s8810_s8 + $0x10] ss:$8 sps:$4 sm:$0xff]   ;;  %v9168_v5 = vld [vmem:[#allocation135_spill] sm:$0xff] }
 0x4a1   :  { %9158 = vst [vmem:[#allocation49_spill] sm:$0xff] %v8448_v28  ;;  %4292 = vmatmul.mubr.bf16.gmra.mrb[248].mxu1 %v8087_v15  ;;  %v8459_v43 = vpack.c.bf16 %v3810_v55, %v3808_v31  ;;  %v3812_v46 = vmax.f32 %v3572_v51, 0.0  ;;  %v3814_v58 = vmax.f32 %v3574_v56, 0.0  ;;  %v3576_v53 = vadd.f32 %v7830_v17, %v9164_v52  ;;  %v5840_v11 = vld [vmem:[%s8810_s8 + $0x14] ss:$8 sps:$4 sm:$0xff]   ;;  %v9166_v55 = vld [vmem:[#allocation138_spill] sm:$0xff] }
 0x4a2   :  { %4299 = vmatprep.mubr.bf16.mxu1 %v8092_v8  ;;  %v8470_v16 = vpack.c.bf16 %v3809_v42, %v3807_v63  ;;  %v3811_v15 = vmax.f32 %v3571_v30, 0.0  ;;  %v3813_v31 = vmax.f32 %v3573_v0, 0.0  ;;  %v3578_v51 = vadd.f32 %v7844_v50, %v9166_v55  ;;  %v9169_v52 = vld [vmem:[#allocation137_spill] sm:$0xff]  ;;  %4871 = vmatprep.subr.bf16.mxu0 %v5840_v11  ;;  %v9171_v63 = vld [vmem:[#allocation140_spill] sm:$0xff]  ;;  %v9172_v30 = vld [vmem:[#allocation142_spill] sm:$0xff] }
 0x4a3   :  { %9163 = vst [vmem:[#allocation51_spill] sm:$0xff] %v8459_v43  ;;  %v8474_v56 = vpack.c.bf16 %v3814_v58, %v3812_v46  ;;  %v3816_v44 = vmax.f32 %v3576_v53, 0.0  ;;  %v3575_v8 = vadd.f32 %v7823_v47, %v9168_v5  ;;  %v3577_v43 = vadd.f32 %v7835_v39, %v9169_v52  ;;  %4872 = vmatpush1.bf16.msra.mxu0 %v5838_v2  ;;  %v9173_v53 = vld [vmem:[#allocation139_spill] sm:$0xff]  ;;  %v9174_v5 = vld [vmem:[#allocation141_spill] sm:$0xff] }
 0x4a4   :  { %9165 = vst [vmem:[#allocation48_spill] sm:$0xff] %v8470_v16  ;;  %v8480_v28 = vpack.c.bf16 %v3813_v31, %v3811_v15  ;;  %v3818_v48 = vmax.f32 %v3578_v51, 0.0  ;;  %v3580_v42 = vadd.f32 %v7881_v20, %v9171_v63  ;;  %v3582_v0 = vadd.f32 %v7890_v10, %v9172_v30  ;;  %v9175_v31 = vld [vmem:[#allocation145_spill] sm:$0xff]  ;;  %v9176_v2 = vld [vmem:[#allocation147_spill] sm:$0xff]  ;;  %v9177_v16 = vld [vmem:[#allocation144_spill] sm:$0xff] }
 0x4a5   :  { %9167 = vst [vmem:[#allocation50_spill] sm:$0xff] %v8474_v56  ;;  %v3815_v46 = vmax.f32 %v3575_v8, 0.0  ;;  %v3817_v58 = vmax.f32 %v3577_v43, 0.0  ;;  %v3579_v55 = vadd.f32 %v7875_v54, %v9173_v53  ;;  %v3581_v56 = vadd.f32 %v7885_v41, %v9174_v5 }
 0x4a6   :  { %9170 = vst [vmem:[#allocation54_spill] sm:$0xff] %v8480_v28  ;;  %v8490_v52 = vpack.c.bf16 %v3818_v48, %v3816_v44  ;;  %v3820_v11 = vmax.f32 %v3580_v42, 0.0  ;;  %v3822_v15 = vmax.f32 %v3582_v0, 0.0  ;;  %v3584_v51 = vadd.f32 %v7784_v7, %v9175_v31  ;;  %v9178_v48 = vld [vmem:[#allocation146_spill] sm:$0xff]  ;;  %v9179_v0 = vld [vmem:[#allocation149_spill] sm:$0xff] }
 0x4a7   :  { %v8494_v63 = vpack.c.bf16 %v3817_v58, %v3815_v46  ;;  %v3819_v28 = vmax.f32 %v3579_v55, 0.0  ;;  %v3821_v30 = vmax.f32 %v3581_v56, 0.0  ;;  %v3586_v43 = vadd.f32 %v7796_v3, %v9176_v2  ;;  %v9180_v46 = vld [vmem:[#allocation151_spill] sm:$0xff]  ;;  %v9183_v31 = vld [vmem:[#allocation153_spill] sm:$0xff] }
 0x4a8   :  { %v8498_v8 = vpack.c.bf16 %v3822_v15, %v3820_v11  ;;  %v3824_v53 = vmax.f32 %v3584_v51, 0.0  ;;  %v3583_v5 = vadd.f32 %v7779_v38, %v9177_v16  ;;  %v3585_v44 = vadd.f32 %v7787_v26, %v9178_v48  ;;  %v9181_v11 = vld [vmem:[#allocation148_spill] sm:$0xff]  ;;  %v9182_v16 = vld [vmem:[#allocation150_spill] sm:$0xff] }
 0x4a9   :  { %4300 = vmatmul.mubr.bf16.gmra.mrb[252].mxu1 %v8102_v23  ;;  %v8505_v42 = vpack.c.bf16 %v3821_v30, %v3819_v28  ;;  %v3826_v7 = vmax.f32 %v3586_v43, 0.0  ;;  %v3588_v56 = vadd.f32 %v7830_v17, %v9179_v0  ;;  %v3590_v3 = vadd.f32 %v7844_v50, %v9180_v46 }
 0x4aa   :  { %4307 = vmatprep.mubr.bf16.mxu1 %v8107_v24  ;;  %v3823_v58 = vmax.f32 %v3583_v5, 0.0  ;;  %v3825_v55 = vmax.f32 %v3585_v44, 0.0  ;;  %v3587_v38 = vadd.f32 %v7823_v47, %v9181_v11  ;;  %v3589_v26 = vadd.f32 %v7835_v39, %v9182_v16  ;;  %v9184_v24 = vld [vmem:[#allocation155_spill] sm:$0xff]  ;;  %v9185_v47 = vld [vmem:[#allocation152_spill] sm:$0xff]  ;;  %v9186_v39 = vld [vmem:[#allocation154_spill] sm:$0xff] }
 0x4ab   :  { %v8516_v23 = vpack.c.bf16 %v3826_v7, %v3824_v53  ;;  %v3828_v28 = vmax.f32 %v3588_v56, 0.0  ;;  %v3830_v15 = vmax.f32 %v3590_v3, 0.0  ;;  %v3592_v17 = vadd.f32 %v7881_v20, %v9183_v31  ;;  %v9187_v3 = vld [vmem:[#allocation33_spill] sm:$0xff] }
 0x4ac   :  { %v8520_v51 = vpack.c.bf16 %v3825_v55, %v3823_v58  ;;  %v3827_v50 = vmax.f32 %v3587_v38, 0.0  ;;  %v3829_v30 = vmax.f32 %v3589_v26, 0.0  ;;  %v3594_v2 = vadd.f32 %v7890_v10, %v9184_v24  ;;  %v5844_v26 = vld [vmem:[%s8810_s8 + $0x30] ss:$8 sps:$4 sm:$0xff]  }
 0x4ad   :  { %v8524_v43 = vpack.c.bf16 %v3830_v15, %v3828_v28  ;;  %v3591_v5 = vadd.f32 %v7875_v54, %v9185_v47  ;;  %v3593_v53 = vadd.f32 %v7885_v41, %v9186_v39  ;;  %v3832_v44 = vmax.f32 %v3592_v17, 0.0  ;;  %v5841_v41 = vld [vmem:[%s8810_s8 + $0x20] ss:$8 sps:$4 sm:$0xff]   ;;  %v5843_v54 = vld [vmem:[%s8810_s8 + $0x24] ss:$8 sps:$4 sm:$0xff]  }
 0x4ae   :  { %v8530_v48 = vpack.c.bf16 %v3829_v30, %v3827_v50  ;;  %v3834_v7 = vmax.f32 %v3594_v2, 0.0  ;;  %4873 = vmatprep.subr.bf16.mxu0 %v5843_v54  ;;  %v5846_v28 = vld [vmem:[%s8810_s8 + $0x34] ss:$8 sps:$4 sm:$0xff]  }
 0x4af   :  { %v3831_v20 = vmax.f32 %v3591_v5, 0.0  ;;  %v3833_v0 = vmax.f32 %v3593_v53, 0.0  ;;  %4874 = vmatpush1.bf16.msra.mxu0 %v5841_v41  ;;  %v9191_v2 = vld [vmem:[#allocation37_spill] sm:$0xff] }
 0x4b0   :  { %v8532_v56 = vpack.c.bf16 %v3834_v7, %v3832_v44  ;;  %4875 = vmatprep.subr.bf16.mxu0 %v5846_v28  ;;  %v9192_v7 = vld [vmem:[#allocation39_spill] sm:$0xff] }
 0x4b1   :  { %4308 = vmatmul.mubr.bf16.gmra.mrb[0].mxu1 %v8125_v14  ;;  %v8535_v46 = vpack.c.bf16 %v3833_v0, %v3831_v20  ;;  %v9193_v20 = vld [vmem:[#allocation36_spill] sm:$0xff] }
 0x4b2   :  { %4315 = vmatprep.mubr.bf16.mxu1 %v8128_v32 }
 0x4b3   :  { %4876 = vmatpush1.bf16.msra.mxu0 %v5844_v26 }
 0x4b9   :  { %4316 = vmatmul.mubr.bf16.gmra.mrb[4].mxu1 %v8133_v62 }
 0x4ba   :  { %4323 = vmatprep.mubr.bf16.mxu1 %v8145_v1 }
 0x4c1   :  { %4324 = vmatmul.mubr.bf16.gmra.mrb[8].mxu1 %v8156_v4 }
 0x4c2   :  { %4331 = vmatprep.mubr.bf16.mxu1 %v8164_v60 }
 0x4c9   :  { %4332 = vmatmul.mubr.bf16.gmra.mrb[12].mxu1 %v8177_v34 }
 0x4ca   :  { %4339 = vmatprep.mubr.bf16.mxu1 %v8180_v27 }
 0x4d1   :  { %4340 = vmatmul.mubr.bf16.gmra.mrb[16].mxu1 %v8187_v49 }
 0x4d2   :  { %4347 = vmatprep.mubr.bf16.mxu1 %v8203_v25 }
 0x4d9   :  { %4348 = vmatmul.mubr.bf16.gmra.mrb[20].mxu1 %v8208_v59 }
 0x4da   :  { %4355 = vmatprep.mubr.bf16.mxu1 %v8216_v36 }
 0x4e1   :  { %4356 = vmatmul.mubr.bf16.gmra.mrb[24].mxu1 %v8223_v9 }
 0x4e2   :  { %4363 = vmatprep.mubr.bf16.mxu1 %v8239_v6 }
 0x4e9   :  { %4364 = vmatmul.mubr.bf16.gmra.mrb[28].mxu1 %v8244_v57 }
 0x4ea   :  { %4371 = vmatprep.mubr.bf16.mxu1 %v8249_v40 }
 0x4f1   :  { %4372 = vmatmul.mubr.bf16.gmra.mrb[32].mxu1 %v8254_v12 }
 0x4f2   :  { %4379 = vmatprep.mubr.bf16.mxu1 %v8272_v35 }
 0x4f4   :  { %v4165_v10 = vpop.f32.mrb[184].mxu1 }
 0x4f5   :  { %v4167_v14 = vpop.f32.mrb[185].mxu1 }
 0x4f6   :  { %v4168_v32 = vpop.f32.mrb[186].mxu1 }
 0x4f7   :  { %v4644_v62 = vpack.c.bf16 %v4168_v32, %v4165_v10  ;;  %v4170_v1 = vpop.f32.mrb[187].mxu1  ;;  %v9194_v32 = vld [vmem:[#allocation38_spill] sm:$0xff] }
 0x4f9   :  { %4380 = vmatmul.mubr.bf16.gmra.mrb[36].mxu1 %v8275_v37 }
 0x4fa   :  { %4387 = vmatprep.mubr.bf16.mxu1 %v8280_v13 }
 0x4fc   :  { %v4173_v4 = vpop.f32.mrb[188].mxu1 }
 0x4fd   :  { %v4175_v60 = vpop.f32.mrb[189].mxu1 }
 0x4fe   :  { %v4176_v34 = vpop.f32.mrb[190].mxu1 }
 0x4ff   :  { %v4645_v27 = vpack.c.bf16 %v4176_v34, %v4173_v4  ;;  %v4178_v49 = vpop.f32.mrb[191].mxu1 }
 0x500   :  { %v9197_v49 = vld [vmem:[#allocation40_spill] sm:$0xff] }
 0x501   :  { %4388 = vmatmul.mubr.bf16.gmra.mrb[40].mxu1 %v8290_v61  ;;  %v9188_v61 = vld [vmem:[#allocation35_spill] sm:$0xff] }
 0x502   :  { %4395 = vmatprep.mubr.bf16.mxu1 %v8295_v45 }
 0x504   :  { %v4181_v25 = vpop.f32.mrb[192].mxu1 }
 0x505   :  { %v4183_v59 = vpop.f32.mrb[193].mxu1 }
 0x506   :  { %v4184_v36 = vpop.f32.mrb[194].mxu1 }
 0x507   :  { %v4646_v9 = vpack.c.bf16 %v4184_v36, %v4181_v25  ;;  %v4186_v40 = vpop.f32.mrb[195].mxu1 }
 0x509   :  { %4396 = vmatmul.mubr.bf16.gmra.mrb[44].mxu1 %v8312_v18  ;;  %v9189_v18 = vld [vmem:[#allocation32_spill] sm:$0xff] }
 0x50a   :  { %4403 = vmatprep.mubr.bf16.mxu1 %v8316_v33  ;;  %v9190_v33 = vld [vmem:[#allocation34_spill] sm:$0xff] }
 0x50c   :  { %v4189_v6 = vpop.f32.mrb[196].mxu1 }
 0x50d   :  { %v4191_v57 = vpop.f32.mrb[197].mxu1 }
 0x50e   :  { %v4192_v12 = vpop.f32.mrb[198].mxu1  ;;  %v9198_v57 = vld [vmem:[#allocation42_spill] sm:$0xff] }
 0x50f   :  { %v4647_v35 = vpack.c.bf16 %v4192_v12, %v4189_v6  ;;  %v4194_v37 = vpop.f32.mrb[199].mxu1 }
 0x511   :  { %v8566_v13 = vmax.bf16 %v4647_v35, %v4644_v62  ;;  %4404 = vmatmul.mubr.bf16.gmra.mrb[48].mxu1 %v9187_v3  ;;  %v9195_v62 = vld [vmem:[#allocation41_spill] sm:$0xff] }
 0x512   :  { %4411 = vmatprep.mubr.bf16.mxu1 %v9188_v61 }
 0x514   :  { %v4197_v45 = vpop.f32.mrb[200].mxu1 }
 0x515   :  { %v4199_v58 = vpop.f32.mrb[201].mxu1 }
 0x516   :  { %v4200_v55 = vpop.f32.mrb[202].mxu1 }
 0x517   :  { %v4648_v11 = vpack.c.bf16 %v4200_v55, %v4197_v45  ;;  %v4202_v38 = vpop.f32.mrb[203].mxu1  ;;  %v9199_v55 = vld [vmem:[#allocation45_spill] sm:$0xff] }
 0x519   :  { %v8570_v16 = vmax.bf16 %v4648_v11, %v4645_v27  ;;  %4412 = vmatmul.mubr.bf16.gmra.mrb[52].mxu1 %v9189_v18  ;;  %v9196_v27 = vld [vmem:[#allocation43_spill] sm:$0xff] }
 0x51a   :  { %4419 = vmatprep.mubr.bf16.mxu1 %v9190_v33  ;;  %v9200_v11 = vld [vmem:[#allocation47_spill] sm:$0xff] }
 0x51c   :  { %v4205_v15 = vpop.f32.mrb[204].mxu1 }
 0x51d   :  { %v4207_v31 = vpop.f32.mrb[205].mxu1 }
 0x51e   :  { %v4208_v17 = vpop.f32.mrb[206].mxu1  ;;  %v9201_v31 = vld [vmem:[#allocation44_spill] sm:$0xff] }
 0x51f   :  { %v4649_v50 = vpack.c.bf16 %v4208_v17, %v4205_v15  ;;  %v4210_v30 = vpop.f32.mrb[207].mxu1 }
 0x521   :  { %v8580_v24 = vmax.bf16 %v4649_v50, %v4646_v9  ;;  %4420 = vmatmul.mubr.bf16.gmra.mrb[56].mxu1 %v9191_v2 }
 0x522   :  { %4427 = vmatprep.mubr.bf16.mxu1 %v8358_v29 }
 0x524   :  { %v4213_v47 = vpop.f32.mrb[208].mxu1 }
 0x525   :  { %v4215_v5 = vpop.f32.mrb[209].mxu1 }
 0x526   :  { %v4216_v39 = vpop.f32.mrb[210].mxu1 }
 0x527   :  { %v4650_v53 = vpack.c.bf16 %v4216_v39, %v4213_v47  ;;  %v4218_v44 = vpop.f32.mrb[211].mxu1  ;;  %v5847_v39 = vld [vmem:[%s8810_s8 + $0x40] ss:$8 sps:$4 sm:$0xff]  }
 0x528   :  { %v9202_v44 = vld [vmem:[#allocation46_spill] sm:$0xff] }
 0x529   :  { %4428 = vmatmul.mubr.bf16.gmra.mrb[60].mxu1 %v9192_v7 }
 0x52a   :  { %4435 = vmatprep.mubr.bf16.mxu1 %v9193_v20 }
 0x52c   :  { %v4221_v0 = vpop.f32.mrb[212].mxu1 }
 0x52d   :  { %v4223_v41 = vpop.f32.mrb[213].mxu1 }
 0x52e   :  { %v4224_v54 = vpop.f32.mrb[214].mxu1 }
 0x52f   :  { %v4651_v10 = vpack.c.bf16 %v4224_v54, %v4221_v0  ;;  %v4226_v14 = vpop.f32.mrb[215].mxu1  ;;  %v9203_v54 = vld [vmem:[#allocation49_spill] sm:$0xff] }
 0x531   :  { %4436 = vmatmul.mubr.bf16.gmra.mrb[64].mxu1 %v9194_v32 }
 0x532   :  { %4443 = vmatprep.mubr.bf16.mxu1 %v9195_v62 }
 0x534   :  { %v4229_v1 = vpop.f32.mrb[216].mxu1 }
 0x535   :  { %v4231_v29 = vpop.f32.mrb[217].mxu1 }
 0x536   :  { %v4232_v4 = vpop.f32.mrb[218].mxu1  ;;  %v9205_v29 = vld [vmem:[#allocation48_spill] sm:$0xff] }
 0x537   :  { %v4652_v60 = vpack.c.bf16 %v4232_v4, %v4229_v1  ;;  %v4234_v34 = vpop.f32.mrb[219].mxu1  ;;  %v9206_v4 = vld [vmem:[#allocation50_spill] sm:$0xff] }
 0x539   :  { %4444 = vmatmul.mubr.bf16.gmra.mrb[68].mxu1 %v9196_v27 }
 0x53a   :  { %4451 = vmatprep.mubr.bf16.mxu1 %v9197_v49 }
 0x53c   :  { %v4237_v25 = vpop.f32.mrb[220].mxu1 }
 0x53d   :  { %v4239_v59 = vpop.f32.mrb[221].mxu1 }
 0x53e   :  { %v4240_v36 = vpop.f32.mrb[222].mxu1 }
 0x53f   :  { %v4653_v9 = vpack.c.bf16 %v4240_v36, %v4237_v25  ;;  %v4242_v40 = vpop.f32.mrb[223].mxu1  ;;  %v9207_v36 = vld [vmem:[#allocation54_spill] sm:$0xff] }
 0x541   :  { %v8590_v6 = vmax.bf16 %v4653_v9, %v4650_v53  ;;  %4452 = vmatmul.mubr.bf16.gmra.mrb[72].mxu1 %v9198_v57  ;;  %v5849_v53 = vld [vmem:[%s8810_s8 + $0x44] ss:$8 sps:$4 sm:$0xff]  }
 0x542   :  { %4459 = vmatprep.mubr.bf16.mxu1 %v8408_v21  ;;  %4877 = vmatprep.subr.bf16.mxu0 %v5849_v53 }
 0x543   :  { %v4734_v12 = vmax.bf16 %v8590_v6, %v8566_v13  ;;  %4878 = vmatpush1.bf16.msra.mxu0 %v5847_v39 }
 0x544   :  { %v4245_v35 = vpop.f32.mrb[224].mxu1 }
 0x545   :  { %v4247_v37 = vpop.f32.mrb[225].mxu1 }
 0x546   :  { %v4248_v3 = vpop.f32.mrb[226].mxu1 }
 0x547   :  { %v4654_v61 = vpack.c.bf16 %v4248_v3, %v4245_v35  ;;  %v4250_v45 = vpop.f32.mrb[227].mxu1 }
 0x549   :  { %v8596_v58 = vmax.bf16 %v4654_v61, %v4651_v10  ;;  %4460 = vmatmul.mubr.bf16.gmra.mrb[76].mxu1 %v9199_v55 }
 0x54a   :  { %4467 = vmatprep.mubr.bf16.mxu1 %v9200_v11 }
 0x54b   :  { %v4735_v38 = vmax.bf16 %v8596_v58, %v8570_v16 }
 0x54c   :  { %v4253_v18 = vpop.f32.mrb[228].mxu1 }
 0x54d   :  { %v4255_v33 = vpop.f32.mrb[229].mxu1 }
 0x54e   :  { %v4256_v21 = vpop.f32.mrb[230].mxu1 }
 0x54f   :  { %v4655_v26 = vpack.c.bf16 %v4256_v21, %v4253_v18  ;;  %v4258_v28 = vpop.f32.mrb[231].mxu1 }
 0x551   :  { %v8602_v15 = vmax.bf16 %v4655_v26, %v4652_v60  ;;  %4468 = vmatmul.mubr.bf16.gmra.mrb[80].mxu1 %v9201_v31 }
 0x552   :  { %4475 = vmatprep.mubr.bf16.mxu1 %v8434_v19 }
 0x553   :  { %v4736_v17 = vmax.bf16 %v8602_v15, %v8580_v24 }
 0x554   :  { %v4261_v50 = vpop.f32.mrb[232].mxu1 }
 0x555   :  { %v4263_v30 = vpop.f32.mrb[233].mxu1 }
 0x556   :  { %v4264_v2 = vpop.f32.mrb[234].mxu1 }
 0x557   :  { %v4656_v47 = vpack.c.bf16 %v4264_v2, %v4261_v50  ;;  %v4266_v5 = vpop.f32.mrb[235].mxu1 }
 0x559   :  { %4476 = vmatmul.mubr.bf16.gmra.mrb[84].mxu1 %v8438_v22  ;;  %v9204_v22 = vld [vmem:[#allocation51_spill] sm:$0xff] }
 0x55a   :  { %4483 = vmatprep.mubr.bf16.mxu1 %v9202_v44 }
 0x55c   :  { %v4269_v19 = vpop.f32.mrb[236].mxu1 }
 0x55d   :  { %v4271_v7 = vpop.f32.mrb[237].mxu1 }
 0x55e   :  { %v4272_v20 = vpop.f32.mrb[238].mxu1 }
 0x55f   :  { %v4657_v0 = vpack.c.bf16 %v4272_v20, %v4269_v19  ;;  %v4274_v41 = vpop.f32.mrb[239].mxu1 }
 0x560   :  { %v9210_v41 = vld [vmem:[#allocation4_spill] sm:$0xff] }
 0x561   :  { %4484 = vmatmul.mubr.bf16.gmra.mrb[88].mxu1 %v9203_v54 }
 0x562   :  { %4491 = vmatprep.mubr.bf16.mxu1 %v9204_v22 }
 0x564   :  { %v4277_v10 = vpop.f32.mrb[240].mxu1 }
 0x565   :  { %v4279_v14 = vpop.f32.mrb[241].mxu1 }
 0x566   :  { %v4280_v32 = vpop.f32.mrb[242].mxu1 }
 0x567   :  { %v4658_v62 = vpack.c.bf16 %v4280_v32, %v4277_v10  ;;  %v4282_v1 = vpop.f32.mrb[243].mxu1 }
 0x569   :  { %4492 = vmatmul.mubr.bf16.gmra.mrb[92].mxu1 %v9205_v29  ;;  %v9211_v29 = vld [vmem:[#allocation3_spill] sm:$0xff] }
 0x56a   :  { %4499 = vmatprep.mubr.bf16.mxu1 %v9206_v4  ;;  %v9212_v4 = vld [vmem:[#allocation5_spill] sm:$0xff] }
 0x56c   :  { %v4285_v60 = vpop.f32.mrb[244].mxu1 }
 0x56d   :  { %v4287_v34 = vpop.f32.mrb[245].mxu1 }
 0x56e   :  { %v4288_v27 = vpop.f32.mrb[246].mxu1 }
 0x56f   :  { %v4659_v49 = vpack.c.bf16 %v4288_v27, %v4285_v60  ;;  %v4290_v25 = vpop.f32.mrb[247].mxu1 }
 0x571   :  { %v4710_v59 = vmax.bf16 %v4659_v49, %v4656_v47  ;;  %4500 = vmatmul.mubr.bf16.gmra.mrb[96].mxu1 %v9207_v36  ;;  %v9214_v36 = vld [vmem:[#allocation8_spill] sm:$0xff] }
 0x572   :  { %4507 = vmatprep.mubr.bf16.mxu1 %v8490_v52 }
 0x574   :  { %v4293_v9 = vpop.f32.mrb[248].mxu1 }
 0x575   :  { %v4295_v40 = vpop.f32.mrb[249].mxu1 }
 0x576   :  { %v4296_v57 = vpop.f32.mrb[250].mxu1 }
 0x577   :  { %v4660_v35 = vpack.c.bf16 %v4296_v57, %v4293_v9  ;;  %v4298_v37 = vpop.f32.mrb[251].mxu1 }
 0x578   :  { %v9215_v37 = vld [vmem:[#allocation6_spill] sm:$0xff] }
 0x579   :  { %v4711_v3 = vmax.bf16 %v4660_v35, %v4657_v0  ;;  %4508 = vmatmul.mubr.bf16.gmra.mrb[100].mxu1 %v8494_v63  ;;  %v9209_v0 = vld [vmem:[#allocation10_spill] sm:$0xff] }
 0x57a   :  { %4515 = vmatprep.mubr.bf16.mxu1 %v8498_v8 }
 0x57c   :  { %v4301_v61 = vpop.f32.mrb[252].mxu1 }
 0x57d   :  { %v4303_v45 = vpop.f32.mrb[253].mxu1 }
 0x57e   :  { %v4304_v55 = vpop.f32.mrb[254].mxu1 }
 0x57f   :  { %v4661_v11 = vpack.c.bf16 %v4304_v55, %v4301_v61  ;;  %v4306_v18 = vpop.f32.mrb[255].mxu1 }
 0x581   :  { %v4712_v33 = vmax.bf16 %v4661_v11, %v4658_v62  ;;  %4516 = vmatmul.mubr.bf16.gmra.mrb[104].mxu1 %v8505_v42  ;;  %v5850_v42 = vld [vmem:[%s8810_s8 + $0x50] ss:$8 sps:$4 sm:$0xff]  }
 0x582   :  { %4523 = vmatprep.mubr.bf16.mxu1 %v8516_v23  ;;  %v5852_v23 = vld [vmem:[%s8810_s8 + $0x54] ss:$8 sps:$4 sm:$0xff]  }
 0x583   :  { %4879 = vmatprep.subr.bf16.mxu0 %v5852_v23  ;;  %v5855_v23 = vld [vmem:[%s8810_s8 + $0x64] ss:$8 sps:$4 sm:$0xff]  }
 0x584   :  { %v4309_v52 = vpop.f32.mrb[0].mxu1  ;;  %4880 = vmatpush1.bf16.msra.mxu0 %v5850_v42  ;;  %v5853_v42 = vld [vmem:[%s8810_s8 + $0x60] ss:$8 sps:$4 sm:$0xff]  }
 0x585   :  { %v4311_v21 = vpop.f32.mrb[1].mxu1  ;;  %4881 = vmatprep.subr.bf16.mxu0 %v5855_v23 }
 0x586   :  { %v4312_v26 = vpop.f32.mrb[2].mxu1 }
 0x587   :  { %v4662_v28 = vpack.c.bf16 %v4312_v26, %v4309_v52  ;;  %v4314_v31 = vpop.f32.mrb[3].mxu1  ;;  %v9218_v52 = vld [vmem:[#allocation18_spill] sm:$0xff] }
 0x588   :  { %v9220_v31 = vld [vmem:[#allocation23_spill] sm:$0xff]  ;;  %4882 = vmatpush1.bf16.msra.mxu0 %v5853_v42 }
 0x589   :  { %4524 = vmatmul.mubr.bf16.gmra.mrb[108].mxu1 %v8520_v51 }
 0x58a   :  { %4531 = vmatprep.mubr.bf16.mxu1 %v8524_v43 }
 0x58c   :  { %v4317_v63 = vpop.f32.mrb[4].mxu1 }
 0x58d   :  { %v4319_v8 = vpop.f32.mrb[5].mxu1 }
 0x58e   :  { %v4320_v50 = vpop.f32.mrb[6].mxu1 }
 0x58f   :  { %v4663_v30 = vpack.c.bf16 %v4320_v50, %v4317_v63  ;;  %v4322_v2 = vpop.f32.mrb[7].mxu1 }
 0x591   :  { %4532 = vmatmul.mubr.bf16.gmra.mrb[112].mxu1 %v8530_v48  ;;  %v9208_v48 = vld [vmem:[#allocation2_spill] sm:$0xff] }
 0x592   :  { %4539 = vmatprep.mubr.bf16.mxu1 %v8532_v56 }
 0x594   :  { %v4325_v51 = vpop.f32.mrb[8].mxu1 }
 0x595   :  { %v4327_v47 = vpop.f32.mrb[9].mxu1 }
 0x596   :  { %v4328_v43 = vpop.f32.mrb[10].mxu1  ;;  %v9221_v47 = vld [vmem:[#allocation21_spill] sm:$0xff] }
 0x597   :  { %v4664_v5 = vpack.c.bf16 %v4328_v43, %v4325_v51  ;;  %v4330_v39 = vpop.f32.mrb[11].mxu1  ;;  %v9222_v43 = vld [vmem:[#allocation22_spill] sm:$0xff] }
 0x599   :  { %4540 = vmatmul.mubr.bf16.gmra.mrb[116].mxu1 %v8535_v46 }
 0x59a   :  { %4547 = vmatprep.mubr.bf16.mxu1 %v9208_v48 }
 0x59c   :  { %v4333_v56 = vpop.f32.mrb[12].mxu1 }
 0x59d   :  { %v4335_v53 = vpop.f32.mrb[13].mxu1 }
 0x59e   :  { %v4336_v44 = vpop.f32.mrb[14].mxu1 }
 0x59f   :  { %v4665_v19 = vpack.c.bf16 %v4336_v44, %v4333_v56  ;;  %v4338_v7 = vpop.f32.mrb[15].mxu1 }
 0x5a0   :  { %v9224_v7 = vld [vmem:[#allocation27_spill] sm:$0xff] }
 0x5a1   :  { %v4713_v20 = vmax.bf16 %v4665_v19, %v4662_v28  ;;  %4548 = vmatmul.mubr.bf16.gmra.mrb[120].mxu1 %v9209_v0  ;;  %v9219_v28 = vld [vmem:[#allocation16_spill] sm:$0xff] }
 0x5a2   :  { %4555 = vmatprep.mubr.bf16.mxu1 %v9210_v41  ;;  %v9223_v19 = vld [vmem:[#allocation20_spill] sm:$0xff] }
 0x5a3   :  { %v4737_v54 = vmax.bf16 %v4713_v20, %v4710_v59  ;;  %v9213_v59 = vld [vmem:[#allocation7_spill] sm:$0xff] }
 0x5a4   :  { %v4341_v22 = vpop.f32.mrb[16].mxu1 }
 0x5a5   :  { %v8643_v10 = vmax.bf16 %v4737_v54, %v4734_v12  ;;  %v4343_v46 = vpop.f32.mrb[17].mxu1 }
 0x5a6   :  { %v4344_v14 = vpop.f32.mrb[18].mxu1 }
 0x5a7   :  { %v4666_v32 = vpack.c.bf16 %v4344_v14, %v4341_v22  ;;  %v4346_v62 = vpop.f32.mrb[19].mxu1  ;;  %v9225_v14 = vld [vmem:[#allocation25_spill] sm:$0xff] }
 0x5a9   :  { %v4714_v1 = vmax.bf16 %v4666_v32, %v4663_v30  ;;  %4556 = vmatmul.mubr.bf16.gmra.mrb[124].mxu1 %v9211_v29  ;;  %v9226_v32 = vld [vmem:[#allocation26_spill] sm:$0xff] }
 0x5aa   :  { %4563 = vmatprep.mubr.bf16.mxu1 %v9212_v4 }
 0x5ab   :  { %v4738_v60 = vmax.bf16 %v4714_v1, %v4711_v3  ;;  %v9216_v3 = vld [vmem:[#allocation12_spill] sm:$0xff] }
 0x5ac   :  { %v4349_v34 = vpop.f32.mrb[20].mxu1 }
 0x5ad   :  { %v8650_v27 = vmax.bf16 %v4738_v60, %v4735_v38  ;;  %v4351_v49 = vpop.f32.mrb[21].mxu1 }
 0x5ae   :  { %v4352_v13 = vpop.f32.mrb[22].mxu1  ;;  %v9228_v49 = vld [vmem:[#allocation31_spill] sm:$0xff] }
 0x5af   :  { %v4667_v6 = vpack.c.bf16 %v4352_v13, %v4349_v34  ;;  %v4354_v12 = vpop.f32.mrb[23].mxu1  ;;  %v9227_v34 = vld [vmem:[#allocation24_spill] sm:$0xff] }
 0x5b1   :  { %v4715_v25 = vmax.bf16 %v4667_v6, %v4664_v5  ;;  %4564 = vmatmul.mubr.bf16.gmra.mrb[128].mxu1 %v9213_v59 }
 0x5b2   :  { %4571 = vmatprep.mubr.bf16.mxu1 %v9214_v36  ;;  %v9229_v36 = vld [vmem:[#allocation29_spill] sm:$0xff] }
 0x5b3   :  { %v4739_v9 = vmax.bf16 %v4715_v25, %v4712_v33  ;;  %v9217_v33 = vld [vmem:[#allocation15_spill] sm:$0xff] }
 0x5b4   :  { %v4357_v40 = vpop.f32.mrb[24].mxu1 }
 0x5b5   :  { %v8657_v57 = vmax.bf16 %v4739_v9, %v4736_v17  ;;  %v4359_v35 = vpop.f32.mrb[25].mxu1  ;;  %v9230_v9 = vld [vmem:[#allocation30_spill] sm:$0xff] }
 0x5b6   :  { %v4360_v16 = vpop.f32.mrb[26].mxu1 }
 0x5b7   :  { %v4668_v58 = vpack.c.bf16 %v4360_v16, %v4357_v40  ;;  %v4362_v38 = vpop.f32.mrb[27].mxu1 }
 0x5b9   :  { %4572 = vmatmul.mubr.bf16.gmra.mrb[132].mxu1 %v9215_v37  ;;  %v9231_v37 = vld [vmem:[#allocation28_spill] sm:$0xff] }
 0x5ba   :  { %4579 = vmatprep.mubr.bf16.mxu1 %v9216_v3 }
 0x5bc   :  { %v4365_v61 = vpop.f32.mrb[28].mxu1 }
 0x5bd   :  { %v4367_v45 = vpop.f32.mrb[29].mxu1 }
 0x5be   :  { %v4368_v55 = vpop.f32.mrb[30].mxu1 }
 0x5bf   :  { %v4669_v11 = vpack.c.bf16 %v4368_v55, %v4365_v61  ;;  %v4370_v18 = vpop.f32.mrb[31].mxu1 }
 0x5c1   :  { %4580 = vmatmul.mubr.bf16.gmra.mrb[136].mxu1 %v9217_v33 }
 0x5c2   :  { %4587 = vmatprep.mubr.bf16.mxu1 %v9218_v52 }
 0x5c4   :  { %v4373_v24 = vpop.f32.mrb[32].mxu1 }
 0x5c5   :  { %v4375_v15 = vpop.f32.mrb[33].mxu1 }
 0x5c6   :  { %v4376_v17 = vpop.f32.mrb[34].mxu1 }
 0x5c7   :  { %v4670_v21 = vpack.c.bf16 %v4376_v17, %v4373_v24  ;;  %v4378_v26 = vpop.f32.mrb[35].mxu1 }
 0x5c8   :  { %v5856_v26 = vld [vmem:[%s8810_s8 + $0x70] ss:$8 sps:$4 sm:$0xff]  }
 0x5c9   :  { %4588 = vmatmul.mubr.bf16.gmra.mrb[140].mxu1 %v9219_v28  ;;  %v5858_v28 = vld [vmem:[%s8810_s8 + $0x74] ss:$8 sps:$4 sm:$0xff]  }
 0x5ca   :  { %4595 = vmatprep.mubr.bf16.mxu1 %v9220_v31  ;;  %4883 = vmatprep.subr.bf16.mxu0 %v5858_v28 }
 0x5cb   :  { %4884 = vmatpush1.bf16.msra.mxu0 %v5856_v26 }
 0x5cc   :  { %v4381_v63 = vpop.f32.mrb[36].mxu1 }
 0x5cd   :  { %v4383_v8 = vpop.f32.mrb[37].mxu1 }
 0x5ce   :  { %v4384_v50 = vpop.f32.mrb[38].mxu1 }
 0x5cf   :  { %v4671_v30 = vpack.c.bf16 %v4384_v50, %v4381_v63  ;;  %v4386_v2 = vpop.f32.mrb[39].mxu1 }
 0x5d1   :  { %v8671_v51 = vmax.bf16 %v4671_v30, %v4668_v58  ;;  %4596 = vmatmul.mubr.bf16.gmra.mrb[144].mxu1 %v9221_v47 }
 0x5d2   :  { %4603 = vmatprep.mubr.bf16.mxu1 %v9222_v43 }
 0x5d4   :  { %v4389_v5 = vpop.f32.mrb[40].mxu1 }
 0x5d5   :  { %v4391_v39 = vpop.f32.mrb[41].mxu1 }
 0x5d6   :  { %v4392_v48 = vpop.f32.mrb[42].mxu1 }
 0x5d7   :  { %v4672_v56 = vpack.c.bf16 %v4392_v48, %v4389_v5  ;;  %v4394_v53 = vpop.f32.mrb[43].mxu1 }
 0x5d9   :  { %v8675_v44 = vmax.bf16 %v4672_v56, %v4669_v11  ;;  %4604 = vmatmul.mubr.bf16.gmra.mrb[148].mxu1 %v9223_v19 }
 0x5da   :  { %4611 = vmatprep.mubr.bf16.mxu1 %v9224_v7 }
 0x5dc   :  { %v4397_v20 = vpop.f32.mrb[44].mxu1 }
 0x5dd   :  { %v4399_v0 = vpop.f32.mrb[45].mxu1 }
 0x5de   :  { %v4400_v41 = vpop.f32.mrb[46].mxu1 }
 0x5df   :  { %v4673_v54 = vpack.c.bf16 %v4400_v41, %v4397_v20  ;;  %v4402_v22 = vpop.f32.mrb[47].mxu1 }
 0x5e1   :  { %v8679_v46 = vmax.bf16 %v4673_v54, %v4670_v21  ;;  %4612 = vmatmul.mubr.bf16.gmra.mrb[152].mxu1 %v9225_v14 }
 0x5e2   :  { %4619 = vmatprep.mubr.bf16.mxu1 %v9226_v32 }
 0x5e4   :  { %v4405_v62 = vpop.f32.mrb[48].mxu1 }
 0x5e5   :  { %v4407_v1 = vpop.f32.mrb[49].mxu1 }
 0x5e6   :  { %v4408_v29 = vpop.f32.mrb[50].mxu1 }
 0x5e7   :  { %v4674_v4 = vpack.c.bf16 %v4408_v29, %v4405_v62  ;;  %v4410_v60 = vpop.f32.mrb[51].mxu1 }
 0x5e9   :  { %4620 = vmatmul.mubr.bf16.gmra.mrb[156].mxu1 %v9227_v34 }
 0x5ea   :  { %4627 = vmatprep.mubr.bf16.mxu1 %v9228_v49 }
 0x5ec   :  { %v4413_v13 = vpop.f32.mrb[52].mxu1 }
 0x5ed   :  { %v4415_v6 = vpop.f32.mrb[53].mxu1 }
 0x5ee   :  { %v4416_v12 = vpop.f32.mrb[54].mxu1 }
 0x5ef   :  { %v4675_v25 = vpack.c.bf16 %v4416_v12, %v4413_v13  ;;  %v4418_v59 = vpop.f32.mrb[55].mxu1 }
 0x5f1   :  { %4628 = vmatmul.mubr.bf16.gmra.mrb[160].mxu1 %v9229_v36 }
 0x5f2   :  { %4635 = vmatprep.mubr.bf16.mxu1 %v9230_v9 }
 0x5f4   :  { %v4421_v40 = vpop.f32.mrb[56].mxu1 }
 0x5f5   :  { %v4423_v35 = vpop.f32.mrb[57].mxu1 }
 0x5f6   :  { %v4424_v16 = vpop.f32.mrb[58].mxu1 }
 0x5f7   :  { %v4676_v58 = vpack.c.bf16 %v4424_v16, %v4421_v40  ;;  %v4426_v38 = vpop.f32.mrb[59].mxu1 }
 0x5f9   :  { %4636 = vmatmul.mubr.bf16.gmra.mrb[164].mxu1 %v9231_v37 }
 0x5fc   :  { %v4429_v3 = vpop.f32.mrb[60].mxu1 }
 0x5fd   :  { %v4431_v61 = vpop.f32.mrb[61].mxu1 }
 0x5fe   :  { %v4432_v45 = vpop.f32.mrb[62].mxu1 }
 0x5ff   :  { %v4677_v55 = vpack.c.bf16 %v4432_v45, %v4429_v3  ;;  %v4434_v11 = vpop.f32.mrb[63].mxu1 }
 0x601   :  { %v8688_v18 = vmax.bf16 %v4677_v55, %v4674_v4 }
 0x603   :  { %v4740_v33 = vmax.bf16 %v8688_v18, %v8671_v51 }
 0x604   :  { %v4437_v52 = vpop.f32.mrb[64].mxu1 }
 0x605   :  { %v4439_v24 = vpop.f32.mrb[65].mxu1 }
 0x606   :  { %v4440_v15 = vpop.f32.mrb[66].mxu1 }
 0x607   :  { %v4678_v17 = vpack.c.bf16 %v4440_v15, %v4437_v52  ;;  %v4442_v21 = vpop.f32.mrb[67].mxu1 }
 0x609   :  { %v8698_v31 = vmax.bf16 %v4678_v17, %v4675_v25 }
 0x60b   :  { %v4741_v63 = vmax.bf16 %v8698_v31, %v8675_v44 }
 0x60c   :  { %v4445_v8 = vpop.f32.mrb[68].mxu1 }
 0x60d   :  { %v4447_v50 = vpop.f32.mrb[69].mxu1 }
 0x60e   :  { %v4448_v30 = vpop.f32.mrb[70].mxu1  ;;  %v5859_v50 = vld [vmem:[%s8811_s10 + $0x40] sm:$0xff]  }
 0x60f   :  { %v4679_v2 = vpack.c.bf16 %v4448_v30, %v4445_v8  ;;  %v4450_v42 = vpop.f32.mrb[71].mxu1  ;;  %5465 = vmatprep.subr.bf16.mxu0 %v5859_v50 }
 0x611   :  { %v8702_v23 = vmax.bf16 %v4679_v2, %v4676_v58 }
 0x613   :  { %v4742_v47 = vmax.bf16 %v8702_v23, %v8679_v46 }
 0x614   :  { %v4453_v43 = vpop.f32.mrb[72].mxu1 }
 0x615   :  { %v4455_v5 = vpop.f32.mrb[73].mxu1 }
 0x616   :  { %v4456_v39 = vpop.f32.mrb[74].mxu1 }
 0x617   :  { %v4680_v48 = vpack.c.bf16 %v4456_v39, %v4453_v43  ;;  %v4458_v56 = vpop.f32.mrb[75].mxu1 }
 0x61c   :  { %v4461_v53 = vpop.f32.mrb[76].mxu1 }
 0x61d   :  { %v4463_v19 = vpop.f32.mrb[77].mxu1 }
 0x61e   :  { %v4464_v7 = vpop.f32.mrb[78].mxu1 }
 0x61f   :  { %v4681_v20 = vpack.c.bf16 %v4464_v7, %v4461_v53  ;;  %v4466_v0 = vpop.f32.mrb[79].mxu1 }
 0x624   :  { %v4469_v41 = vpop.f32.mrb[80].mxu1 }
 0x625   :  { %v4471_v54 = vpop.f32.mrb[81].mxu1 }
 0x626   :  { %v4472_v22 = vpop.f32.mrb[82].mxu1 }
 0x627   :  { %v4682_v14 = vpack.c.bf16 %v4472_v22, %v4469_v41  ;;  %v4474_v32 = vpop.f32.mrb[83].mxu1 }
 0x62c   :  { %v4477_v62 = vpop.f32.mrb[84].mxu1 }
 0x62d   :  { %v4479_v1 = vpop.f32.mrb[85].mxu1 }
 0x62e   :  { %v4480_v29 = vpop.f32.mrb[86].mxu1 }
 0x62f   :  { %v4683_v4 = vpack.c.bf16 %v4480_v29, %v4477_v62  ;;  %v4482_v60 = vpop.f32.mrb[87].mxu1 }
 0x631   :  { %v4722_v34 = vmax.bf16 %v4683_v4, %v4680_v48 }
 0x634   :  { %v4485_v49 = vpop.f32.mrb[88].mxu1 }
 0x635   :  { %v4487_v13 = vpop.f32.mrb[89].mxu1 }
 0x636   :  { %v4488_v6 = vpop.f32.mrb[90].mxu1 }
 0x637   :  { %v4684_v12 = vpack.c.bf16 %v4488_v6, %v4485_v49  ;;  %v4490_v25 = vpop.f32.mrb[91].mxu1 }
 0x639   :  { %v4723_v59 = vmax.bf16 %v4684_v12, %v4681_v20 }
 0x63c   :  { %v4493_v36 = vpop.f32.mrb[92].mxu1 }
 0x63d   :  { %v4495_v9 = vpop.f32.mrb[93].mxu1 }
 0x63e   :  { %v4496_v40 = vpop.f32.mrb[94].mxu1 }
 0x63f   :  { %v4685_v35 = vpack.c.bf16 %v4496_v40, %v4493_v36  ;;  %v4498_v16 = vpop.f32.mrb[95].mxu1 }
 0x641   :  { %v4724_v58 = vmax.bf16 %v4685_v35, %v4682_v14 }
 0x644   :  { %v4501_v38 = vpop.f32.mrb[96].mxu1 }
 0x645   :  { %v4503_v37 = vpop.f32.mrb[97].mxu1 }
 0x646   :  { %v4504_v3 = vpop.f32.mrb[98].mxu1 }
 0x647   :  { %v4686_v61 = vpack.c.bf16 %v4504_v3, %v4501_v38  ;;  %v4506_v45 = vpop.f32.mrb[99].mxu1 }
 0x64c   :  { %v4509_v55 = vpop.f32.mrb[100].mxu1 }
 0x64d   :  { %v4511_v11 = vpop.f32.mrb[101].mxu1 }
 0x64e   :  { %v4512_v52 = vpop.f32.mrb[102].mxu1 }
 0x64f   :  { %v4687_v24 = vpack.c.bf16 %v4512_v52, %v4509_v55  ;;  %v4514_v15 = vpop.f32.mrb[103].mxu1 }
 0x654   :  { %v4517_v17 = vpop.f32.mrb[104].mxu1 }
 0x655   :  { %v4519_v21 = vpop.f32.mrb[105].mxu1 }
 0x656   :  { %v4520_v26 = vpop.f32.mrb[106].mxu1 }
 0x657   :  { %v4688_v28 = vpack.c.bf16 %v4520_v26, %v4517_v17  ;;  %v4522_v8 = vpop.f32.mrb[107].mxu1 }
 0x65c   :  { %v4525_v30 = vpop.f32.mrb[108].mxu1 }
 0x65d   :  { %v4527_v2 = vpop.f32.mrb[109].mxu1 }
 0x65e   :  { %v4528_v42 = vpop.f32.mrb[110].mxu1 }
 0x65f   :  { %v4689_v43 = vpack.c.bf16 %v4528_v42, %v4525_v30  ;;  %v4530_v5 = vpop.f32.mrb[111].mxu1 }
 0x661   :  { %v4725_v39 = vmax.bf16 %v4689_v43, %v4686_v61 }
 0x663   :  { %v4743_v48 = vmax.bf16 %v4725_v39, %v4722_v34 }
 0x664   :  { %v4533_v56 = vpop.f32.mrb[112].mxu1 }
 0x665   :  { %v8712_v53 = vmax.bf16 %v4743_v48, %v4740_v33  ;;  %v4535_v19 = vpop.f32.mrb[113].mxu1 }
 0x666   :  { %v4536_v7 = vpop.f32.mrb[114].mxu1 }
 0x667   :  { %v4690_v20 = vpack.c.bf16 %v4536_v7, %v4533_v56  ;;  %v4538_v0 = vpop.f32.mrb[115].mxu1  ;;  %v4755_v41 = vmax.bf16 %v8712_v53, %v8643_v10  ;;  %v5863_v10 = vld [vmem:[%s8811_s10 + $0x50] sm:$0xff]  }
 0x669   :  { %v4726_v54 = vmax.bf16 %v4690_v20, %v4687_v24 }
 0x66b   :  { %v4744_v22 = vmax.bf16 %v4726_v54, %v4723_v59 }
 0x66c   :  { %v4541_v14 = vpop.f32.mrb[116].mxu1 }
 0x66d   :  { %v8719_v32 = vmax.bf16 %v4744_v22, %v4741_v63  ;;  %v4543_v62 = vpop.f32.mrb[117].mxu1 }
 0x66e   :  { %v4544_v1 = vpop.f32.mrb[118].mxu1 }
 0x66f   :  { %v4691_v51 = vpack.c.bf16 %v4544_v1, %v4541_v14  ;;  %v4546_v18 = vpop.f32.mrb[119].mxu1  ;;  %v4756_v33 = vmax.bf16 %v8719_v32, %v8650_v27  ;;  %v5867_v27 = vld [vmem:[%s8811_s10 + $0x60] sm:$0xff]  }
 0x671   :  { %v4727_v29 = vmax.bf16 %v4691_v51, %v4688_v28 }
 0x673   :  { %v4745_v4 = vmax.bf16 %v4727_v29, %v4724_v58 }
 0x674   :  { %v4549_v60 = vpop.f32.mrb[120].mxu1 }
 0x675   :  { %v8726_v34 = vmax.bf16 %v4745_v4, %v4742_v47  ;;  %v4551_v49 = vpop.f32.mrb[121].mxu1 }
 0x676   :  { %v4552_v13 = vpop.f32.mrb[122].mxu1  ;;  %v5860_v49 = vld [vmem:[%s8811_s10] sm:$0xff]  }
 0x677   :  { %v4692_v44 = vpack.c.bf16 %v4552_v13, %v4549_v60  ;;  %v4554_v31 = vpop.f32.mrb[123].mxu1  ;;  %v4757_v63 = vmax.bf16 %v8726_v34, %v8657_v57  ;;  %v5872_v57 = vld [vmem:[%s8811_s10 + $0x30] sm:$0xff]   ;;  %v5873_v34 = vld [vmem:[%s8811_s10 + $0x78] sm:$0xff]  }
 0x678   :  { %v5861_v31 = vld [vmem:[%s8811_s10 + $0x48] sm:$0xff]  }
 0x67c   :  { %v4557_v6 = vpop.f32.mrb[124].mxu1 }
 0x67d   :  { %v4559_v12 = vpop.f32.mrb[125].mxu1 }
 0x67e   :  { %v4560_v25 = vpop.f32.mrb[126].mxu1 }
 0x67f   :  { %v4693_v59 = vpack.c.bf16 %v4560_v25, %v4557_v6  ;;  %v4562_v36 = vpop.f32.mrb[127].mxu1 }
 0x680   :  { %v5862_v36 = vld [vmem:[%s8811_s10 + $0x8] sm:$0xff]  }
 0x684   :  { %v4565_v9 = vpop.f32.mrb[128].mxu1 }
 0x685   :  { %v4567_v40 = vpop.f32.mrb[129].mxu1 }
 0x686   :  { %v4568_v35 = vpop.f32.mrb[130].mxu1  ;;  %v5864_v40 = vld [vmem:[%s8811_s10 + $0x10] sm:$0xff]  }
 0x687   :  { %v4694_v16 = vpack.c.bf16 %v4568_v35, %v4565_v9  ;;  %v4570_v58 = vpop.f32.mrb[131].mxu1 }
 0x688   :  { %v5865_v58 = vld [vmem:[%s8811_s10 + $0x58] sm:$0xff]  }
 0x68c   :  { %v4573_v46 = vpop.f32.mrb[132].mxu1 }
 0x68d   :  { %v4575_v23 = vpop.f32.mrb[133].mxu1 }
 0x68e   :  { %v4576_v47 = vpop.f32.mrb[134].mxu1 }
 0x68f   :  { %v4695_v38 = vpack.c.bf16 %v4576_v47, %v4573_v46  ;;  %v4578_v37 = vpop.f32.mrb[135].mxu1 }
 0x691   :  { %v4728_v3 = vmax.bf16 %v4695_v38, %v4692_v44  ;;  %v5866_v38 = vld [vmem:[%s8811_s10 + $0x18] sm:$0xff]  }
 0x694   :  { %v4581_v61 = vpop.f32.mrb[136].mxu1 }
 0x695   :  { %v4583_v45 = vpop.f32.mrb[137].mxu1 }
 0x696   :  { %v4584_v55 = vpop.f32.mrb[138].mxu1  ;;  %v5870_v45 = vld [vmem:[%s8811_s10 + $0x28] sm:$0xff]  }
 0x697   :  { %v4696_v11 = vpack.c.bf16 %v4584_v55, %v4581_v61  ;;  %v4586_v52 = vpop.f32.mrb[139].mxu1  ;;  %v5869_v61 = vld [vmem:[%s8811_s10 + $0x68] sm:$0xff]   ;;  %v5871_v55 = vld [vmem:[%s8811_s10 + $0x70] sm:$0xff]  }
 0x698   :  { %v9233_v52 = vld [vmem:[#allocation143_spill] sm:$0xff] }
 0x699   :  { %v4729_v24 = vmax.bf16 %v4696_v11, %v4693_v59  ;;  %v9232_v59 = vmov 0   ;;  %v4777_v11 = vld [vmem:[%s8812_s9] sm:$0x3] }
 0x69c   :  { %v4589_v15 = vpop.f32.mrb[140].mxu1 }
 0x69d   :  { %v4591_v17 = vpop.f32.mrb[141].mxu1 }
 0x69e   :  { %v4592_v21 = vpop.f32.mrb[142].mxu1  ;;  %v9235_v17 = vsub.s32 1, %v9233_v52 }
 0x69f   :  { %v4697_v26 = vpack.c.bf16 %v4592_v21, %v4589_v15  ;;  %v4594_v28 = vpop.f32.mrb[143].mxu1 }
 0x6a0   :  { %v4786_v21 = vrot.slane %v4777_v11, %v9235_v17 }
 0x6a1   :  { %v4730_v8 = vmax.bf16 %v4697_v26, %v4694_v16 }
 0x6a4   :  { %v4597_v50 = vpop.f32.mrb[144].mxu1 }
 0x6a5   :  { %v4599_v30 = vpop.f32.mrb[145].mxu1 }
 0x6a6   :  { %v4600_v2 = vpop.f32.mrb[146].mxu1 }
 0x6a7   :  { %v4698_v42 = vpack.c.bf16 %v4600_v2, %v4597_v50  ;;  %v4602_v43 = vpop.f32.mrb[147].mxu1 }
 0x6ac   :  { %v4605_v5 = vpop.f32.mrb[148].mxu1 }
 0x6ad   :  { %v4607_v39 = vpop.f32.mrb[149].mxu1 }
 0x6ae   :  { %v4608_v48 = vpop.f32.mrb[150].mxu1 }
 0x6af   :  { %v4699_v56 = vpack.c.bf16 %v4608_v48, %v4605_v5  ;;  %v4610_v19 = vpop.f32.mrb[151].mxu1 }
 0x6b4   :  { %v4613_v7 = vpop.f32.mrb[152].mxu1 }
 0x6b5   :  { %v4615_v20 = vpop.f32.mrb[153].mxu1 }
 0x6b6   :  { %v4616_v0 = vpop.f32.mrb[154].mxu1 }
 0x6b7   :  { %v4700_v54 = vpack.c.bf16 %v4616_v0, %v4613_v7  ;;  %v4618_v22 = vpop.f32.mrb[155].mxu1 }
 0x6bc   :  { %v4621_v14 = vpop.f32.mrb[156].mxu1 }
 0x6bd   :  { %v4623_v62 = vpop.f32.mrb[157].mxu1 }
 0x6be   :  { %v4624_v1 = vpop.f32.mrb[158].mxu1 }
 0x6bf   :  { %v4701_v51 = vpack.c.bf16 %v4624_v1, %v4621_v14  ;;  %v4626_v18 = vpop.f32.mrb[159].mxu1 }
 0x6c1   :  { %v4731_v29 = vmax.bf16 %v4701_v51, %v4698_v42 }
 0x6c3   :  { %v4746_v4 = vmax.bf16 %v4731_v29, %v4728_v3 }
 0x6c4   :  { %v4629_v60 = vpop.f32.mrb[160].mxu1 }
 0x6c5   :  { %v4758_v13 = vmax.bf16 %v4755_v41, %v4746_v4  ;;  %v4631_v44 = vpop.f32.mrb[161].mxu1 }
 0x6c6   :  { %v4632_v6 = vpop.f32.mrb[162].mxu1 }
 0x6c7   :  { %v4702_v12 = vpack.c.bf16 %v4632_v6, %v4629_v60  ;;  %v4634_v25 = vpop.f32.mrb[163].mxu1  ;;  %4902 = vmatmul.mubr.bf16.vlgmr.msra.gmra.mrb[172].mxu0 %v4758_v13 }
 0x6c8   :  { %4911 = vmatprep.mubr.bf16.mxu0 %v9232_v59  ;;  %5466 = vmatpush3.bf16.msra.mxu0 %v5860_v49 }
 0x6c9   :  { %v4732_v9 = vmax.bf16 %v4702_v12, %v4699_v56  ;;  %5467 = vmatprep.subr.bf16.mxu0 %v5861_v31 }
 0x6cb   :  { %v4747_v53 = vmax.bf16 %v4732_v9, %v4729_v24  ;;  %v9234_v24 = vsub.s32 0, %v9233_v52 }
 0x6cc   :  { %v4637_v41 = vpop.f32.mrb[164].mxu1  ;;  %5468 = vmatpush3.bf16.msra.mxu0 %v5862_v36 }
 0x6cd   :  { %v4759_v35 = vmax.bf16 %v4756_v33, %v4747_v53  ;;  %v4639_v16 = vpop.f32.mrb[165].mxu1  ;;  %5469 = vmatprep.subr.bf16.mxu0 %v5863_v10  ;;  %v5868_v33 = vld [vmem:[%s8811_s10 + $0x20] sm:$0xff]   ;;  %v4782_v15 = vrot.slane %v4777_v11, %v9234_v24 }
 0x6ce   :  { %v4640_v46 = vpop.f32.mrb[166].mxu1  ;;  %v5403_v24 = vld [vmem:[%s8813_s11] ss:$0 sm:$0xff] }
 0x6cf   :  { %v4703_v23 = vpack.c.bf16 %v4640_v46, %v4637_v41  ;;  %v4642_v47 = vpop.f32.mrb[167].mxu1  ;;  %4912 = vmatmul.mubr.bf16.gmra.mrb[176].mxu0 %v4759_v35 }
 0x6d0   :  { %4921 = vmatprep.mubr.bf16.mxu0 %v9232_v59  ;;  %5470 = vmatpush3.bf16.msra.mxu0 %v5864_v40 }
 0x6d1   :  { %v4733_v37 = vmax.bf16 %v4703_v23, %v4700_v54  ;;  %5471 = vmatprep.subr.bf16.mxu0 %v5865_v58 }
 0x6d3   :  { %v4748_v32 = vmax.bf16 %v4733_v37, %v4730_v8 }
 0x6d4   :  { %5472 = vmatpush3.bf16.msra.mxu0 %v5866_v38 }
 0x6d5   :  { %v4760_v3 = vmax.bf16 %v4757_v63, %v4748_v32  ;;  %5473 = vmatprep.subr.bf16.mxu0 %v5867_v27  ;;  %v5874_v63 = vld [vmem:[%s8811_s10 + $0x38] sm:$0xff]  }
 0x6d7   :  { %4922 = vmatmul.mubr.bf16.gmra.mrb[180].mxu0 %v4760_v3 }
 0x6d8   :  { %5474 = vmatpush3.bf16.msra.mxu0 %v5868_v33 }
 0x6d9   :  { %5475 = vmatprep.subr.bf16.mxu0 %v5869_v61 }
 0x6dc   :  { %5476 = vmatpush3.bf16.msra.mxu0 %v5870_v45 }
 0x6dd   :  { %5477 = vmatprep.subr.bf16.mxu0 %v5871_v55 }
 0x6e0   :  { %5478 = vmatpush3.bf16.msra.mxu0 %v5872_v57 }
 0x6e1   :  { %5479 = vmatprep.subr.bf16.mxu0 %v5873_v34 }
 0x6e4   :  { %5480 = vmatpush3.bf16.msra.mxu0 %v5874_v63 }
 0x79a   :  { %v4903_v26 = vpop.f32.mrb[172].mxu0 }
 0x79b   :  { %v4904_v28 = vadd.f32 %v4903_v26, %v4782_v15  ;;  %v4905_v8 = vpop.f32.mrb[173].mxu0 }
 0x79c   :  { %v4906_v50 = vadd.f32 %v4905_v8, %v4786_v21  ;;  %v4907_v30 = vpop.f32.mrb[174].mxu0 }
 0x79d   :  { %v4908_v2 = vadd.f32 %v4907_v30, %v4782_v15  ;;  %v4909_v42 = vpop.f32.mrb[175].mxu0  ;;  %v4932_v5 = vmax.f32 %v4904_v28, 0.0 }
 0x79e   :  { %v4910_v43 = vadd.f32 %v4909_v42, %v4786_v21  ;;  %v4933_v48 = vmax.f32 %v4906_v50, 0.0 }
 0x79f   :  { %v4934_v39 = vmax.f32 %v4908_v2, 0.0 }
 0x7a0   :  { %v4935_v56 = vmax.f32 %v4910_v43, 0.0 }
 0x7a1   :  { %v4944_v19 = vpack.c.bf16 %v4934_v39, %v4932_v5 }
 0x7a2   :  { %v4945_v7 = vpack.c.bf16 %v4935_v56, %v4933_v48  ;;  %v4913_v20 = vpop.f32.mrb[176].mxu0 }
 0x7a3   :  { %v4914_v0 = vadd.f32 %v4913_v20, %v4782_v15  ;;  %v4915_v54 = vpop.f32.mrb[177].mxu0 }
 0x7a4   :  { %v4916_v22 = vadd.f32 %v4915_v54, %v4786_v21  ;;  %v4917_v14 = vpop.f32.mrb[178].mxu0  ;;  %5110 = vmatprep.mubr.bf16.mxu0 %v4945_v7 }
 0x7a5   :  { %v4918_v62 = vadd.f32 %v4917_v14, %v4782_v15  ;;  %v4919_v1 = vpop.f32.mrb[179].mxu0  ;;  %5111 = vmatmul.mubr.bf16.vlgmr.msra.gmra.mrb[184].mxu0 %v4944_v19  ;;  %v4936_v18 = vmax.f32 %v4914_v0, 0.0 }
 0x7a6   :  { %v4920_v51 = vadd.f32 %v4919_v1, %v4786_v21  ;;  %v4937_v4 = vmax.f32 %v4916_v22, 0.0 }
 0x7a7   :  { %v4938_v29 = vmax.f32 %v4918_v62, 0.0 }
 0x7a8   :  { %v4939_v60 = vmax.f32 %v4920_v51, 0.0 }
 0x7a9   :  { %v4946_v49 = vpack.c.bf16 %v4938_v29, %v4936_v18 }
 0x7aa   :  { %v4947_v13 = vpack.c.bf16 %v4939_v60, %v4937_v4  ;;  %v4923_v44 = vpop.f32.mrb[180].mxu0 }
 0x7ab   :  { %v4924_v31 = vadd.f32 %v4923_v44, %v4782_v15  ;;  %v4925_v6 = vpop.f32.mrb[181].mxu0 }
 0x7ac   :  { %v4926_v12 = vadd.f32 %v4925_v6, %v4786_v21  ;;  %v4927_v25 = vpop.f32.mrb[182].mxu0  ;;  %5118 = vmatprep.mubr.bf16.mxu0 %v4947_v13 }
 0x7ad   :  { %v4928_v59 = vadd.f32 %v4927_v25, %v4782_v15  ;;  %v4929_v36 = vpop.f32.mrb[183].mxu0  ;;  %5119 = vmatmul.mubr.bf16.gmra.mrb[188].mxu0 %v4946_v49  ;;  %v4940_v10 = vmax.f32 %v4924_v31, 0.0 }
 0x7ae   :  { %v4930_v9 = vadd.f32 %v4929_v36, %v4786_v21  ;;  %v4941_v41 = vmax.f32 %v4926_v12, 0.0 }
 0x7af   :  { %v4942_v53 = vmax.f32 %v4928_v59, 0.0 }
 0x7b0   :  { %v4943_v40 = vmax.f32 %v4930_v9, 0.0 }
 0x7b1   :  { %v4948_v35 = vpack.c.bf16 %v4942_v53, %v4940_v10 }
 0x7b2   :  { %v4949_v16 = vpack.c.bf16 %v4943_v40, %v4941_v41 }
 0x7b4   :  { %5126 = vmatprep.mubr.bf16.mxu0 %v4949_v16 }
 0x7b5   :  { %5127 = vmatmul.mubr.bf16.gmra.mrb[192].mxu0 %v4948_v35 }
 0x878   :  { %v5481_v58 = vpop.f32.mrb[184].mxu0 }
 0x879   :  { %v5482_v46 = vpop.f32.mrb[185].mxu0 }
 0x87a   :  { %v5483_v23 = vadd.f32 %v5482_v46, %v5481_v58  ;;  %v5484_v47 = vpop.f32.mrb[186].mxu0 }
 0x87b   :  { %v5485_v38 = vpop.f32.mrb[187].mxu0 }
 0x87c   :  { %v5486_v37 = vadd.f32 %v5485_v38, %v5484_v47 }
 0x880   :  { %v5487_v27 = vpop.f32.mrb[188].mxu0 }
 0x881   :  { %v5488_v32 = vpop.f32.mrb[189].mxu0 }
 0x882   :  { %v5489_v33 = vadd.f32 %v5488_v32, %v5487_v27  ;;  %v5490_v3 = vpop.f32.mrb[190].mxu0 }
 0x883   :  { %v5491_v61 = vpop.f32.mrb[191].mxu0 }
 0x884   :  { %v5135_v45 = vmax.f32 %v5483_v23, %v5489_v33  ;;  %v5492_v55 = vadd.f32 %v5491_v61, %v5490_v3 }
 0x886   :  { %v5136_v57 = vmax.f32 %v5486_v37, %v5492_v55 }
 0x888   :  { %v5493_v34 = vpop.f32.mrb[192].mxu0 }
 0x889   :  { %v5494_v63 = vpop.f32.mrb[193].mxu0 }
 0x88a   :  { %v5495_v11 = vadd.f32 %v5494_v63, %v5493_v34  ;;  %v5496_v52 = vpop.f32.mrb[194].mxu0 }
 0x88b   :  { %v5497_v15 = vpop.f32.mrb[195].mxu0 }
 0x88c   :  { %v5137_v17 = vmax.f32 %v5135_v45, %v5495_v11  ;;  %v5498_v21 = vadd.f32 %v5497_v15, %v5496_v52 }
 0x88e   :  { %v5146_v26 = vadd.f32 %v5403_v24, %v5137_v17  ;;  %v5138_v28 = vmax.f32 %v5136_v57, %v5498_v21 }
 0x890   :  { %5148 = vst [vmem:[%s8814_s12] sm:$0xff] %v5146_v26  ;;  %v5147_v8 = vadd.f32 %v5403_v24, %v5138_v28 }
 0x892   :  { %5149 = vst [vmem:[%s8814_s12 + $0x8] sm:$0xff] %v5147_v8 }

</bundles_post_ra>
